<compile_context>
chip_gen: v7x
topology: tpu7x:2x2x1
jax: 0.10.0
libtpu: 0.0.40
codegen_flags: <defaults>
</compile_context>

<pallas_src>
import functools

import jax
import jax.numpy as jnp
import numpy as np
from jax.experimental import pallas as pl
from jax.experimental.pallas import tpu as pltpu


# ----------------------------------------------------------------------------
# In-kernel building blocks (traced inside the single fused Pallas kernel)
# ----------------------------------------------------------------------------
def _bn_relu(y, gamma, beta, inv_count, eps, mask=None):
    """Train-mode BatchNorm (batch stats, biased var) + affine + ReLU.

    y: [B, C] f32.  mask (optional): [B, C] f32 lane-dense mask, 1 on rows that
    are real conv outputs, 0 on wrap/garbage rows (excluded from the stats).
    """
    if mask is None:
        mean = jnp.sum(y, axis=0, keepdims=True) * inv_count
        d = y - mean
    else:
        mean = jnp.sum(y * mask, axis=0, keepdims=True) * inv_count
        d = (y - mean) * mask
    var = jnp.sum(d * d, axis=0, keepdims=True) * inv_count
    y_hat = (y - mean) * jax.lax.rsqrt(var + eps)
    return jnp.maximum(y_hat * gamma + beta, 0.0)


def _conv3x3_bigk(src_ref, patch_ref, w_ref, frame_w, rows):
    """3x3 'valid' conv over a flat [*, C] bf16 frame as ONE big-K MXU matmul.

    The 9 shifted [rows, C] views of the frame are copied into the shared
    [*, 9*C] bf16 im2col scratch and contracted against the [9*C, C] bf16
    weight in a single jnp.dot with f32 accumulation.
    """
    c = w_ref.shape[1]
    for dy in range(3):
        for dx in range(3):
            t = dy * 3 + dx
            off = dy * frame_w + dx
            patch_ref[0:rows, t * c:(t + 1) * c] = src_ref[off:off + rows, :]
    return jnp.dot(patch_ref[0:rows, :], w_ref[...],
                   preferred_element_type=jnp.float32)


def _maxpool2x2(src_ref, dst_ref, *, n_batch, src_sample_stride, src_frame_w,
                hp, wp, dst0):
    """2x2 / stride-2 max-pool (floor mode) from a flat [*, C] frame.

    Vectorized: per output row (ni, p) issue 4 strided [wp, C] loads (even/odd
    columns of frame rows 2p and 2p+1), 3 maxes and ONE [wp, C] store.
    """
    for ni in range(n_batch):
        for p in range(hp):
            row0 = ni * src_sample_stride + (2 * p) * src_frame_w
            row1 = row0 + src_frame_w
            t0 = src_ref[pl.ds(row0, wp, stride=2), :]
            t1 = src_ref[pl.ds(row0 + 1, wp, stride=2), :]
            b0 = src_ref[pl.ds(row1, wp, stride=2), :]
            b1 = src_ref[pl.ds(row1 + 1, wp, stride=2), :]
            pooled = jnp.maximum(jnp.maximum(t0, t1), jnp.maximum(b0, b1))
            d0 = dst0(ni, p)
            dst_ref[d0:d0 + wp, :] = pooled.astype(dst_ref.dtype)


# ----------------------------------------------------------------------------
# The fused kernel: conv1+BN+ReLU -> pool -> conv2+BN+ReLU -> pool ->
#                   conv3(pad1)+BN+ReLU -> conv4(pad1)+BN+ReLU
# ----------------------------------------------------------------------------
def _fused_cnn_kernel(xp_ref, w1_ref, w2_ref, w3_ref, w4_ref,
                      gam_ref, bet_ref, m2_ref, m34_ref,
                      o_ref,
                      a1_ref, f2_ref, a2_ref, f3_ref, patch_ref,
                      *, n, h1, w1o, hp1, wp1, hp2, wp2, f3w, f3hw,
                      inv_counts, eps):
    b2 = m2_ref.shape[0]          # computed base rows in the layer-2 frame
    b3 = m34_ref.shape[0]         # computed base rows in the layer-3/4 frame

    # ---- layer 1: dense im2col patches (built in the wrapper) -> one MXU matmul.
    y1 = jnp.dot(xp_ref[...], w1_ref[...], preferred_element_type=jnp.float32)
    a1_ref[...] = _bn_relu(y1, gam_ref[0:1, :], bet_ref[0:1, :],
                           inv_counts[0], eps)

    # ---- MaxPool2d(2) on layer 1 -> dense bf16 layer-2 input frame f2 [N*hp1*wp1, C]
    _maxpool2x2(a1_ref, f2_ref, n_batch=n, src_sample_stride=h1 * w1o,
                src_frame_w=w1o, hp=hp1, wp=wp1,
                dst0=lambda ni, p: ni * hp1 * wp1 + p * wp1)

    # ---- layer 2: Conv(64->64, pad=0) as one big-K MXU matmul + masked BN + ReLU
    y2 = _conv3x3_bigk(f2_ref, patch_ref, w2_ref, wp1, b2)
    a2_ref[...] = _bn_relu(y2, gam_ref[1:2, :], bet_ref[1:2, :],
                           inv_counts[1], eps, mask=m2_ref[...])

    # ---- MaxPool2d(2) on layer 2, written into the interior of the zero-padded
    #      (pad=1) bf16 layer-3/4 frame f3 [N*f3hw, C]
    f3_ref[...] = jnp.zeros(f3_ref.shape, f3_ref.dtype)
    _maxpool2x2(a2_ref, f3_ref, n_batch=n, src_sample_stride=hp1 * wp1,
                src_frame_w=wp1, hp=hp2, wp=wp2,
                dst0=lambda ni, p: ni * f3hw + (p + 1) * f3w + 1)

    # ---- layer 3: Conv(64->64, pad=1) big-K MXU + masked BN + ReLU
    y3 = _conv3x3_bigk(f3_ref, patch_ref, w3_ref, f3w, b3)
    y3 = _bn_relu(y3, gam_ref[2:3, :], bet_ref[2:3, :],
                  inv_counts[2], eps, mask=m34_ref[...])

    # In-place scatter: write y3's valid rows back into f3's interior (border rows
    # stay zero), so layer 4 reuses the same padded frame -- no separate f4 buffer.
    for ni in range(n):
        for i in range(hp2):
            src = ni * f3hw + i * f3w
            dst = ni * f3hw + (i + 1) * f3w + 1
            f3_ref[dst:dst + wp2, :] = y3[src:src + wp2, :].astype(f3_ref.dtype)

    # ---- layer 4: Conv(64->64, pad=1) big-K MXU + masked BN + ReLU
    y4 = _conv3x3_bigk(f3_ref, patch_ref, w4_ref, f3w, b3)
    y4 = _bn_relu(y4, gam_ref[3:4, :], bet_ref[3:4, :],
                  inv_counts[2], eps, mask=m34_ref[...])

    # Compact the valid rows into the dense NHWC-flat output [N*hp2*wp2, C].
    for ni in range(n):
        for i in range(hp2):
            src = ni * f3hw + i * f3w
            dst = ni * hp2 * wp2 + i * wp2
            o_ref[dst:dst + wp2, :] = y4[src:src + wp2, :]


# ----------------------------------------------------------------------------
# Wrapper
# ----------------------------------------------------------------------------
def _valid_mask(frame_h, frame_w, out_h, out_w, rows, c):
    """Lane-dense [rows, c] f32 mask: 1 where the flat-frame base row is a real
    conv output; also returns the valid-row count for the BN statistics."""
    idx = np.arange(rows)
    rr = idx % (frame_h * frame_w)
    valid = ((rr // frame_w) < out_h) & ((rr % frame_w) < out_w)
    mask = np.repeat(valid.astype(np.float32)[:, None], c, axis=1)
    return jnp.asarray(mask), float(valid.sum())


@jax.jit
def cnn_encoder_forward(x_nchw, params):
    n, cin, h, w = x_nchw.shape
    assert cin == 1, "CNNEncoder layer1 expects a single input channel"
    c = params[0][0].shape[-1]

    h1, w1o = h - 2, w - 2                  # layer-1 conv output
    hp1, wp1 = h1 // 2, w1o // 2            # after MaxPool2d(2)
    h2, w2o = hp1 - 2, wp1 - 2              # layer-2 conv output
    hp2, wp2 = h2 // 2, w2o // 2            # after MaxPool2d(2); layers 3/4 keep this
    assert hp2 >= 1 and wp2 >= 1, "input spatially too small for CNNEncoder"
    f3h, f3w = hp2 + 2, wp2 + 2             # zero-padded frame for the pad=1 convs
    f3hw = f3h * f3w

    b2 = n * hp1 * wp1 - (2 * wp1 + 2)      # computed base rows per flat frame
    b3 = n * f3hw - (2 * f3w + 2)

    m2, c2 = _valid_mask(hp1, wp1, h2, w2o, b2, c)
    m34, c34 = _valid_mask(f3h, f3w, hp2, wp2, b3, c)

    # Layer-1 im2col hoisted to the wrapper (lane-dense [rows, 9] patches): conv1
    # becomes one MXU matmul and the layer-1 frame is dense (no mask / garbage rows).
    x_img = x_nchw[:, 0, :, :]
    taps = [x_img[:, dy:dy + h1, dx:dx + w1o].reshape(n * h1 * w1o, 1)
            for dy in range(3) for dx in range(3)]
    x_patch = jnp.concatenate(taps, axis=1)                         # [n*h1*w1o, 9] f32

    # Conv biases (params[i][1]) intentionally unused: a per-channel constant added
    # before train-mode BatchNorm is exactly cancelled by the mean subtraction.
    w1 = params[0][0].reshape(9, c)                                  # f32
    w2 = params[1][0].reshape(9 * c, c).astype(jnp.bfloat16)         # bf16 (MXU)
    w3 = params[2][0].reshape(9 * c, c).astype(jnp.bfloat16)
    w4 = params[3][0].reshape(9 * c, c).astype(jnp.bfloat16)
    gammas = jnp.stack([p[2] for p in params], axis=0)               # [4, C]
    betas = jnp.stack([p[3] for p in params], axis=0)                # [4, C]

    kernel = functools.partial(
        _fused_cnn_kernel,
        n=n, h1=h1, w1o=w1o, hp1=hp1, wp1=wp1, hp2=hp2, wp2=wp2,
        f3w=f3w, f3hw=f3hw,
        inv_counts=(1.0 / float(n * h1 * w1o), 1.0 / c2, 1.0 / c34), eps=1e-5)

    inputs = (x_patch, w1, w2, w3, w4, gammas, betas, m2, m34)
    out_flat = pl.pallas_call(
        kernel,
        out_shape=jax.ShapeDtypeStruct((n * hp2 * wp2, c), jnp.float32),
        in_specs=[pl.BlockSpec(memory_space=pltpu.MemorySpace.VMEM)] * len(inputs),
        out_specs=pl.BlockSpec(memory_space=pltpu.MemorySpace.VMEM),
        scratch_shapes=[
            pltpu.VMEM((n * h1 * w1o, c), jnp.float32),      # a1: layer-1 act (dense)
            pltpu.VMEM((n * hp1 * wp1, c), jnp.bfloat16),    # f2: pooled layer-1 (bf16)
            pltpu.VMEM((b2, c), jnp.float32),                # a2: layer-2 act (frame)
            pltpu.VMEM((n * f3hw, c), jnp.bfloat16),         # f3: padded layer-3/4 frame
            pltpu.VMEM((max(b2, b3), 9 * c), jnp.bfloat16),  # shared bf16 im2col patch
        ],
    )(*inputs)

    out = out_flat.reshape(n, hp2, wp2, c)
    return jnp.transpose(out, (0, 3, 1, 2))                  # back to NCHW


# ----------------------------------------------------------------------------
# Parameters + pure-JAX reference (for a loose numerical sanity check)
# ----------------------------------------------------------------------------
def init_params(key):
    """Deterministic init. Conv weights stored as [3, 3, Cin, Cout]."""
    cins = [1, 64, 64, 64]
    cout = 64
    params = []
    for i, cin in enumerate(cins):
        kw, kb, kg, kbt = jax.random.split(jax.random.fold_in(key, i), 4)
        scale = 1.0 / jnp.sqrt(jnp.float32(cin * 9))
        wgt = jax.random.normal(kw, (3, 3, cin, cout), jnp.float32) * scale
        bias = jax.random.normal(kb, (cout,), jnp.float32) * 0.01  # cancelled by BN
        gamma = 1.0 + 0.1 * jax.random.normal(kg, (cout,), jnp.float32)
        beta = 0.1 * jax.random.normal(kbt, (cout,), jnp.float32)
        params.append((wgt, bias, gamma, beta))
    return params


def _reference_forward(x_nchw, params):
    """Plain-JAX (non-Pallas) f32 reference of CNNEncoder's forward."""
    def conv3x3(x_nhwc, wk, bias, pad):
        if pad:
            x_nhwc = jnp.pad(x_nhwc, ((0, 0), (1, 1), (1, 1), (0, 0)))
        _, hh, ww, _ = x_nhwc.shape
        ho, wo = hh - 2, ww - 2
        out = None
        for dy in range(3):
            for dx in range(3):
                term = jnp.einsum('nhwc,cd->nhwd',
                                  x_nhwc[:, dy:dy + ho, dx:dx + wo, :], wk[dy, dx])
                out = term if out is None else out + term
        return out + bias

    def bn_relu(y, g, bt):
        mean = jnp.mean(y, axis=(0, 1, 2), keepdims=True)
        var = jnp.var(y, axis=(0, 1, 2), keepdims=True)
        return jnp.maximum((y - mean) * jax.lax.rsqrt(var + 1e-5) * g + bt, 0.0)

    def pool2(y):
        nn_, hh, ww, cc = y.shape
        y = y[:, :hh // 2 * 2, :ww // 2 * 2, :]
        y = y.reshape(nn_, hh // 2, 2, ww // 2, 2, cc)
        return jnp.max(y, axis=(2, 4))

    x = jnp.transpose(x_nchw, (0, 2, 3, 1))
    wk, bs, g, bt = params[0]
    x = pool2(bn_relu(conv3x3(x, wk, bs, False), g, bt))
    wk, bs, g, bt = params[1]
    x = pool2(bn_relu(conv3x3(x, wk, bs, False), g, bt))
    wk, bs, g, bt = params[2]
    x = bn_relu(conv3x3(x, wk, bs, True), g, bt)
    wk, bs, g, bt = params[3]
    x = bn_relu(conv3x3(x, wk, bs, True), g, bt)
    return jnp.transpose(x, (0, 3, 1, 2))


if __name__ == "__main__":
    key = jax.random.PRNGKey(0)
    kx, kp = jax.random.split(key)

    # Small input consistent with Conv2d(1, 64, ...): [N=2, C=1, H=16, W=16].
    x = jax.random.normal(kx, (2, 1, 16, 16), jnp.float32)
    params = init_params(kp)

    out = jax.block_until_ready(cnn_encoder_forward(x, params))

    # 16 -> conv(14) -> pool(7) -> conv(5) -> pool(2) -> conv pad1 (2) -> conv pad1 (2)
    assert out.shape == (2, 64, 2, 2), out.shape
    assert bool(jnp.all(jnp.isfinite(out)))

    # Loose tolerance: kernel uses bf16 MXU operands / bf16 frames (f32 accumulation
    # and f32 BN statistics).
    ref = jax.block_until_ready(_reference_forward(x, params))
    np.testing.assert_allclose(np.asarray(out), np.asarray(ref), rtol=0.1, atol=0.1)

    print("KERNEL_OK")
</pallas_src>

<mosaic_0001>
module attributes {stable_mosaic.version = 11 : i64} {
  func.func @_fused_cnn_kernel(%arg0: memref<392x9xf32, #tpu.memory_space<vmem>>, %arg1: memref<9x64xf32, #tpu.memory_space<vmem>>, %arg2: memref<576x64xbf16, #tpu.memory_space<vmem>>, %arg3: memref<576x64xbf16, #tpu.memory_space<vmem>>, %arg4: memref<576x64xbf16, #tpu.memory_space<vmem>>, %arg5: memref<4x64xf32, #tpu.memory_space<vmem>>, %arg6: memref<4x64xf32, #tpu.memory_space<vmem>>, %arg7: memref<82x64xf32, #tpu.memory_space<vmem>>, %arg8: memref<22x64xf32, #tpu.memory_space<vmem>>, %arg9: memref<8x64xf32, #tpu.memory_space<vmem>>, %arg10: memref<392x64xf32, #tpu.memory_space<vmem>>, %arg11: memref<98x64xbf16, #tpu.memory_space<vmem>>, %arg12: memref<82x64xf32, #tpu.memory_space<vmem>>, %arg13: memref<32x64xbf16, #tpu.memory_space<vmem>>, %arg14: memref<82x576xbf16, #tpu.memory_space<vmem>>) attributes {dimension_semantics = [], scalar_prefetch = 0 : i64, scratch_operands = 5 : i64, tpu.core_type = #tpu.core_type<tc>} {
    %c0 = arith.constant 0 : index
    %c0_0 = arith.constant 0 : index
    %0 = vector.load %arg0[%c0, %c0_0] : memref<392x9xf32, #tpu.memory_space<vmem>>, vector<392x9xf32>
    %c0_1 = arith.constant 0 : index
    %c0_2 = arith.constant 0 : index
    %1 = vector.load %arg1[%c0_1, %c0_2] : memref<9x64xf32, #tpu.memory_space<vmem>>, vector<9x64xf32>
    %cst = arith.constant dense<0.000000e+00> : vector<392x64xf32>
    %2 = tpu.matmul %0, %1, %cst {dimension_numbers = #tpu.dot_dimension_numbers<[1], [0], [0], [1], [0, 0, 1, 1], [], []>} : vector<392x9xf32>, vector<9x64xf32>, vector<392x64xf32> -> vector<392x64xf32>
    %c0_3 = arith.constant 0 : index
    %c0_4 = arith.constant 0 : index
    %3 = vector.load %arg5[%c0_3, %c0_4] : memref<4x64xf32, #tpu.memory_space<vmem>>, vector<1x64xf32>
    %c0_5 = arith.constant 0 : index
    %c0_6 = arith.constant 0 : index
    %4 = vector.load %arg6[%c0_5, %c0_6] : memref<4x64xf32, #tpu.memory_space<vmem>>, vector<1x64xf32>
    %cst_7 = arith.constant dense<0.000000e+00> : vector<64xf32>
    %5 = vector.multi_reduction <add>, %2, %cst_7 [0] : vector<392x64xf32> to vector<64xf32>
    %6 = vector.shape_cast %5 : vector<64xf32> to vector<1x64xf32>
    %cst_8 = arith.constant 0.00255102036 : f32
    %7 = vector.broadcast %cst_8 : f32 to vector<1x64xf32>
    %8 = arith.mulf %6, %7 : vector<1x64xf32>
    %9 = vector.broadcast %8 : vector<1x64xf32> to vector<392x64xf32>
    %10 = arith.subf %2, %9 : vector<392x64xf32>
    %11 = arith.mulf %10, %10 : vector<392x64xf32>
    %cst_9 = arith.constant dense<0.000000e+00> : vector<64xf32>
    %12 = vector.multi_reduction <add>, %11, %cst_9 [0] : vector<392x64xf32> to vector<64xf32>
    %13 = vector.shape_cast %12 : vector<64xf32> to vector<1x64xf32>
    %cst_10 = arith.constant 0.00255102036 : f32
    %14 = vector.broadcast %cst_10 : f32 to vector<1x64xf32>
    %15 = arith.mulf %13, %14 : vector<1x64xf32>
    %16 = vector.broadcast %8 : vector<1x64xf32> to vector<392x64xf32>
    %17 = arith.subf %2, %16 : vector<392x64xf32>
    %cst_11 = arith.constant 9.99999974E-6 : f32
    %18 = vector.broadcast %cst_11 : f32 to vector<1x64xf32>
    %19 = arith.addf %15, %18 : vector<1x64xf32>
    %20 = math.rsqrt %19 : vector<1x64xf32>
    %21 = vector.broadcast %20 : vector<1x64xf32> to vector<392x64xf32>
    %22 = arith.mulf %17, %21 : vector<392x64xf32>
    %23 = vector.broadcast %3 : vector<1x64xf32> to vector<392x64xf32>
    %24 = arith.mulf %22, %23 : vector<392x64xf32>
    %25 = vector.broadcast %4 : vector<1x64xf32> to vector<392x64xf32>
    %26 = arith.addf %24, %25 : vector<392x64xf32>
    %cst_12 = arith.constant 0.000000e+00 : f32
    %27 = vector.broadcast %cst_12 : f32 to vector<392x64xf32>
    %28 = arith.maximumf %26, %27 : vector<392x64xf32>
    %c0_13 = arith.constant 0 : index
    %c0_14 = arith.constant 0 : index
    %29 = vector.load %arg10[%c0_13, %c0_14] : memref<392x64xf32, #tpu.memory_space<vmem>>, vector<392x64xf32>
    tpu.vector_store %arg10[%c0_13, %c0_14], %28 {strides = array<i32>} : memref<392x64xf32, #tpu.memory_space<vmem>>, vector<392x64xf32>,
    %c0_15 = arith.constant 0 : index
    %c0_16 = arith.constant 0 : index
    %30 = tpu.strided_load %arg10[%c0_15, %c0_16] {strides = array<i32: 2, 1>} : memref<392x64xf32, #tpu.memory_space<vmem>>, vector<7x64xf32>
    %c1 = arith.constant 1 : index
    %c0_17 = arith.constant 0 : index
    %31 = tpu.strided_load %arg10[%c1, %c0_17] {strides = array<i32: 2, 1>} : memref<392x64xf32, #tpu.memory_space<vmem>>, vector<7x64xf32>
    %c14 = arith.constant 14 : index
    %c0_18 = arith.constant 0 : index
    %32 = tpu.strided_load %arg10[%c14, %c0_18] {strides = array<i32: 2, 1>} : memref<392x64xf32, #tpu.memory_space<vmem>>, vector<7x64xf32>
    %c15 = arith.constant 15 : index
    %c0_19 = arith.constant 0 : index
    %33 = tpu.strided_load %arg10[%c15, %c0_19] {strides = array<i32: 2, 1>} : memref<392x64xf32, #tpu.memory_space<vmem>>, vector<7x64xf32>
    %34 = arith.maximumf %30, %31 : vector<7x64xf32>
    %35 = arith.maximumf %32, %33 : vector<7x64xf32>
    %36 = arith.maximumf %34, %35 : vector<7x64xf32>
    %37 = arith.truncf %36 : vector<7x64xf32> to vector<7x64xbf16>
    %c0_20 = arith.constant 0 : index
    %c0_21 = arith.constant 0 : index
    %38 = vector.load %arg11[%c0_20, %c0_21] : memref<98x64xbf16, #tpu.memory_space<vmem>>, vector<7x64xbf16>
    tpu.vector_store %arg11[%c0_20, %c0_21], %37 {strides = array<i32>} : memref<98x64xbf16, #tpu.memory_space<vmem>>, vector<7x64xbf16>,
    %c28 = arith.constant 28 : index
    %c0_22 = arith.constant 0 : index
    %39 = tpu.strided_load %arg10[%c28, %c0_22] {strides = array<i32: 2, 1>} : memref<392x64xf32, #tpu.memory_space<vmem>>, vector<7x64xf32>
    %c29 = arith.constant 29 : index
    %c0_23 = arith.constant 0 : index
    %40 = tpu.strided_load %arg10[%c29, %c0_23] {strides = array<i32: 2, 1>} : memref<392x64xf32, #tpu.memory_space<vmem>>, vector<7x64xf32>
    %c42 = arith.constant 42 : index
    %c0_24 = arith.constant 0 : index
    %41 = tpu.strided_load %arg10[%c42, %c0_24] {strides = array<i32: 2, 1>} : memref<392x64xf32, #tpu.memory_space<vmem>>, vector<7x64xf32>
    %c43 = arith.constant 43 : index
    %c0_25 = arith.constant 0 : index
    %42 = tpu.strided_load %arg10[%c43, %c0_25] {strides = array<i32: 2, 1>} : memref<392x64xf32, #tpu.memory_space<vmem>>, vector<7x64xf32>
    %43 = arith.maximumf %39, %40 : vector<7x64xf32>
    %44 = arith.maximumf %41, %42 : vector<7x64xf32>
    %45 = arith.maximumf %43, %44 : vector<7x64xf32>
    %46 = arith.truncf %45 : vector<7x64xf32> to vector<7x64xbf16>
    %c7 = arith.constant 7 : index
    %c0_26 = arith.constant 0 : index
    %47 = vector.load %arg11[%c7, %c0_26] : memref<98x64xbf16, #tpu.memory_space<vmem>>, vector<7x64xbf16>
    tpu.vector_store %arg11[%c7, %c0_26], %46 {strides = array<i32>} : memref<98x64xbf16, #tpu.memory_space<vmem>>, vector<7x64xbf16>,
    %c56 = arith.constant 56 : index
    %c0_27 = arith.constant 0 : index
    %48 = tpu.strided_load %arg10[%c56, %c0_27] {strides = array<i32: 2, 1>} : memref<392x64xf32, #tpu.memory_space<vmem>>, vector<7x64xf32>
    %c57 = arith.constant 57 : index
    %c0_28 = arith.constant 0 : index
    %49 = tpu.strided_load %arg10[%c57, %c0_28] {strides = array<i32: 2, 1>} : memref<392x64xf32, #tpu.memory_space<vmem>>, vector<7x64xf32>
    %c70 = arith.constant 70 : index
    %c0_29 = arith.constant 0 : index
    %50 = tpu.strided_load %arg10[%c70, %c0_29] {strides = array<i32: 2, 1>} : memref<392x64xf32, #tpu.memory_space<vmem>>, vector<7x64xf32>
    %c71 = arith.constant 71 : index
    %c0_30 = arith.constant 0 : index
    %51 = tpu.strided_load %arg10[%c71, %c0_30] {strides = array<i32: 2, 1>} : memref<392x64xf32, #tpu.memory_space<vmem>>, vector<7x64xf32>
    %52 = arith.maximumf %48, %49 : vector<7x64xf32>
    %53 = arith.maximumf %50, %51 : vector<7x64xf32>
    %54 = arith.maximumf %52, %53 : vector<7x64xf32>
    %55 = arith.truncf %54 : vector<7x64xf32> to vector<7x64xbf16>
    %c14_31 = arith.constant 14 : index
    %c0_32 = arith.constant 0 : index
    %56 = vector.load %arg11[%c14_31, %c0_32] : memref<98x64xbf16, #tpu.memory_space<vmem>>, vector<7x64xbf16>
    tpu.vector_store %arg11[%c14_31, %c0_32], %55 {strides = array<i32>} : memref<98x64xbf16, #tpu.memory_space<vmem>>, vector<7x64xbf16>,
    %c84 = arith.constant 84 : index
    %c0_33 = arith.constant 0 : index
    %57 = tpu.strided_load %arg10[%c84, %c0_33] {strides = array<i32: 2, 1>} : memref<392x64xf32, #tpu.memory_space<vmem>>, vector<7x64xf32>
    %c85 = arith.constant 85 : index
    %c0_34 = arith.constant 0 : index
    %58 = tpu.strided_load %arg10[%c85, %c0_34] {strides = array<i32: 2, 1>} : memref<392x64xf32, #tpu.memory_space<vmem>>, vector<7x64xf32>
    %c98 = arith.constant 98 : index
    %c0_35 = arith.constant 0 : index
    %59 = tpu.strided_load %arg10[%c98, %c0_35] {strides = array<i32: 2, 1>} : memref<392x64xf32, #tpu.memory_space<vmem>>, vector<7x64xf32>
    %c99 = arith.constant 99 : index
    %c0_36 = arith.constant 0 : index
    %60 = tpu.strided_load %arg10[%c99, %c0_36] {strides = array<i32: 2, 1>} : memref<392x64xf32, #tpu.memory_space<vmem>>, vector<7x64xf32>
    %61 = arith.maximumf %57, %58 : vector<7x64xf32>
    %62 = arith.maximumf %59, %60 : vector<7x64xf32>
    %63 = arith.maximumf %61, %62 : vector<7x64xf32>
    %64 = arith.truncf %63 : vector<7x64xf32> to vector<7x64xbf16>
    %c21 = arith.constant 21 : index
    %c0_37 = arith.constant 0 : index
    %65 = vector.load %arg11[%c21, %c0_37] : memref<98x64xbf16, #tpu.memory_space<vmem>>, vector<7x64xbf16>
    tpu.vector_store %arg11[%c21, %c0_37], %64 {strides = array<i32>} : memref<98x64xbf16, #tpu.memory_space<vmem>>, vector<7x64xbf16>,
    %c112 = arith.constant 112 : index
    %c0_38 = arith.constant 0 : index
    %66 = tpu.strided_load %arg10[%c112, %c0_38] {strides = array<i32: 2, 1>} : memref<392x64xf32, #tpu.memory_space<vmem>>, vector<7x64xf32>
    %c113 = arith.constant 113 : index
    %c0_39 = arith.constant 0 : index
    %67 = tpu.strided_load %arg10[%c113, %c0_39] {strides = array<i32: 2, 1>} : memref<392x64xf32, #tpu.memory_space<vmem>>, vector<7x64xf32>
    %c126 = arith.constant 126 : index
    %c0_40 = arith.constant 0 : index
    %68 = tpu.strided_load %arg10[%c126, %c0_40] {strides = array<i32: 2, 1>} : memref<392x64xf32, #tpu.memory_space<vmem>>, vector<7x64xf32>
    %c127 = arith.constant 127 : index
    %c0_41 = arith.constant 0 : index
    %69 = tpu.strided_load %arg10[%c127, %c0_41] {strides = array<i32: 2, 1>} : memref<392x64xf32, #tpu.memory_space<vmem>>, vector<7x64xf32>
    %70 = arith.maximumf %66, %67 : vector<7x64xf32>
    %71 = arith.maximumf %68, %69 : vector<7x64xf32>
    %72 = arith.maximumf %70, %71 : vector<7x64xf32>
    %73 = arith.truncf %72 : vector<7x64xf32> to vector<7x64xbf16>
    %c28_42 = arith.constant 28 : index
    %c0_43 = arith.constant 0 : index
    %74 = vector.load %arg11[%c28_42, %c0_43] : memref<98x64xbf16, #tpu.memory_space<vmem>>, vector<7x64xbf16>
    tpu.vector_store %arg11[%c28_42, %c0_43], %73 {strides = array<i32>} : memref<98x64xbf16, #tpu.memory_space<vmem>>, vector<7x64xbf16>,
    %c140 = arith.constant 140 : index
    %c0_44 = arith.constant 0 : index
    %75 = tpu.strided_load %arg10[%c140, %c0_44] {strides = array<i32: 2, 1>} : memref<392x64xf32, #tpu.memory_space<vmem>>, vector<7x64xf32>
    %c141 = arith.constant 141 : index
    %c0_45 = arith.constant 0 : index
    %76 = tpu.strided_load %arg10[%c141, %c0_45] {strides = array<i32: 2, 1>} : memref<392x64xf32, #tpu.memory_space<vmem>>, vector<7x64xf32>
    %c154 = arith.constant 154 : index
    %c0_46 = arith.constant 0 : index
    %77 = tpu.strided_load %arg10[%c154, %c0_46] {strides = array<i32: 2, 1>} : memref<392x64xf32, #tpu.memory_space<vmem>>, vector<7x64xf32>
    %c155 = arith.constant 155 : index
    %c0_47 = arith.constant 0 : index
    %78 = tpu.strided_load %arg10[%c155, %c0_47] {strides = array<i32: 2, 1>} : memref<392x64xf32, #tpu.memory_space<vmem>>, vector<7x64xf32>
    %79 = arith.maximumf %75, %76 : vector<7x64xf32>
    %80 = arith.maximumf %77, %78 : vector<7x64xf32>
    %81 = arith.maximumf %79, %80 : vector<7x64xf32>
    %82 = arith.truncf %81 : vector<7x64xf32> to vector<7x64xbf16>
    %c35 = arith.constant 35 : index
    %c0_48 = arith.constant 0 : index
    %83 = vector.load %arg11[%c35, %c0_48] : memref<98x64xbf16, #tpu.memory_space<vmem>>, vector<7x64xbf16>
    tpu.vector_store %arg11[%c35, %c0_48], %82 {strides = array<i32>} : memref<98x64xbf16, #tpu.memory_space<vmem>>, vector<7x64xbf16>,
    %c168 = arith.constant 168 : index
    %c0_49 = arith.constant 0 : index
    %84 = tpu.strided_load %arg10[%c168, %c0_49] {strides = array<i32: 2, 1>} : memref<392x64xf32, #tpu.memory_space<vmem>>, vector<7x64xf32>
    %c169 = arith.constant 169 : index
    %c0_50 = arith.constant 0 : index
    %85 = tpu.strided_load %arg10[%c169, %c0_50] {strides = array<i32: 2, 1>} : memref<392x64xf32, #tpu.memory_space<vmem>>, vector<7x64xf32>
    %c182 = arith.constant 182 : index
    %c0_51 = arith.constant 0 : index
    %86 = tpu.strided_load %arg10[%c182, %c0_51] {strides = array<i32: 2, 1>} : memref<392x64xf32, #tpu.memory_space<vmem>>, vector<7x64xf32>
    %c183 = arith.constant 183 : index
    %c0_52 = arith.constant 0 : index
    %87 = tpu.strided_load %arg10[%c183, %c0_52] {strides = array<i32: 2, 1>} : memref<392x64xf32, #tpu.memory_space<vmem>>, vector<7x64xf32>
    %88 = arith.maximumf %84, %85 : vector<7x64xf32>
    %89 = arith.maximumf %86, %87 : vector<7x64xf32>
    %90 = arith.maximumf %88, %89 : vector<7x64xf32>
    %91 = arith.truncf %90 : vector<7x64xf32> to vector<7x64xbf16>
    %c42_53 = arith.constant 42 : index
    %c0_54 = arith.constant 0 : index
    %92 = vector.load %arg11[%c42_53, %c0_54] : memref<98x64xbf16, #tpu.memory_space<vmem>>, vector<7x64xbf16>
    tpu.vector_store %arg11[%c42_53, %c0_54], %91 {strides = array<i32>} : memref<98x64xbf16, #tpu.memory_space<vmem>>, vector<7x64xbf16>,
    %c196 = arith.constant 196 : index
    %c0_55 = arith.constant 0 : index
    %93 = tpu.strided_load %arg10[%c196, %c0_55] {strides = array<i32: 2, 1>} : memref<392x64xf32, #tpu.memory_space<vmem>>, vector<7x64xf32>
    %c197 = arith.constant 197 : index
    %c0_56 = arith.constant 0 : index
    %94 = tpu.strided_load %arg10[%c197, %c0_56] {strides = array<i32: 2, 1>} : memref<392x64xf32, #tpu.memory_space<vmem>>, vector<7x64xf32>
    %c210 = arith.constant 210 : index
    %c0_57 = arith.constant 0 : index
    %95 = tpu.strided_load %arg10[%c210, %c0_57] {strides = array<i32: 2, 1>} : memref<392x64xf32, #tpu.memory_space<vmem>>, vector<7x64xf32>
    %c211 = arith.constant 211 : index
    %c0_58 = arith.constant 0 : index
    %96 = tpu.strided_load %arg10[%c211, %c0_58] {strides = array<i32: 2, 1>} : memref<392x64xf32, #tpu.memory_space<vmem>>, vector<7x64xf32>
    %97 = arith.maximumf %93, %94 : vector<7x64xf32>
    %98 = arith.maximumf %95, %96 : vector<7x64xf32>
    %99 = arith.maximumf %97, %98 : vector<7x64xf32>
    %100 = arith.truncf %99 : vector<7x64xf32> to vector<7x64xbf16>
    %c49 = arith.constant 49 : index
    %c0_59 = arith.constant 0 : index
    %101 = vector.load %arg11[%c49, %c0_59] : memref<98x64xbf16, #tpu.memory_space<vmem>>, vector<7x64xbf16>
    tpu.vector_store %arg11[%c49, %c0_59], %100 {strides = array<i32>} : memref<98x64xbf16, #tpu.memory_space<vmem>>, vector<7x64xbf16>,
    %c224 = arith.constant 224 : index
    %c0_60 = arith.constant 0 : index
    %102 = tpu.strided_load %arg10[%c224, %c0_60] {strides = array<i32: 2, 1>} : memref<392x64xf32, #tpu.memory_space<vmem>>, vector<7x64xf32>
    %c225 = arith.constant 225 : index
    %c0_61 = arith.constant 0 : index
    %103 = tpu.strided_load %arg10[%c225, %c0_61] {strides = array<i32: 2, 1>} : memref<392x64xf32, #tpu.memory_space<vmem>>, vector<7x64xf32>
    %c238 = arith.constant 238 : index
    %c0_62 = arith.constant 0 : index
    %104 = tpu.strided_load %arg10[%c238, %c0_62] {strides = array<i32: 2, 1>} : memref<392x64xf32, #tpu.memory_space<vmem>>, vector<7x64xf32>
    %c239 = arith.constant 239 : index
    %c0_63 = arith.constant 0 : index
    %105 = tpu.strided_load %arg10[%c239, %c0_63] {strides = array<i32: 2, 1>} : memref<392x64xf32, #tpu.memory_space<vmem>>, vector<7x64xf32>
    %106 = arith.maximumf %102, %103 : vector<7x64xf32>
    %107 = arith.maximumf %104, %105 : vector<7x64xf32>
    %108 = arith.maximumf %106, %107 : vector<7x64xf32>
    %109 = arith.truncf %108 : vector<7x64xf32> to vector<7x64xbf16>
    %c56_64 = arith.constant 56 : index
    %c0_65 = arith.constant 0 : index
    %110 = vector.load %arg11[%c56_64, %c0_65] : memref<98x64xbf16, #tpu.memory_space<vmem>>, vector<7x64xbf16>
    tpu.vector_store %arg11[%c56_64, %c0_65], %109 {strides = array<i32>} : memref<98x64xbf16, #tpu.memory_space<vmem>>, vector<7x64xbf16>,
    %c252 = arith.constant 252 : index
    %c0_66 = arith.constant 0 : index
    %111 = tpu.strided_load %arg10[%c252, %c0_66] {strides = array<i32: 2, 1>} : memref<392x64xf32, #tpu.memory_space<vmem>>, vector<7x64xf32>
    %c253 = arith.constant 253 : index
    %c0_67 = arith.constant 0 : index
    %112 = tpu.strided_load %arg10[%c253, %c0_67] {strides = array<i32: 2, 1>} : memref<392x64xf32, #tpu.memory_space<vmem>>, vector<7x64xf32>
    %c266 = arith.constant 266 : index
    %c0_68 = arith.constant 0 : index
    %113 = tpu.strided_load %arg10[%c266, %c0_68] {strides = array<i32: 2, 1>} : memref<392x64xf32, #tpu.memory_space<vmem>>, vector<7x64xf32>
    %c267 = arith.constant 267 : index
    %c0_69 = arith.constant 0 : index
    %114 = tpu.strided_load %arg10[%c267, %c0_69] {strides = array<i32: 2, 1>} : memref<392x64xf32, #tpu.memory_space<vmem>>, vector<7x64xf32>
    %115 = arith.maximumf %111, %112 : vector<7x64xf32>
    %116 = arith.maximumf %113, %114 : vector<7x64xf32>
    %117 = arith.maximumf %115, %116 : vector<7x64xf32>
    %118 = arith.truncf %117 : vector<7x64xf32> to vector<7x64xbf16>
    %c63 = arith.constant 63 : index
    %c0_70 = arith.constant 0 : index
    %119 = vector.load %arg11[%c63, %c0_70] : memref<98x64xbf16, #tpu.memory_space<vmem>>, vector<7x64xbf16>
    tpu.vector_store %arg11[%c63, %c0_70], %118 {strides = array<i32>} : memref<98x64xbf16, #tpu.memory_space<vmem>>, vector<7x64xbf16>,
    %c280 = arith.constant 280 : index
    %c0_71 = arith.constant 0 : index
    %120 = tpu.strided_load %arg10[%c280, %c0_71] {strides = array<i32: 2, 1>} : memref<392x64xf32, #tpu.memory_space<vmem>>, vector<7x64xf32>
    %c281 = arith.constant 281 : index
    %c0_72 = arith.constant 0 : index
    %121 = tpu.strided_load %arg10[%c281, %c0_72] {strides = array<i32: 2, 1>} : memref<392x64xf32, #tpu.memory_space<vmem>>, vector<7x64xf32>
    %c294 = arith.constant 294 : index
    %c0_73 = arith.constant 0 : index
    %122 = tpu.strided_load %arg10[%c294, %c0_73] {strides = array<i32: 2, 1>} : memref<392x64xf32, #tpu.memory_space<vmem>>, vector<7x64xf32>
    %c295 = arith.constant 295 : index
    %c0_74 = arith.constant 0 : index
    %123 = tpu.strided_load %arg10[%c295, %c0_74] {strides = array<i32: 2, 1>} : memref<392x64xf32, #tpu.memory_space<vmem>>, vector<7x64xf32>
    %124 = arith.maximumf %120, %121 : vector<7x64xf32>
    %125 = arith.maximumf %122, %123 : vector<7x64xf32>
    %126 = arith.maximumf %124, %125 : vector<7x64xf32>
    %127 = arith.truncf %126 : vector<7x64xf32> to vector<7x64xbf16>
    %c70_75 = arith.constant 70 : index
    %c0_76 = arith.constant 0 : index
    %128 = vector.load %arg11[%c70_75, %c0_76] : memref<98x64xbf16, #tpu.memory_space<vmem>>, vector<7x64xbf16>
    tpu.vector_store %arg11[%c70_75, %c0_76], %127 {strides = array<i32>} : memref<98x64xbf16, #tpu.memory_space<vmem>>, vector<7x64xbf16>,
    %c308 = arith.constant 308 : index
    %c0_77 = arith.constant 0 : index
    %129 = tpu.strided_load %arg10[%c308, %c0_77] {strides = array<i32: 2, 1>} : memref<392x64xf32, #tpu.memory_space<vmem>>, vector<7x64xf32>
    %c309 = arith.constant 309 : index
    %c0_78 = arith.constant 0 : index
    %130 = tpu.strided_load %arg10[%c309, %c0_78] {strides = array<i32: 2, 1>} : memref<392x64xf32, #tpu.memory_space<vmem>>, vector<7x64xf32>
    %c322 = arith.constant 322 : index
    %c0_79 = arith.constant 0 : index
    %131 = tpu.strided_load %arg10[%c322, %c0_79] {strides = array<i32: 2, 1>} : memref<392x64xf32, #tpu.memory_space<vmem>>, vector<7x64xf32>
    %c323 = arith.constant 323 : index
    %c0_80 = arith.constant 0 : index
    %132 = tpu.strided_load %arg10[%c323, %c0_80] {strides = array<i32: 2, 1>} : memref<392x64xf32, #tpu.memory_space<vmem>>, vector<7x64xf32>
    %133 = arith.maximumf %129, %130 : vector<7x64xf32>
    %134 = arith.maximumf %131, %132 : vector<7x64xf32>
    %135 = arith.maximumf %133, %134 : vector<7x64xf32>
    %136 = arith.truncf %135 : vector<7x64xf32> to vector<7x64xbf16>
    %c77 = arith.constant 77 : index
    %c0_81 = arith.constant 0 : index
    %137 = vector.load %arg11[%c77, %c0_81] : memref<98x64xbf16, #tpu.memory_space<vmem>>, vector<7x64xbf16>
    tpu.vector_store %arg11[%c77, %c0_81], %136 {strides = array<i32>} : memref<98x64xbf16, #tpu.memory_space<vmem>>, vector<7x64xbf16>,
    %c336 = arith.constant 336 : index
    %c0_82 = arith.constant 0 : index
    %138 = tpu.strided_load %arg10[%c336, %c0_82] {strides = array<i32: 2, 1>} : memref<392x64xf32, #tpu.memory_space<vmem>>, vector<7x64xf32>
    %c337 = arith.constant 337 : index
    %c0_83 = arith.constant 0 : index
    %139 = tpu.strided_load %arg10[%c337, %c0_83] {strides = array<i32: 2, 1>} : memref<392x64xf32, #tpu.memory_space<vmem>>, vector<7x64xf32>
    %c350 = arith.constant 350 : index
    %c0_84 = arith.constant 0 : index
    %140 = tpu.strided_load %arg10[%c350, %c0_84] {strides = array<i32: 2, 1>} : memref<392x64xf32, #tpu.memory_space<vmem>>, vector<7x64xf32>
    %c351 = arith.constant 351 : index
    %c0_85 = arith.constant 0 : index
    %141 = tpu.strided_load %arg10[%c351, %c0_85] {strides = array<i32: 2, 1>} : memref<392x64xf32, #tpu.memory_space<vmem>>, vector<7x64xf32>
    %142 = arith.maximumf %138, %139 : vector<7x64xf32>
    %143 = arith.maximumf %140, %141 : vector<7x64xf32>
    %144 = arith.maximumf %142, %143 : vector<7x64xf32>
    %145 = arith.truncf %144 : vector<7x64xf32> to vector<7x64xbf16>
    %c84_86 = arith.constant 84 : index
    %c0_87 = arith.constant 0 : index
    %146 = vector.load %arg11[%c84_86, %c0_87] : memref<98x64xbf16, #tpu.memory_space<vmem>>, vector<7x64xbf16>
    tpu.vector_store %arg11[%c84_86, %c0_87], %145 {strides = array<i32>} : memref<98x64xbf16, #tpu.memory_space<vmem>>, vector<7x64xbf16>,
    %c364 = arith.constant 364 : index
    %c0_88 = arith.constant 0 : index
    %147 = tpu.strided_load %arg10[%c364, %c0_88] {strides = array<i32: 2, 1>} : memref<392x64xf32, #tpu.memory_space<vmem>>, vector<7x64xf32>
    %c365 = arith.constant 365 : index
    %c0_89 = arith.constant 0 : index
    %148 = tpu.strided_load %arg10[%c365, %c0_89] {strides = array<i32: 2, 1>} : memref<392x64xf32, #tpu.memory_space<vmem>>, vector<7x64xf32>
    %c378 = arith.constant 378 : index
    %c0_90 = arith.constant 0 : index
    %149 = tpu.strided_load %arg10[%c378, %c0_90] {strides = array<i32: 2, 1>} : memref<392x64xf32, #tpu.memory_space<vmem>>, vector<7x64xf32>
    %c379 = arith.constant 379 : index
    %c0_91 = arith.constant 0 : index
    %150 = tpu.strided_load %arg10[%c379, %c0_91] {strides = array<i32: 2, 1>} : memref<392x64xf32, #tpu.memory_space<vmem>>, vector<7x64xf32>
    %151 = arith.maximumf %147, %148 : vector<7x64xf32>
    %152 = arith.maximumf %149, %150 : vector<7x64xf32>
    %153 = arith.maximumf %151, %152 : vector<7x64xf32>
    %154 = arith.truncf %153 : vector<7x64xf32> to vector<7x64xbf16>
    %c91 = arith.constant 91 : index
    %c0_92 = arith.constant 0 : index
    %155 = vector.load %arg11[%c91, %c0_92] : memref<98x64xbf16, #tpu.memory_space<vmem>>, vector<7x64xbf16>
    tpu.vector_store %arg11[%c91, %c0_92], %154 {strides = array<i32>} : memref<98x64xbf16, #tpu.memory_space<vmem>>, vector<7x64xbf16>,
    %c0_93 = arith.constant 0 : index
    %c0_94 = arith.constant 0 : index
    %156 = vector.load %arg11[%c0_93, %c0_94] : memref<98x64xbf16, #tpu.memory_space<vmem>>, vector<82x64xbf16>
    %c0_95 = arith.constant 0 : index
    %c0_96 = arith.constant 0 : index
    %157 = vector.load %arg14[%c0_95, %c0_96] : memref<82x576xbf16, #tpu.memory_space<vmem>>, vector<82x64xbf16>
    tpu.vector_store %arg14[%c0_95, %c0_96], %156 {strides = array<i32>} : memref<82x576xbf16, #tpu.memory_space<vmem>>, vector<82x64xbf16>,
    %c1_97 = arith.constant 1 : index
    %c0_98 = arith.constant 0 : index
    %158 = vector.load %arg11[%c1_97, %c0_98] : memref<98x64xbf16, #tpu.memory_space<vmem>>, vector<82x64xbf16>
    %c0_99 = arith.constant 0 : index
    %c64 = arith.constant 64 : index
    %159 = vector.load %arg14[%c0_99, %c64] : memref<82x576xbf16, #tpu.memory_space<vmem>>, vector<82x64xbf16>
    tpu.vector_store %arg14[%c0_99, %c64], %158 {strides = array<i32>} : memref<82x576xbf16, #tpu.memory_space<vmem>>, vector<82x64xbf16>,
    %c2 = arith.constant 2 : index
    %c0_100 = arith.constant 0 : index
    %160 = vector.load %arg11[%c2, %c0_100] : memref<98x64xbf16, #tpu.memory_space<vmem>>, vector<82x64xbf16>
    %c0_101 = arith.constant 0 : index
    %c128 = arith.constant 128 : index
    %161 = vector.load %arg14[%c0_101, %c128] : memref<82x576xbf16, #tpu.memory_space<vmem>>, vector<82x64xbf16>
    tpu.vector_store %arg14[%c0_101, %c128], %160 {strides = array<i32>} : memref<82x576xbf16, #tpu.memory_space<vmem>>, vector<82x64xbf16>,
    %c7_102 = arith.constant 7 : index
    %c0_103 = arith.constant 0 : index
    %162 = vector.load %arg11[%c7_102, %c0_103] : memref<98x64xbf16, #tpu.memory_space<vmem>>, vector<82x64xbf16>
    %c0_104 = arith.constant 0 : index
    %c192 = arith.constant 192 : index
    %163 = vector.load %arg14[%c0_104, %c192] : memref<82x576xbf16, #tpu.memory_space<vmem>>, vector<82x64xbf16>
    tpu.vector_store %arg14[%c0_104, %c192], %162 {strides = array<i32>} : memref<82x576xbf16, #tpu.memory_space<vmem>>, vector<82x64xbf16>,
    %c8 = arith.constant 8 : index
    %c0_105 = arith.constant 0 : index
    %164 = vector.load %arg11[%c8, %c0_105] : memref<98x64xbf16, #tpu.memory_space<vmem>>, vector<82x64xbf16>
    %c0_106 = arith.constant 0 : index
    %c256 = arith.constant 256 : index
    %165 = vector.load %arg14[%c0_106, %c256] : memref<82x576xbf16, #tpu.memory_space<vmem>>, vector<82x64xbf16>
    tpu.vector_store %arg14[%c0_106, %c256], %164 {strides = array<i32>} : memref<82x576xbf16, #tpu.memory_space<vmem>>, vector<82x64xbf16>,
    %c9 = arith.constant 9 : index
    %c0_107 = arith.constant 0 : index
    %166 = vector.load %arg11[%c9, %c0_107] : memref<98x64xbf16, #tpu.memory_space<vmem>>, vector<82x64xbf16>
    %c0_108 = arith.constant 0 : index
    %c320 = arith.constant 320 : index
    %167 = vector.load %arg14[%c0_108, %c320] : memref<82x576xbf16, #tpu.memory_space<vmem>>, vector<82x64xbf16>
    tpu.vector_store %arg14[%c0_108, %c320], %166 {strides = array<i32>} : memref<82x576xbf16, #tpu.memory_space<vmem>>, vector<82x64xbf16>,
    %c14_109 = arith.constant 14 : index
    %c0_110 = arith.constant 0 : index
    %168 = vector.load %arg11[%c14_109, %c0_110] : memref<98x64xbf16, #tpu.memory_space<vmem>>, vector<82x64xbf16>
    %c0_111 = arith.constant 0 : index
    %c384 = arith.constant 384 : index
    %169 = vector.load %arg14[%c0_111, %c384] : memref<82x576xbf16, #tpu.memory_space<vmem>>, vector<82x64xbf16>
    tpu.vector_store %arg14[%c0_111, %c384], %168 {strides = array<i32>} : memref<82x576xbf16, #tpu.memory_space<vmem>>, vector<82x64xbf16>,
    %c15_112 = arith.constant 15 : index
    %c0_113 = arith.constant 0 : index
    %170 = vector.load %arg11[%c15_112, %c0_113] : memref<98x64xbf16, #tpu.memory_space<vmem>>, vector<82x64xbf16>
    %c0_114 = arith.constant 0 : index
    %c448 = arith.constant 448 : index
    %171 = vector.load %arg14[%c0_114, %c448] : memref<82x576xbf16, #tpu.memory_space<vmem>>, vector<82x64xbf16>
    tpu.vector_store %arg14[%c0_114, %c448], %170 {strides = array<i32>} : memref<82x576xbf16, #tpu.memory_space<vmem>>, vector<82x64xbf16>,
    %c16 = arith.constant 16 : index
    %c0_115 = arith.constant 0 : index
    %172 = vector.load %arg11[%c16, %c0_115] : memref<98x64xbf16, #tpu.memory_space<vmem>>, vector<82x64xbf16>
    %c0_116 = arith.constant 0 : index
    %c512 = arith.constant 512 : index
    %173 = vector.load %arg14[%c0_116, %c512] : memref<82x576xbf16, #tpu.memory_space<vmem>>, vector<82x64xbf16>
    tpu.vector_store %arg14[%c0_116, %c512], %172 {strides = array<i32>} : memref<82x576xbf16, #tpu.memory_space<vmem>>, vector<82x64xbf16>,
    %c0_117 = arith.constant 0 : index
    %c0_118 = arith.constant 0 : index
    %174 = vector.load %arg14[%c0_117, %c0_118] : memref<82x576xbf16, #tpu.memory_space<vmem>>, vector<82x576xbf16>
    %c0_119 = arith.constant 0 : index
    %c0_120 = arith.constant 0 : index
    %175 = vector.load %arg2[%c0_119, %c0_120] : memref<576x64xbf16, #tpu.memory_space<vmem>>, vector<576x64xbf16>
    %cst_121 = arith.constant dense<0.000000e+00> : vector<82x64xf32>
    %176 = tpu.matmul %174, %175, %cst_121 {dimension_numbers = #tpu.dot_dimension_numbers<[1], [0], [0], [1], [0, 0, 1, 1], [], []>} : vector<82x576xbf16>, vector<576x64xbf16>, vector<82x64xf32> -> vector<82x64xf32>
    %c1_122 = arith.constant 1 : index
    %c0_123 = arith.constant 0 : index
    %177 = vector.load %arg5[%c1_122, %c0_123] : memref<4x64xf32, #tpu.memory_space<vmem>>, vector<1x64xf32>
    %c1_124 = arith.constant 1 : index
    %c0_125 = arith.constant 0 : index
    %178 = vector.load %arg6[%c1_124, %c0_125] : memref<4x64xf32, #tpu.memory_space<vmem>>, vector<1x64xf32>
    %c0_126 = arith.constant 0 : index
    %c0_127 = arith.constant 0 : index
    %179 = vector.load %arg7[%c0_126, %c0_127] : memref<82x64xf32, #tpu.memory_space<vmem>>, vector<82x64xf32>
    %180 = arith.mulf %176, %179 : vector<82x64xf32>
    %cst_128 = arith.constant dense<0.000000e+00> : vector<64xf32>
    %181 = vector.multi_reduction <add>, %180, %cst_128 [0] : vector<82x64xf32> to vector<64xf32>
    %182 = vector.shape_cast %181 : vector<64xf32> to vector<1x64xf32>
    %cst_129 = arith.constant 2.000000e-02 : f32
    %183 = vector.broadcast %cst_129 : f32 to vector<1x64xf32>
    %184 = arith.mulf %182, %183 : vector<1x64xf32>
    %185 = vector.broadcast %184 : vector<1x64xf32> to vector<82x64xf32>
    %186 = arith.subf %176, %185 : vector<82x64xf32>
    %187 = arith.mulf %186, %179 : vector<82x64xf32>
    %188 = arith.mulf %187, %187 : vector<82x64xf32>
    %cst_130 = arith.constant dense<0.000000e+00> : vector<64xf32>
    %189 = vector.multi_reduction <add>, %188, %cst_130 [0] : vector<82x64xf32> to vector<64xf32>
    %190 = vector.shape_cast %189 : vector<64xf32> to vector<1x64xf32>
    %cst_131 = arith.constant 2.000000e-02 : f32
    %191 = vector.broadcast %cst_131 : f32 to vector<1x64xf32>
    %192 = arith.mulf %190, %191 : vector<1x64xf32>
    %193 = vector.broadcast %184 : vector<1x64xf32> to vector<82x64xf32>
    %194 = arith.subf %176, %193 : vector<82x64xf32>
    %cst_132 = arith.constant 9.99999974E-6 : f32
    %195 = vector.broadcast %cst_132 : f32 to vector<1x64xf32>
    %196 = arith.addf %192, %195 : vector<1x64xf32>
    %197 = math.rsqrt %196 : vector<1x64xf32>
    %198 = vector.broadcast %197 : vector<1x64xf32> to vector<82x64xf32>
    %199 = arith.mulf %194, %198 : vector<82x64xf32>
    %200 = vector.broadcast %177 : vector<1x64xf32> to vector<82x64xf32>
    %201 = arith.mulf %199, %200 : vector<82x64xf32>
    %202 = vector.broadcast %178 : vector<1x64xf32> to vector<82x64xf32>
    %203 = arith.addf %201, %202 : vector<82x64xf32>
    %cst_133 = arith.constant 0.000000e+00 : f32
    %204 = vector.broadcast %cst_133 : f32 to vector<82x64xf32>
    %205 = arith.maximumf %203, %204 : vector<82x64xf32>
    %c0_134 = arith.constant 0 : index
    %c0_135 = arith.constant 0 : index
    %206 = vector.load %arg12[%c0_134, %c0_135] : memref<82x64xf32, #tpu.memory_space<vmem>>, vector<82x64xf32>
    tpu.vector_store %arg12[%c0_134, %c0_135], %205 {strides = array<i32>} : memref<82x64xf32, #tpu.memory_space<vmem>>, vector<82x64xf32>,
    %cst_136 = arith.constant 0.000000e+00 : bf16
    %207 = vector.broadcast %cst_136 : bf16 to vector<32x64xbf16>
    %c0_137 = arith.constant 0 : index
    %c0_138 = arith.constant 0 : index
    %208 = vector.load %arg13[%c0_137, %c0_138] : memref<32x64xbf16, #tpu.memory_space<vmem>>, vector<32x64xbf16>
    tpu.vector_store %arg13[%c0_137, %c0_138], %207 {strides = array<i32>} : memref<32x64xbf16, #tpu.memory_space<vmem>>, vector<32x64xbf16>,
    %c0_139 = arith.constant 0 : index
    %c0_140 = arith.constant 0 : index
    %209 = tpu.strided_load %arg12[%c0_139, %c0_140] {strides = array<i32: 2, 1>} : memref<82x64xf32, #tpu.memory_space<vmem>>, vector<2x64xf32>
    %c1_141 = arith.constant 1 : index
    %c0_142 = arith.constant 0 : index
    %210 = tpu.strided_load %arg12[%c1_141, %c0_142] {strides = array<i32: 2, 1>} : memref<82x64xf32, #tpu.memory_space<vmem>>, vector<2x64xf32>
    %c7_143 = arith.constant 7 : index
    %c0_144 = arith.constant 0 : index
    %211 = tpu.strided_load %arg12[%c7_143, %c0_144] {strides = array<i32: 2, 1>} : memref<82x64xf32, #tpu.memory_space<vmem>>, vector<2x64xf32>
    %c8_145 = arith.constant 8 : index
    %c0_146 = arith.constant 0 : index
    %212 = tpu.strided_load %arg12[%c8_145, %c0_146] {strides = array<i32: 2, 1>} : memref<82x64xf32, #tpu.memory_space<vmem>>, vector<2x64xf32>
    %213 = arith.maximumf %209, %210 : vector<2x64xf32>
    %214 = arith.maximumf %211, %212 : vector<2x64xf32>
    %215 = arith.maximumf %213, %214 : vector<2x64xf32>
    %216 = arith.truncf %215 : vector<2x64xf32> to vector<2x64xbf16>
    %c5 = arith.constant 5 : index
    %c0_147 = arith.constant 0 : index
    %217 = vector.load %arg13[%c5, %c0_147] : memref<32x64xbf16, #tpu.memory_space<vmem>>, vector<2x64xbf16>
    tpu.vector_store %arg13[%c5, %c0_147], %216 {strides = array<i32>} : memref<32x64xbf16, #tpu.memory_space<vmem>>, vector<2x64xbf16>,
    %c14_148 = arith.constant 14 : index
    %c0_149 = arith.constant 0 : index
    %218 = tpu.strided_load %arg12[%c14_148, %c0_149] {strides = array<i32: 2, 1>} : memref<82x64xf32, #tpu.memory_space<vmem>>, vector<2x64xf32>
    %c15_150 = arith.constant 15 : index
    %c0_151 = arith.constant 0 : index
    %219 = tpu.strided_load %arg12[%c15_150, %c0_151] {strides = array<i32: 2, 1>} : memref<82x64xf32, #tpu.memory_space<vmem>>, vector<2x64xf32>
    %c21_152 = arith.constant 21 : index
    %c0_153 = arith.constant 0 : index
    %220 = tpu.strided_load %arg12[%c21_152, %c0_153] {strides = array<i32: 2, 1>} : memref<82x64xf32, #tpu.memory_space<vmem>>, vector<2x64xf32>
    %c22 = arith.constant 22 : index
    %c0_154 = arith.constant 0 : index
    %221 = tpu.strided_load %arg12[%c22, %c0_154] {strides = array<i32: 2, 1>} : memref<82x64xf32, #tpu.memory_space<vmem>>, vector<2x64xf32>
    %222 = arith.maximumf %218, %219 : vector<2x64xf32>
    %223 = arith.maximumf %220, %221 : vector<2x64xf32>
    %224 = arith.maximumf %222, %223 : vector<2x64xf32>
    %225 = arith.truncf %224 : vector<2x64xf32> to vector<2x64xbf16>
    %c9_155 = arith.constant 9 : index
    %c0_156 = arith.constant 0 : index
    %226 = vector.load %arg13[%c9_155, %c0_156] : memref<32x64xbf16, #tpu.memory_space<vmem>>, vector<2x64xbf16>
    tpu.vector_store %arg13[%c9_155, %c0_156], %225 {strides = array<i32>} : memref<32x64xbf16, #tpu.memory_space<vmem>>, vector<2x64xbf16>,
    %c49_157 = arith.constant 49 : index
    %c0_158 = arith.constant 0 : index
    %227 = tpu.strided_load %arg12[%c49_157, %c0_158] {strides = array<i32: 2, 1>} : memref<82x64xf32, #tpu.memory_space<vmem>>, vector<2x64xf32>
    %c50 = arith.constant 50 : index
    %c0_159 = arith.constant 0 : index
    %228 = tpu.strided_load %arg12[%c50, %c0_159] {strides = array<i32: 2, 1>} : memref<82x64xf32, #tpu.memory_space<vmem>>, vector<2x64xf32>
    %c56_160 = arith.constant 56 : index
    %c0_161 = arith.constant 0 : index
    %229 = tpu.strided_load %arg12[%c56_160, %c0_161] {strides = array<i32: 2, 1>} : memref<82x64xf32, #tpu.memory_space<vmem>>, vector<2x64xf32>
    %c57_162 = arith.constant 57 : index
    %c0_163 = arith.constant 0 : index
    %230 = tpu.strided_load %arg12[%c57_162, %c0_163] {strides = array<i32: 2, 1>} : memref<82x64xf32, #tpu.memory_space<vmem>>, vector<2x64xf32>
    %231 = arith.maximumf %227, %228 : vector<2x64xf32>
    %232 = arith.maximumf %229, %230 : vector<2x64xf32>
    %233 = arith.maximumf %231, %232 : vector<2x64xf32>
    %234 = arith.truncf %233 : vector<2x64xf32> to vector<2x64xbf16>
    %c21_164 = arith.constant 21 : index
    %c0_165 = arith.constant 0 : index
    %235 = vector.load %arg13[%c21_164, %c0_165] : memref<32x64xbf16, #tpu.memory_space<vmem>>, vector<2x64xbf16>
    tpu.vector_store %arg13[%c21_164, %c0_165], %234 {strides = array<i32>} : memref<32x64xbf16, #tpu.memory_space<vmem>>, vector<2x64xbf16>,
    %c63_166 = arith.constant 63 : index
    %c0_167 = arith.constant 0 : index
    %236 = tpu.strided_load %arg12[%c63_166, %c0_167] {strides = array<i32: 2, 1>} : memref<82x64xf32, #tpu.memory_space<vmem>>, vector<2x64xf32>
    %c64_168 = arith.constant 64 : index
    %c0_169 = arith.constant 0 : index
    %237 = tpu.strided_load %arg12[%c64_168, %c0_169] {strides = array<i32: 2, 1>} : memref<82x64xf32, #tpu.memory_space<vmem>>, vector<2x64xf32>
    %c70_170 = arith.constant 70 : index
    %c0_171 = arith.constant 0 : index
    %238 = tpu.strided_load %arg12[%c70_170, %c0_171] {strides = array<i32: 2, 1>} : memref<82x64xf32, #tpu.memory_space<vmem>>, vector<2x64xf32>
    %c71_172 = arith.constant 71 : index
    %c0_173 = arith.constant 0 : index
    %239 = tpu.strided_load %arg12[%c71_172, %c0_173] {strides = array<i32: 2, 1>} : memref<82x64xf32, #tpu.memory_space<vmem>>, vector<2x64xf32>
    %240 = arith.maximumf %236, %237 : vector<2x64xf32>
    %241 = arith.maximumf %238, %239 : vector<2x64xf32>
    %242 = arith.maximumf %240, %241 : vector<2x64xf32>
    %243 = arith.truncf %242 : vector<2x64xf32> to vector<2x64xbf16>
    %c25 = arith.constant 25 : index
    %c0_174 = arith.constant 0 : index
    %244 = vector.load %arg13[%c25, %c0_174] : memref<32x64xbf16, #tpu.memory_space<vmem>>, vector<2x64xbf16>
    tpu.vector_store %arg13[%c25, %c0_174], %243 {strides = array<i32>} : memref<32x64xbf16, #tpu.memory_space<vmem>>, vector<2x64xbf16>,
    %c0_175 = arith.constant 0 : index
    %c0_176 = arith.constant 0 : index
    %245 = vector.load %arg13[%c0_175, %c0_176] : memref<32x64xbf16, #tpu.memory_space<vmem>>, vector<22x64xbf16>
    %c0_177 = arith.constant 0 : index
    %c0_178 = arith.constant 0 : index
    %246 = vector.load %arg14[%c0_177, %c0_178] : memref<82x576xbf16, #tpu.memory_space<vmem>>, vector<22x64xbf16>
    tpu.vector_store %arg14[%c0_177, %c0_178], %245 {strides = array<i32>} : memref<82x576xbf16, #tpu.memory_space<vmem>>, vector<22x64xbf16>,
    %c1_179 = arith.constant 1 : index
    %c0_180 = arith.constant 0 : index
    %247 = vector.load %arg13[%c1_179, %c0_180] : memref<32x64xbf16, #tpu.memory_space<vmem>>, vector<22x64xbf16>
    %c0_181 = arith.constant 0 : index
    %c64_182 = arith.constant 64 : index
    %248 = vector.load %arg14[%c0_181, %c64_182] : memref<82x576xbf16, #tpu.memory_space<vmem>>, vector<22x64xbf16>
    tpu.vector_store %arg14[%c0_181, %c64_182], %247 {strides = array<i32>} : memref<82x576xbf16, #tpu.memory_space<vmem>>, vector<22x64xbf16>,
    %c2_183 = arith.constant 2 : index
    %c0_184 = arith.constant 0 : index
    %249 = vector.load %arg13[%c2_183, %c0_184] : memref<32x64xbf16, #tpu.memory_space<vmem>>, vector<22x64xbf16>
    %c0_185 = arith.constant 0 : index
    %c128_186 = arith.constant 128 : index
    %250 = vector.load %arg14[%c0_185, %c128_186] : memref<82x576xbf16, #tpu.memory_space<vmem>>, vector<22x64xbf16>
    tpu.vector_store %arg14[%c0_185, %c128_186], %249 {strides = array<i32>} : memref<82x576xbf16, #tpu.memory_space<vmem>>, vector<22x64xbf16>,
    %c4 = arith.constant 4 : index
    %c0_187 = arith.constant 0 : index
    %251 = vector.load %arg13[%c4, %c0_187] : memref<32x64xbf16, #tpu.memory_space<vmem>>, vector<22x64xbf16>
    %c0_188 = arith.constant 0 : index
    %c192_189 = arith.constant 192 : index
    %252 = vector.load %arg14[%c0_188, %c192_189] : memref<82x576xbf16, #tpu.memory_space<vmem>>, vector<22x64xbf16>
    tpu.vector_store %arg14[%c0_188, %c192_189], %251 {strides = array<i32>} : memref<82x576xbf16, #tpu.memory_space<vmem>>, vector<22x64xbf16>,
    %c5_190 = arith.constant 5 : index
    %c0_191 = arith.constant 0 : index
    %253 = vector.load %arg13[%c5_190, %c0_191] : memref<32x64xbf16, #tpu.memory_space<vmem>>, vector<22x64xbf16>
    %c0_192 = arith.constant 0 : index
    %c256_193 = arith.constant 256 : index
    %254 = vector.load %arg14[%c0_192, %c256_193] : memref<82x576xbf16, #tpu.memory_space<vmem>>, vector<22x64xbf16>
    tpu.vector_store %arg14[%c0_192, %c256_193], %253 {strides = array<i32>} : memref<82x576xbf16, #tpu.memory_space<vmem>>, vector<22x64xbf16>,
    %c6 = arith.constant 6 : index
    %c0_194 = arith.constant 0 : index
    %255 = vector.load %arg13[%c6, %c0_194] : memref<32x64xbf16, #tpu.memory_space<vmem>>, vector<22x64xbf16>
    %c0_195 = arith.constant 0 : index
    %c320_196 = arith.constant 320 : index
    %256 = vector.load %arg14[%c0_195, %c320_196] : memref<82x576xbf16, #tpu.memory_space<vmem>>, vector<22x64xbf16>
    tpu.vector_store %arg14[%c0_195, %c320_196], %255 {strides = array<i32>} : memref<82x576xbf16, #tpu.memory_space<vmem>>, vector<22x64xbf16>,
    %c8_197 = arith.constant 8 : index
    %c0_198 = arith.constant 0 : index
    %257 = vector.load %arg13[%c8_197, %c0_198] : memref<32x64xbf16, #tpu.memory_space<vmem>>, vector<22x64xbf16>
    %c0_199 = arith.constant 0 : index
    %c384_200 = arith.constant 384 : index
    %258 = vector.load %arg14[%c0_199, %c384_200] : memref<82x576xbf16, #tpu.memory_space<vmem>>, vector<22x64xbf16>
    tpu.vector_store %arg14[%c0_199, %c384_200], %257 {strides = array<i32>} : memref<82x576xbf16, #tpu.memory_space<vmem>>, vector<22x64xbf16>,
    %c9_201 = arith.constant 9 : index
    %c0_202 = arith.constant 0 : index
    %259 = vector.load %arg13[%c9_201, %c0_202] : memref<32x64xbf16, #tpu.memory_space<vmem>>, vector<22x64xbf16>
    %c0_203 = arith.constant 0 : index
    %c448_204 = arith.constant 448 : index
    %260 = vector.load %arg14[%c0_203, %c448_204] : memref<82x576xbf16, #tpu.memory_space<vmem>>, vector<22x64xbf16>
    tpu.vector_store %arg14[%c0_203, %c448_204], %259 {strides = array<i32>} : memref<82x576xbf16, #tpu.memory_space<vmem>>, vector<22x64xbf16>,
    %c10 = arith.constant 10 : index
    %c0_205 = arith.constant 0 : index
    %261 = vector.load %arg13[%c10, %c0_205] : memref<32x64xbf16, #tpu.memory_space<vmem>>, vector<22x64xbf16>
    %c0_206 = arith.constant 0 : index
    %c512_207 = arith.constant 512 : index
    %262 = vector.load %arg14[%c0_206, %c512_207] : memref<82x576xbf16, #tpu.memory_space<vmem>>, vector<22x64xbf16>
    tpu.vector_store %arg14[%c0_206, %c512_207], %261 {strides = array<i32>} : memref<82x576xbf16, #tpu.memory_space<vmem>>, vector<22x64xbf16>,
    %c0_208 = arith.constant 0 : index
    %c0_209 = arith.constant 0 : index
    %263 = vector.load %arg14[%c0_208, %c0_209] : memref<82x576xbf16, #tpu.memory_space<vmem>>, vector<22x576xbf16>
    %c0_210 = arith.constant 0 : index
    %c0_211 = arith.constant 0 : index
    %264 = vector.load %arg3[%c0_210, %c0_211] : memref<576x64xbf16, #tpu.memory_space<vmem>>, vector<576x64xbf16>
    %cst_212 = arith.constant dense<0.000000e+00> : vector<22x64xf32>
    %265 = tpu.matmul %263, %264, %cst_212 {dimension_numbers = #tpu.dot_dimension_numbers<[1], [0], [0], [1], [0, 0, 1, 1], [], []>} : vector<22x576xbf16>, vector<576x64xbf16>, vector<22x64xf32> -> vector<22x64xf32>
    %c2_213 = arith.constant 2 : index
    %c0_214 = arith.constant 0 : index
    %266 = vector.load %arg5[%c2_213, %c0_214] : memref<4x64xf32, #tpu.memory_space<vmem>>, vector<1x64xf32>
    %c2_215 = arith.constant 2 : index
    %c0_216 = arith.constant 0 : index
    %267 = vector.load %arg6[%c2_215, %c0_216] : memref<4x64xf32, #tpu.memory_space<vmem>>, vector<1x64xf32>
    %c0_217 = arith.constant 0 : index
    %c0_218 = arith.constant 0 : index
    %268 = vector.load %arg8[%c0_217, %c0_218] : memref<22x64xf32, #tpu.memory_space<vmem>>, vector<22x64xf32>
    %269 = arith.mulf %265, %268 : vector<22x64xf32>
    %cst_219 = arith.constant dense<0.000000e+00> : vector<64xf32>
    %270 = vector.multi_reduction <add>, %269, %cst_219 [0] : vector<22x64xf32> to vector<64xf32>
    %271 = vector.shape_cast %270 : vector<64xf32> to vector<1x64xf32>
    %cst_220 = arith.constant 1.250000e-01 : f32
    %272 = vector.broadcast %cst_220 : f32 to vector<1x64xf32>
    %273 = arith.mulf %271, %272 : vector<1x64xf32>
    %274 = vector.broadcast %273 : vector<1x64xf32> to vector<22x64xf32>
    %275 = arith.subf %265, %274 : vector<22x64xf32>
    %276 = arith.mulf %275, %268 : vector<22x64xf32>
    %277 = arith.mulf %276, %276 : vector<22x64xf32>
    %cst_221 = arith.constant dense<0.000000e+00> : vector<64xf32>
    %278 = vector.multi_reduction <add>, %277, %cst_221 [0] : vector<22x64xf32> to vector<64xf32>
    %279 = vector.shape_cast %278 : vector<64xf32> to vector<1x64xf32>
    %cst_222 = arith.constant 1.250000e-01 : f32
    %280 = vector.broadcast %cst_222 : f32 to vector<1x64xf32>
    %281 = arith.mulf %279, %280 : vector<1x64xf32>
    %282 = vector.broadcast %273 : vector<1x64xf32> to vector<22x64xf32>
    %283 = arith.subf %265, %282 : vector<22x64xf32>
    %cst_223 = arith.constant 9.99999974E-6 : f32
    %284 = vector.broadcast %cst_223 : f32 to vector<1x64xf32>
    %285 = arith.addf %281, %284 : vector<1x64xf32>
    %286 = math.rsqrt %285 : vector<1x64xf32>
    %287 = vector.broadcast %286 : vector<1x64xf32> to vector<22x64xf32>
    %288 = arith.mulf %283, %287 : vector<22x64xf32>
    %289 = vector.broadcast %266 : vector<1x64xf32> to vector<22x64xf32>
    %290 = arith.mulf %288, %289 : vector<22x64xf32>
    %291 = vector.broadcast %267 : vector<1x64xf32> to vector<22x64xf32>
    %292 = arith.addf %290, %291 : vector<22x64xf32>
    %cst_224 = arith.constant 0.000000e+00 : f32
    %293 = vector.broadcast %cst_224 : f32 to vector<22x64xf32>
    %294 = arith.maximumf %292, %293 : vector<22x64xf32>
    %295 = vector.extract_strided_slice %294 {offsets = [0, 0], sizes = [2, 64], strides = [1, 1]} : vector<22x64xf32> to vector<2x64xf32>
    %296 = arith.truncf %295 : vector<2x64xf32> to vector<2x64xbf16>
    %c5_225 = arith.constant 5 : index
    %c0_226 = arith.constant 0 : index
    %297 = vector.load %arg13[%c5_225, %c0_226] : memref<32x64xbf16, #tpu.memory_space<vmem>>, vector<2x64xbf16>
    tpu.vector_store %arg13[%c5_225, %c0_226], %296 {strides = array<i32>} : memref<32x64xbf16, #tpu.memory_space<vmem>>, vector<2x64xbf16>,
    %298 = vector.extract_strided_slice %294 {offsets = [4, 0], sizes = [2, 64], strides = [1, 1]} : vector<22x64xf32> to vector<2x64xf32>
    %299 = arith.truncf %298 : vector<2x64xf32> to vector<2x64xbf16>
    %c9_227 = arith.constant 9 : index
    %c0_228 = arith.constant 0 : index
    %300 = vector.load %arg13[%c9_227, %c0_228] : memref<32x64xbf16, #tpu.memory_space<vmem>>, vector<2x64xbf16>
    tpu.vector_store %arg13[%c9_227, %c0_228], %299 {strides = array<i32>} : memref<32x64xbf16, #tpu.memory_space<vmem>>, vector<2x64xbf16>,
    %301 = vector.extract_strided_slice %294 {offsets = [16, 0], sizes = [2, 64], strides = [1, 1]} : vector<22x64xf32> to vector<2x64xf32>
    %302 = arith.truncf %301 : vector<2x64xf32> to vector<2x64xbf16>
    %c21_229 = arith.constant 21 : index
    %c0_230 = arith.constant 0 : index
    %303 = vector.load %arg13[%c21_229, %c0_230] : memref<32x64xbf16, #tpu.memory_space<vmem>>, vector<2x64xbf16>
    tpu.vector_store %arg13[%c21_229, %c0_230], %302 {strides = array<i32>} : memref<32x64xbf16, #tpu.memory_space<vmem>>, vector<2x64xbf16>,
    %304 = vector.extract_strided_slice %294 {offsets = [20, 0], sizes = [2, 64], strides = [1, 1]} : vector<22x64xf32> to vector<2x64xf32>
    %305 = arith.truncf %304 : vector<2x64xf32> to vector<2x64xbf16>
    %c25_231 = arith.constant 25 : index
    %c0_232 = arith.constant 0 : index
    %306 = vector.load %arg13[%c25_231, %c0_232] : memref<32x64xbf16, #tpu.memory_space<vmem>>, vector<2x64xbf16>
    tpu.vector_store %arg13[%c25_231, %c0_232], %305 {strides = array<i32>} : memref<32x64xbf16, #tpu.memory_space<vmem>>, vector<2x64xbf16>,
    %c0_233 = arith.constant 0 : index
    %c0_234 = arith.constant 0 : index
    %307 = vector.load %arg13[%c0_233, %c0_234] : memref<32x64xbf16, #tpu.memory_space<vmem>>, vector<22x64xbf16>
    %c0_235 = arith.constant 0 : index
    %c0_236 = arith.constant 0 : index
    %308 = vector.load %arg14[%c0_235, %c0_236] : memref<82x576xbf16, #tpu.memory_space<vmem>>, vector<22x64xbf16>
    tpu.vector_store %arg14[%c0_235, %c0_236], %307 {strides = array<i32>} : memref<82x576xbf16, #tpu.memory_space<vmem>>, vector<22x64xbf16>,
    %c1_237 = arith.constant 1 : index
    %c0_238 = arith.constant 0 : index
    %309 = vector.load %arg13[%c1_237, %c0_238] : memref<32x64xbf16, #tpu.memory_space<vmem>>, vector<22x64xbf16>
    %c0_239 = arith.constant 0 : index
    %c64_240 = arith.constant 64 : index
    %310 = vector.load %arg14[%c0_239, %c64_240] : memref<82x576xbf16, #tpu.memory_space<vmem>>, vector<22x64xbf16>
    tpu.vector_store %arg14[%c0_239, %c64_240], %309 {strides = array<i32>} : memref<82x576xbf16, #tpu.memory_space<vmem>>, vector<22x64xbf16>,
    %c2_241 = arith.constant 2 : index
    %c0_242 = arith.constant 0 : index
    %311 = vector.load %arg13[%c2_241, %c0_242] : memref<32x64xbf16, #tpu.memory_space<vmem>>, vector<22x64xbf16>
    %c0_243 = arith.constant 0 : index
    %c128_244 = arith.constant 128 : index
    %312 = vector.load %arg14[%c0_243, %c128_244] : memref<82x576xbf16, #tpu.memory_space<vmem>>, vector<22x64xbf16>
    tpu.vector_store %arg14[%c0_243, %c128_244], %311 {strides = array<i32>} : memref<82x576xbf16, #tpu.memory_space<vmem>>, vector<22x64xbf16>,
    %c4_245 = arith.constant 4 : index
    %c0_246 = arith.constant 0 : index
    %313 = vector.load %arg13[%c4_245, %c0_246] : memref<32x64xbf16, #tpu.memory_space<vmem>>, vector<22x64xbf16>
    %c0_247 = arith.constant 0 : index
    %c192_248 = arith.constant 192 : index
    %314 = vector.load %arg14[%c0_247, %c192_248] : memref<82x576xbf16, #tpu.memory_space<vmem>>, vector<22x64xbf16>
    tpu.vector_store %arg14[%c0_247, %c192_248], %313 {strides = array<i32>} : memref<82x576xbf16, #tpu.memory_space<vmem>>, vector<22x64xbf16>,
    %c5_249 = arith.constant 5 : index
    %c0_250 = arith.constant 0 : index
    %315 = vector.load %arg13[%c5_249, %c0_250] : memref<32x64xbf16, #tpu.memory_space<vmem>>, vector<22x64xbf16>
    %c0_251 = arith.constant 0 : index
    %c256_252 = arith.constant 256 : index
    %316 = vector.load %arg14[%c0_251, %c256_252] : memref<82x576xbf16, #tpu.memory_space<vmem>>, vector<22x64xbf16>
    tpu.vector_store %arg14[%c0_251, %c256_252], %315 {strides = array<i32>} : memref<82x576xbf16, #tpu.memory_space<vmem>>, vector<22x64xbf16>,
    %c6_253 = arith.constant 6 : index
    %c0_254 = arith.constant 0 : index
    %317 = vector.load %arg13[%c6_253, %c0_254] : memref<32x64xbf16, #tpu.memory_space<vmem>>, vector<22x64xbf16>
    %c0_255 = arith.constant 0 : index
    %c320_256 = arith.constant 320 : index
    %318 = vector.load %arg14[%c0_255, %c320_256] : memref<82x576xbf16, #tpu.memory_space<vmem>>, vector<22x64xbf16>
    tpu.vector_store %arg14[%c0_255, %c320_256], %317 {strides = array<i32>} : memref<82x576xbf16, #tpu.memory_space<vmem>>, vector<22x64xbf16>,
    %c8_257 = arith.constant 8 : index
    %c0_258 = arith.constant 0 : index
    %319 = vector.load %arg13[%c8_257, %c0_258] : memref<32x64xbf16, #tpu.memory_space<vmem>>, vector<22x64xbf16>
    %c0_259 = arith.constant 0 : index
    %c384_260 = arith.constant 384 : index
    %320 = vector.load %arg14[%c0_259, %c384_260] : memref<82x576xbf16, #tpu.memory_space<vmem>>, vector<22x64xbf16>
    tpu.vector_store %arg14[%c0_259, %c384_260], %319 {strides = array<i32>} : memref<82x576xbf16, #tpu.memory_space<vmem>>, vector<22x64xbf16>,
    %c9_261 = arith.constant 9 : index
    %c0_262 = arith.constant 0 : index
    %321 = vector.load %arg13[%c9_261, %c0_262] : memref<32x64xbf16, #tpu.memory_space<vmem>>, vector<22x64xbf16>
    %c0_263 = arith.constant 0 : index
    %c448_264 = arith.constant 448 : index
    %322 = vector.load %arg14[%c0_263, %c448_264] : memref<82x576xbf16, #tpu.memory_space<vmem>>, vector<22x64xbf16>
    tpu.vector_store %arg14[%c0_263, %c448_264], %321 {strides = array<i32>} : memref<82x576xbf16, #tpu.memory_space<vmem>>, vector<22x64xbf16>,
    %c10_265 = arith.constant 10 : index
    %c0_266 = arith.constant 0 : index
    %323 = vector.load %arg13[%c10_265, %c0_266] : memref<32x64xbf16, #tpu.memory_space<vmem>>, vector<22x64xbf16>
    %c0_267 = arith.constant 0 : index
    %c512_268 = arith.constant 512 : index
    %324 = vector.load %arg14[%c0_267, %c512_268] : memref<82x576xbf16, #tpu.memory_space<vmem>>, vector<22x64xbf16>
    tpu.vector_store %arg14[%c0_267, %c512_268], %323 {strides = array<i32>} : memref<82x576xbf16, #tpu.memory_space<vmem>>, vector<22x64xbf16>,
    %c0_269 = arith.constant 0 : index
    %c0_270 = arith.constant 0 : index
    %325 = vector.load %arg14[%c0_269, %c0_270] : memref<82x576xbf16, #tpu.memory_space<vmem>>, vector<22x576xbf16>
    %c0_271 = arith.constant 0 : index
    %c0_272 = arith.constant 0 : index
    %326 = vector.load %arg4[%c0_271, %c0_272] : memref<576x64xbf16, #tpu.memory_space<vmem>>, vector<576x64xbf16>
    %cst_273 = arith.constant dense<0.000000e+00> : vector<22x64xf32>
    %327 = tpu.matmul %325, %326, %cst_273 {dimension_numbers = #tpu.dot_dimension_numbers<[1], [0], [0], [1], [0, 0, 1, 1], [], []>} : vector<22x576xbf16>, vector<576x64xbf16>, vector<22x64xf32> -> vector<22x64xf32>
    %c3 = arith.constant 3 : index
    %c0_274 = arith.constant 0 : index
    %328 = vector.load %arg5[%c3, %c0_274] : memref<4x64xf32, #tpu.memory_space<vmem>>, vector<1x64xf32>
    %c3_275 = arith.constant 3 : index
    %c0_276 = arith.constant 0 : index
    %329 = vector.load %arg6[%c3_275, %c0_276] : memref<4x64xf32, #tpu.memory_space<vmem>>, vector<1x64xf32>
    %c0_277 = arith.constant 0 : index
    %c0_278 = arith.constant 0 : index
    %330 = vector.load %arg8[%c0_277, %c0_278] : memref<22x64xf32, #tpu.memory_space<vmem>>, vector<22x64xf32>
    %331 = arith.mulf %327, %330 : vector<22x64xf32>
    %cst_279 = arith.constant dense<0.000000e+00> : vector<64xf32>
    %332 = vector.multi_reduction <add>, %331, %cst_279 [0] : vector<22x64xf32> to vector<64xf32>
    %333 = vector.shape_cast %332 : vector<64xf32> to vector<1x64xf32>
    %cst_280 = arith.constant 1.250000e-01 : f32
    %334 = vector.broadcast %cst_280 : f32 to vector<1x64xf32>
    %335 = arith.mulf %333, %334 : vector<1x64xf32>
    %336 = vector.broadcast %335 : vector<1x64xf32> to vector<22x64xf32>
    %337 = arith.subf %327, %336 : vector<22x64xf32>
    %338 = arith.mulf %337, %330 : vector<22x64xf32>
    %339 = arith.mulf %338, %338 : vector<22x64xf32>
    %cst_281 = arith.constant dense<0.000000e+00> : vector<64xf32>
    %340 = vector.multi_reduction <add>, %339, %cst_281 [0] : vector<22x64xf32> to vector<64xf32>
    %341 = vector.shape_cast %340 : vector<64xf32> to vector<1x64xf32>
    %cst_282 = arith.constant 1.250000e-01 : f32
    %342 = vector.broadcast %cst_282 : f32 to vector<1x64xf32>
    %343 = arith.mulf %341, %342 : vector<1x64xf32>
    %344 = vector.broadcast %335 : vector<1x64xf32> to vector<22x64xf32>
    %345 = arith.subf %327, %344 : vector<22x64xf32>
    %cst_283 = arith.constant 9.99999974E-6 : f32
    %346 = vector.broadcast %cst_283 : f32 to vector<1x64xf32>
    %347 = arith.addf %343, %346 : vector<1x64xf32>
    %348 = math.rsqrt %347 : vector<1x64xf32>
    %349 = vector.broadcast %348 : vector<1x64xf32> to vector<22x64xf32>
    %350 = arith.mulf %345, %349 : vector<22x64xf32>
    %351 = vector.broadcast %328 : vector<1x64xf32> to vector<22x64xf32>
    %352 = arith.mulf %350, %351 : vector<22x64xf32>
    %353 = vector.broadcast %329 : vector<1x64xf32> to vector<22x64xf32>
    %354 = arith.addf %352, %353 : vector<22x64xf32>
    %cst_284 = arith.constant 0.000000e+00 : f32
    %355 = vector.broadcast %cst_284 : f32 to vector<22x64xf32>
    %356 = arith.maximumf %354, %355 : vector<22x64xf32>
    %357 = vector.extract_strided_slice %356 {offsets = [0, 0], sizes = [2, 64], strides = [1, 1]} : vector<22x64xf32> to vector<2x64xf32>
    %c0_285 = arith.constant 0 : index
    %c0_286 = arith.constant 0 : index
    %358 = vector.load %arg9[%c0_285, %c0_286] : memref<8x64xf32, #tpu.memory_space<vmem>>, vector<2x64xf32>
    tpu.vector_store %arg9[%c0_285, %c0_286], %357 {strides = array<i32>} : memref<8x64xf32, #tpu.memory_space<vmem>>, vector<2x64xf32>,
    %359 = vector.extract_strided_slice %356 {offsets = [4, 0], sizes = [2, 64], strides = [1, 1]} : vector<22x64xf32> to vector<2x64xf32>
    %c2_287 = arith.constant 2 : index
    %c0_288 = arith.constant 0 : index
    %360 = vector.load %arg9[%c2_287, %c0_288] : memref<8x64xf32, #tpu.memory_space<vmem>>, vector<2x64xf32>
    tpu.vector_store %arg9[%c2_287, %c0_288], %359 {strides = array<i32>} : memref<8x64xf32, #tpu.memory_space<vmem>>, vector<2x64xf32>,
    %361 = vector.extract_strided_slice %356 {offsets = [16, 0], sizes = [2, 64], strides = [1, 1]} : vector<22x64xf32> to vector<2x64xf32>
    %c4_289 = arith.constant 4 : index
    %c0_290 = arith.constant 0 : index
    %362 = vector.load %arg9[%c4_289, %c0_290] : memref<8x64xf32, #tpu.memory_space<vmem>>, vector<2x64xf32>
    tpu.vector_store %arg9[%c4_289, %c0_290], %361 {strides = array<i32>} : memref<8x64xf32, #tpu.memory_space<vmem>>, vector<2x64xf32>,
    %363 = vector.extract_strided_slice %356 {offsets = [20, 0], sizes = [2, 64], strides = [1, 1]} : vector<22x64xf32> to vector<2x64xf32>
    %c6_291 = arith.constant 6 : index
    %c0_292 = arith.constant 0 : index
    %364 = vector.load %arg9[%c6_291, %c0_292] : memref<8x64xf32, #tpu.memory_space<vmem>>, vector<2x64xf32>
    tpu.vector_store %arg9[%c6_291, %c0_292], %363 {strides = array<i32>} : memref<8x64xf32, #tpu.memory_space<vmem>>, vector<2x64xf32>,
    return
  }
}

</mosaic_0001>

<bundles_post_ra>
// kernel: cnn_encoder_forward.1
= control target key start
LH: loop header
LB: loop body
LE: loop exit
PB: predicated region body
PF: predicated region fallthrough
CT: control target
= control target key end

     0   :  { %vm9007_vm0 = vcmask 1040384   ;;  %v6180_v2 = vmov 0.0|0.0   ;;  %vm6181_vm1 = vmmov 1   ;;  %vm6182_vm3 = vmmov 0   ;;  %s8990_s0 = inlined_call_operand.vmem [shape: f32[392,9], index: 0, kind: input, shape index: {}]   ;;  %s8991_s1 = inlined_call_operand.vmem [shape: f32[9,64], index: 1, kind: input, shape index: {}]   ;;  %s8992_s2 = inlined_call_operand.vmem [shape: bf16[576,64], index: 2, kind: input, shape index: {}]   ;;  %s8993_s3 = inlined_call_operand.vmem [shape: bf16[576,64], index: 3, kind: input, shape index: {}]   ;;  %s8994_s4 = inlined_call_operand.vmem [shape: bf16[576,64], index: 4, kind: input, shape index: {}]   ;;  %s8995_s5 = inlined_call_operand.vmem [shape: f32[4,64], index: 5, kind: input, shape index: {}]   ;;  %s8996_s6 = inlined_call_operand.vmem [shape: f32[4,64], index: 6, kind: input, shape index: {}]   ;;  %s8997_s7 = inlined_call_operand.vmem [shape: f32[82,64], index: 7, kind: input, shape index: {}]   ;;  %s8998_s8 = inlined_call_operand.vmem [shape: f32[22,64], index: 8, kind: input, shape index: {}]   ;;  %s8999_s9 = inlined_call_operand.hbm [shape: f32[8,64], index: 9, kind: output, shape index: {}]  }
   0x1   :  { %v83_v0 = vld [vmem:[%s8991_s1] sm:$0xff]  ;;  %v84_v1 = vld [vmem:[%s8991_s1 + $0x8] sm:$0x1]  ;;  %5932 = vmatprep.subr.bf16.mxu0 %v6180_v2  ;;  %vm5934_vm2 = vmpackc.low %vm9007_vm0, %vm6181_vm1  ;;  %v6183_v4 = vmov 0.0   ;;  %vm85_vm4 = vcmask 72704  }
   0x2   :  { %v5933_v3 = vpack.c.bf16 %v84_v1, %v83_v0  ;;  %5741 = vmatprep.mubr.msk.f32.mxu0 %vm6182_vm3, %v6183_v4  ;;  %v34_v5 = vld [vmem:[%s8990_s0] sm:$0xff]  ;;  %v35_v6 = vld [vmem:[%s8990_s0 + $0x8] sm:$0xff]  ;;  %v36_v7 = vld [vmem:[%s8990_s0 + $0x10] sm:$0xff] }
   0x3   :  { %v37_v8 = vld [vmem:[%s8990_s0 + $0x18] sm:$0xff]  ;;  %v38_v9 = vld [vmem:[%s8990_s0 + $0x20] sm:$0xff]  ;;  %v39_v10 = vld [vmem:[%s8990_s0 + $0x28] sm:$0xff] }
   0x4   :  { %5935 = vmatpush3.bf16.msk.msra.mxu0 %vm5934_vm2, %v5933_v3  ;;  %v40_v11 = vld [vmem:[%s8990_s0 + $0x30] sm:$0xff]  ;;  %v41_v12 = vld [vmem:[%s8990_s0 + $0x38] sm:$0xff]  ;;  %v42_v13 = vld [vmem:[%s8990_s0 + $0x40] sm:$0xff] }
   0x5   :  { %v43_v14 = vld [vmem:[%s8990_s0 + $0x48] sm:$0xff]  ;;  %v44_v15 = vld [vmem:[%s8990_s0 + $0x50] sm:$0xff]  ;;  %v45_v16 = vld [vmem:[%s8990_s0 + $0x58] sm:$0xff] }
   0x6   :  { %v46_v17 = vld [vmem:[%s8990_s0 + $0x60] sm:$0xff]  ;;  %v47_v18 = vld [vmem:[%s8990_s0 + $0x68] sm:$0xff]  ;;  %v48_v19 = vld [vmem:[%s8990_s0 + $0x70] sm:$0xff] }
   0x7   :  { %5742 = vmatmul.mubr.msk.f32.vlgmr.msra.gmra.mrb[0].mxu0 %vm85_vm4, %v34_v5  ;;  %v49_v20 = vld [vmem:[%s8990_s0 + $0x78] sm:$0xff]  ;;  %v50_v21 = vld [vmem:[%s8990_s0 + $0x80] sm:$0xff]  ;;  %v51_v22 = vld [vmem:[%s8990_s0 + $0x88] sm:$0xff] }
   0x8   :  { %5744 = vmatprep.mubr.msk.f32.mxu0 %vm6182_vm3, %v6183_v4  ;;  %v52_v23 = vld [vmem:[%s8990_s0 + $0x90] sm:$0xff]  ;;  %v53_v24 = vld [vmem:[%s8990_s0 + $0x98] sm:$0xff]  ;;  %v54_v25 = vld [vmem:[%s8990_s0 + $0xa0] sm:$0xff] }
   0x9   :  { %v55_v26 = vld [vmem:[%s8990_s0 + $0xa8] sm:$0xff]  ;;  %v56_v27 = vld [vmem:[%s8990_s0 + $0xb0] sm:$0xff] }
   0xb   :  { %5745 = vmatmul.mubr.msk.f32.gmra.mrb[2].mxu0 %vm85_vm4, %v35_v6 }
   0xc   :  { %5747 = vmatprep.mubr.msk.f32.mxu0 %vm6182_vm3, %v6183_v4 }
   0xf   :  { %5748 = vmatmul.mubr.msk.f32.gmra.mrb[4].mxu0 %vm85_vm4, %v36_v7 }
  0x10   :  { %5750 = vmatprep.mubr.msk.f32.mxu0 %vm6182_vm3, %v6183_v4 }
  0x13   :  { %5751 = vmatmul.mubr.msk.f32.gmra.mrb[6].mxu0 %vm85_vm4, %v37_v8 }
  0x14   :  { %5753 = vmatprep.mubr.msk.f32.mxu0 %vm6182_vm3, %v6183_v4 }
  0x17   :  { %5754 = vmatmul.mubr.msk.f32.gmra.mrb[8].mxu0 %vm85_vm4, %v38_v9 }
  0x18   :  { %5756 = vmatprep.mubr.msk.f32.mxu0 %vm6182_vm3, %v6183_v4 }
  0x1b   :  { %5757 = vmatmul.mubr.msk.f32.gmra.mrb[10].mxu0 %vm85_vm4, %v39_v10 }
  0x1c   :  { %5759 = vmatprep.mubr.msk.f32.mxu0 %vm6182_vm3, %v6183_v4 }
  0x1f   :  { %5760 = vmatmul.mubr.msk.f32.gmra.mrb[12].mxu0 %vm85_vm4, %v40_v11 }
  0x20   :  { %5762 = vmatprep.mubr.msk.f32.mxu0 %vm6182_vm3, %v6183_v4 }
  0x23   :  { %5763 = vmatmul.mubr.msk.f32.gmra.mrb[14].mxu0 %vm85_vm4, %v41_v12 }
  0x24   :  { %5765 = vmatprep.mubr.msk.f32.mxu0 %vm6182_vm3, %v6183_v4 }
  0x27   :  { %5766 = vmatmul.mubr.msk.f32.gmra.mrb[16].mxu0 %vm85_vm4, %v42_v13 }
  0x28   :  { %5768 = vmatprep.mubr.msk.f32.mxu0 %vm6182_vm3, %v6183_v4 }
  0x2b   :  { %5769 = vmatmul.mubr.msk.f32.gmra.mrb[18].mxu0 %vm85_vm4, %v43_v14 }
  0x2c   :  { %5771 = vmatprep.mubr.msk.f32.mxu0 %vm6182_vm3, %v6183_v4 }
  0x2f   :  { %5772 = vmatmul.mubr.msk.f32.gmra.mrb[20].mxu0 %vm85_vm4, %v44_v15 }
  0x30   :  { %5774 = vmatprep.mubr.msk.f32.mxu0 %vm6182_vm3, %v6183_v4 }
  0x33   :  { %5775 = vmatmul.mubr.msk.f32.gmra.mrb[22].mxu0 %vm85_vm4, %v45_v16 }
  0x34   :  { %5777 = vmatprep.mubr.msk.f32.mxu0 %vm6182_vm3, %v6183_v4 }
  0x37   :  { %5778 = vmatmul.mubr.msk.f32.gmra.mrb[24].mxu0 %vm85_vm4, %v46_v17 }
  0x38   :  { %5780 = vmatprep.mubr.msk.f32.mxu0 %vm6182_vm3, %v6183_v4 }
  0x3b   :  { %5781 = vmatmul.mubr.msk.f32.gmra.mrb[26].mxu0 %vm85_vm4, %v47_v18 }
  0x3c   :  { %5783 = vmatprep.mubr.msk.f32.mxu0 %vm6182_vm3, %v6183_v4 }
  0x3f   :  { %5784 = vmatmul.mubr.msk.f32.gmra.mrb[28].mxu0 %vm85_vm4, %v48_v19 }
  0x40   :  { %5786 = vmatprep.mubr.msk.f32.mxu0 %vm6182_vm3, %v6183_v4 }
  0x43   :  { %5787 = vmatmul.mubr.msk.f32.gmra.mrb[30].mxu0 %vm85_vm4, %v49_v20 }
  0x44   :  { %5789 = vmatprep.mubr.msk.f32.mxu0 %vm6182_vm3, %v6183_v4 }
  0x47   :  { %5790 = vmatmul.mubr.msk.f32.gmra.mrb[32].mxu0 %vm85_vm4, %v50_v21 }
  0x48   :  { %5792 = vmatprep.mubr.msk.f32.mxu0 %vm6182_vm3, %v6183_v4 }
  0x4b   :  { %5793 = vmatmul.mubr.msk.f32.gmra.mrb[34].mxu0 %vm85_vm4, %v51_v22 }
  0x4c   :  { %5795 = vmatprep.mubr.msk.f32.mxu0 %vm6182_vm3, %v6183_v4 }
  0x4f   :  { %5796 = vmatmul.mubr.msk.f32.gmra.mrb[36].mxu0 %vm85_vm4, %v52_v23 }
  0x50   :  { %5798 = vmatprep.mubr.msk.f32.mxu0 %vm6182_vm3, %v6183_v4 }
  0x53   :  { %5799 = vmatmul.mubr.msk.f32.gmra.mrb[38].mxu0 %vm85_vm4, %v53_v24 }
  0x54   :  { %5801 = vmatprep.mubr.msk.f32.mxu0 %vm6182_vm3, %v6183_v4 }
  0x57   :  { %5802 = vmatmul.mubr.msk.f32.gmra.mrb[40].mxu0 %vm85_vm4, %v54_v25 }
  0x58   :  { %5804 = vmatprep.mubr.msk.f32.mxu0 %vm6182_vm3, %v6183_v4 }
  0x5b   :  { %5805 = vmatmul.mubr.msk.f32.gmra.mrb[42].mxu0 %vm85_vm4, %v55_v26 }
  0x5c   :  { %5807 = vmatprep.mubr.msk.f32.mxu0 %vm6182_vm3, %v6183_v4 }
  0x5d   :  { %14 = vsyncpa [#allocation8], 0  ;;  %v57_v28 = vld [vmem:[%s8990_s0 + $0xb8] sm:$0xff]  ;;  %v58_v29 = vld [vmem:[%s8990_s0 + $0xc0] sm:$0xff]  ;;  %vm9006_vm5 = vcmask 523264   ;;  %vm1122_vm6 = vcmask 519168  }
  0x5e   :  { %v59_v30 = vld [vmem:[%s8990_s0 + $0xc8] sm:$0xff]  ;;  %v60_v31 = vld [vmem:[%s8990_s0 + $0xd0] sm:$0xff]  ;;  %v61_v32 = vld [vmem:[%s8990_s0 + $0xd8] sm:$0xff]  ;;  %vm1123_vm7 = vsmask.f32 3328  ;;  %vm1154_vm8 = vcmask 519171  }
  0x5f   :  { %5808 = vmatmul.mubr.msk.f32.gmra.mrb[44].mxu0 %vm85_vm4, %v56_v27  ;;  %v62_v33 = vld [vmem:[%s8990_s0 + $0xe0] sm:$0xff]  ;;  %v63_v34 = vld [vmem:[%s8990_s0 + $0xe8] sm:$0xff]  ;;  %v64_v35 = vld [vmem:[%s8990_s0 + $0xf0] sm:$0xff]  ;;  %vm1155_vm9 = vsmask.f32 7950  ;;  %vm9008_vm10 = vcmask 518144  }
  0x60   :  { %5810 = vmatprep.mubr.msk.f32.mxu0 %vm6182_vm3, %v6183_v4  ;;  %v65_v36 = vld [vmem:[%s8990_s0 + $0xf8] sm:$0xff]  ;;  %v66_v37 = vld [vmem:[%s8990_s0 + $0x100] sm:$0xff]  ;;  %v67_v38 = vld [vmem:[%s8990_s0 + $0x108] sm:$0xff]  ;;  %vm1184_vm11 = vsmask.f32 2304  ;;  %vm1282_vm13 = vcmask 516096  }
  0x61   :  { %v68_v39 = vld [vmem:[%s8990_s0 + $0x110] sm:$0xff]  ;;  %v69_v40 = vld [vmem:[%s8990_s0 + $0x118] sm:$0xff]  ;;  %v70_v41 = vld [vmem:[%s8990_s0 + $0x120] sm:$0xff]  ;;  %vm1306_vm1 = vsmask.f32 256  ;;  %s6184_s27 = smov 64  }
  0x62   :  { %v71_v42 = vld [vmem:[%s8990_s0 + $0x128] sm:$0xff]  ;;  %v72_v43 = vld [vmem:[%s8990_s0 + $0x130] sm:$0xff]  ;;  %v73_v44 = vld [vmem:[%s8990_s0 + $0x138] sm:$0xff]  ;;  %vm1524_vm2 = vsmask.f32 7440  ;;  %s6186_s20 = smov [#allocation7]  }
  0x63   :  { %5811 = vmatmul.mubr.msk.f32.gmra.mrb[46].mxu0 %vm85_vm4, %v57_v28  ;;  %v74_v45 = vld [vmem:[%s8990_s0 + $0x140] sm:$0xff]  ;;  %v75_v46 = vld [vmem:[%s8990_s0 + $0x148] sm:$0xff]  ;;  %v76_v47 = vld [vmem:[%s8990_s0 + $0x150] sm:$0xff]  ;;  %vm1245_vm0 = vsmask.f32 1280  ;;  %s5118_s21 = sshll.u32 %s6186_s20, 4  ;;  %s5119_s21 = int_to_ptr.vmem [resolvable:$true] %s5118_s21 }
  0x64   :  { %5813 = vmatprep.mubr.msk.f32.mxu0 %vm6182_vm3, %v6183_v4  ;;  %v77_v48 = vld [vmem:[%s8990_s0 + $0x158] sm:$0xff]  ;;  %v78_v49 = vld [vmem:[%s8990_s0 + $0x160] sm:$0xff]  ;;  %v79_v50 = vld [vmem:[%s8990_s0 + $0x168] sm:$0xff]  ;;  %p6161_p1 = scmp.lt.s32.totalorder %s5119_s21, %s5119_s21 }
  0x65   :  { %v80_v51 = vld [vmem:[%s8990_s0 + $0x170] sm:$0xff]  ;;  %v81_v52 = vld [vmem:[%s8990_s0 + $0x178] sm:$0xff]  ;;  %v82_v53 = vld [vmem:[%s8990_s0 + $0x180] sm:$0xff] }
  0x66   :  { %vm7419_vm12 = vmand %vm1122_vm6, %vm1123_vm7 }
  0x67   :  { %5814 = vmatmul.mubr.msk.f32.gmra.mrb[48].mxu0 %vm85_vm4, %v58_v29  ;;  %vm7472_vm14 = vmand %vm1154_vm8, %vm1155_vm9  ;;  %vm1216_vm9 = vsmask.f32 7946 }
  0x68   :  { %5816 = vmatprep.mubr.msk.f32.mxu0 %vm6182_vm3, %v6183_v4  ;;  %vm7486_vm15 = vmand %vm9008_vm10, %vm1184_vm11 }
  0x6b   :  { %5817 = vmatmul.mubr.msk.f32.gmra.mrb[50].mxu0 %vm85_vm4, %v59_v30 }
  0x6c   :  { %5819 = vmatprep.mubr.msk.f32.mxu0 %vm6182_vm3, %v6183_v4 }
  0x6f   :  { %5820 = vmatmul.mubr.msk.f32.gmra.mrb[52].mxu0 %vm85_vm4, %v60_v31 }
  0x70   :  { %5822 = vmatprep.mubr.msk.f32.mxu0 %vm6182_vm3, %v6183_v4 }
  0x73   :  { %5823 = vmatmul.mubr.msk.f32.gmra.mrb[54].mxu0 %vm85_vm4, %v61_v32 }
  0x74   :  { %5825 = vmatprep.mubr.msk.f32.mxu0 %vm6182_vm3, %v6183_v4 }
  0x77   :  { %5826 = vmatmul.mubr.msk.f32.gmra.mrb[56].mxu0 %vm85_vm4, %v62_v33 }
  0x78   :  { %5828 = vmatprep.mubr.msk.f32.mxu0 %vm6182_vm3, %v6183_v4 }
  0x7b   :  { %5829 = vmatmul.mubr.msk.f32.gmra.mrb[58].mxu0 %vm85_vm4, %v63_v34 }
  0x7c   :  { %5831 = vmatprep.mubr.msk.f32.mxu0 %vm6182_vm3, %v6183_v4 }
  0x7f   :  { %5832 = vmatmul.mubr.msk.f32.gmra.mrb[60].mxu0 %vm85_vm4, %v64_v35 }
  0x80   :  { %5834 = vmatprep.mubr.msk.f32.mxu0 %vm6182_vm3, %v6183_v4 }
  0x83   :  { %5835 = vmatmul.mubr.msk.f32.gmra.mrb[62].mxu0 %vm85_vm4, %v65_v36 }
  0x84   :  { %5837 = vmatprep.mubr.msk.f32.mxu0 %vm6182_vm3, %v6183_v4 }
  0x87   :  { %5838 = vmatmul.mubr.msk.f32.gmra.mrb[64].mxu0 %vm85_vm4, %v66_v37 }
  0x88   :  { %5840 = vmatprep.mubr.msk.f32.mxu0 %vm6182_vm3, %v6183_v4 }
  0x8b   :  { %5841 = vmatmul.mubr.msk.f32.gmra.mrb[66].mxu0 %vm85_vm4, %v67_v38 }
  0x8c   :  { %5843 = vmatprep.mubr.msk.f32.mxu0 %vm6182_vm3, %v6183_v4 }
  0x8f   :  { %5844 = vmatmul.mubr.msk.f32.gmra.mrb[68].mxu0 %vm85_vm4, %v68_v39 }
  0x90   :  { %5846 = vmatprep.mubr.msk.f32.mxu0 %vm6182_vm3, %v6183_v4 }
  0x93   :  { %5847 = vmatmul.mubr.msk.f32.gmra.mrb[70].mxu0 %vm85_vm4, %v69_v40 }
  0x94   :  { %5849 = vmatprep.mubr.msk.f32.mxu0 %vm6182_vm3, %v6183_v4 }
  0x97   :  { %5850 = vmatmul.mubr.msk.f32.gmra.mrb[72].mxu0 %vm85_vm4, %v70_v41 }
  0x98   :  { %5852 = vmatprep.mubr.msk.f32.mxu0 %vm6182_vm3, %v6183_v4 }
  0x9b   :  { %5853 = vmatmul.mubr.msk.f32.gmra.mrb[74].mxu0 %vm85_vm4, %v71_v42 }
  0x9c   :  { %5855 = vmatprep.mubr.msk.f32.mxu0 %vm6182_vm3, %v6183_v4 }
  0x9f   :  { %5856 = vmatmul.mubr.msk.f32.gmra.mrb[76].mxu0 %vm85_vm4, %v72_v43 }
  0xa0   :  { %5858 = vmatprep.mubr.msk.f32.mxu0 %vm6182_vm3, %v6183_v4 }
  0xa3   :  { %5859 = vmatmul.mubr.msk.f32.gmra.mrb[78].mxu0 %vm85_vm4, %v73_v44 }
  0xa4   :  { %5861 = vmatprep.mubr.msk.f32.mxu0 %vm6182_vm3, %v6183_v4 }
  0xa7   :  { %5862 = vmatmul.mubr.msk.f32.gmra.mrb[80].mxu0 %vm85_vm4, %v74_v45 }
  0xa8   :  { %5864 = vmatprep.mubr.msk.f32.mxu0 %vm6182_vm3, %v6183_v4 }
  0xab   :  { %5865 = vmatmul.mubr.msk.f32.gmra.mrb[82].mxu0 %vm85_vm4, %v75_v46 }
  0xac   :  { %5867 = vmatprep.mubr.msk.f32.mxu0 %vm6182_vm3, %v6183_v4 }
  0xaf   :  { %5868 = vmatmul.mubr.msk.f32.gmra.mrb[84].mxu0 %vm85_vm4, %v76_v47 }
  0xb0   :  { %5870 = vmatprep.mubr.msk.f32.mxu0 %vm6182_vm3, %v6183_v4 }
  0xb3   :  { %5871 = vmatmul.mubr.msk.f32.gmra.mrb[86].mxu0 %vm85_vm4, %v77_v48 }
  0xb4   :  { %5873 = vmatprep.mubr.msk.f32.mxu0 %vm6182_vm3, %v6183_v4 }
  0xb7   :  { %5874 = vmatmul.mubr.msk.f32.gmra.mrb[88].mxu0 %vm85_vm4, %v78_v49 }
  0xb8   :  { %5876 = vmatprep.mubr.msk.f32.mxu0 %vm6182_vm3, %v6183_v4 }
  0xbb   :  { %5877 = vmatmul.mubr.msk.f32.gmra.mrb[90].mxu0 %vm85_vm4, %v79_v50 }
  0xbc   :  { %5879 = vmatprep.mubr.msk.f32.mxu0 %vm6182_vm3, %v6183_v4 }
  0xbf   :  { %5880 = vmatmul.mubr.msk.f32.gmra.mrb[92].mxu0 %vm85_vm4, %v80_v51 }
  0xc0   :  { %5882 = vmatprep.mubr.msk.f32.mxu0 %vm6182_vm3, %v6183_v4 }
  0xc3   :  { %5883 = vmatmul.mubr.msk.f32.gmra.mrb[94].mxu0 %vm85_vm4, %v81_v52 }
  0xc4   :  { %5885 = vmatprep.mubr.msk.f32.mxu0 %vm6182_vm3, %v6183_v4  ;;  %vm1772_vm3 = vsmask.f32 4368 }
  0xc5   :  { %vm7527_vm11 = vmor %vm1306_vm1, %vm1772_vm3 }
  0xc7   :  { %5886 = vmatmul.mubr.msk.f32.gmra.mrb[96].mxu0 %vm85_vm4, %v82_v53  ;;  %vm1215_vm4 = vcmask 519170  }
  0xc8   :  { %vm7538_vm3 = vmand %vm1215_vm4, %vm1216_vm9 }
  0xda   :  { %v6538_v54 = vpop.f32.mrb[0].mxu0 }
  0xdb   :  { %v5743_v55 = vpop.f32.mrb[1].mxu0  ;;  %v550_v57 = vsel %vm9006_vm5, %v6538_v54, 0.0 }
  0xde   :  { %v6540_v56 = vpop.f32.mrb[2].mxu0 }
  0xdf   :  { %v551_v58 = vsel %vm9006_vm5, %v6540_v56, 0.0  ;;  %v5746_v59 = vpop.f32.mrb[3].mxu0 }
  0xe0   :  { %v552_v60 = vadd.f32 %v551_v58, %v550_v57 }
  0xe2   :  { %v6546_v61 = vpop.f32.mrb[4].mxu0 }
  0xe3   :  { %v553_v62 = vsel %vm9006_vm5, %v6546_v61, 0.0  ;;  %v5749_v63 = vpop.f32.mrb[5].mxu0 }
  0xe4   :  { %v554_v0 = vadd.f32 %v553_v62, %v552_v60 }
  0xe6   :  { %v6550_v1 = vpop.f32.mrb[6].mxu0 }
  0xe7   :  { %v555_v2 = vsel %vm9006_vm5, %v6550_v1, 0.0  ;;  %v5752_v3 = vpop.f32.mrb[7].mxu0 }
  0xe8   :  { %v556_v4 = vadd.f32 %v555_v2, %v554_v0 }
  0xea   :  { %v6554_v5 = vpop.f32.mrb[8].mxu0 }
  0xeb   :  { %v557_v6 = vsel %vm9006_vm5, %v6554_v5, 0.0  ;;  %v5755_v7 = vpop.f32.mrb[9].mxu0 }
  0xec   :  { %v558_v8 = vadd.f32 %v557_v6, %v556_v4 }
  0xee   :  { %v6558_v9 = vpop.f32.mrb[10].mxu0 }
  0xef   :  { %v559_v10 = vsel %vm9006_vm5, %v6558_v9, 0.0  ;;  %v5758_v11 = vpop.f32.mrb[11].mxu0 }
  0xf0   :  { %v560_v12 = vadd.f32 %v559_v10, %v558_v8 }
  0xf2   :  { %v6562_v13 = vpop.f32.mrb[12].mxu0 }
  0xf3   :  { %v561_v14 = vsel %vm9006_vm5, %v6562_v13, 0.0  ;;  %v5761_v15 = vpop.f32.mrb[13].mxu0 }
  0xf4   :  { %v562_v16 = vadd.f32 %v561_v14, %v560_v12 }
  0xf6   :  { %v6566_v17 = vpop.f32.mrb[14].mxu0 }
  0xf7   :  { %v563_v18 = vsel %vm9006_vm5, %v6566_v17, 0.0  ;;  %v5764_v19 = vpop.f32.mrb[15].mxu0 }
  0xf8   :  { %v564_v20 = vadd.f32 %v563_v18, %v562_v16 }
  0xfa   :  { %v6570_v21 = vpop.f32.mrb[16].mxu0 }
  0xfb   :  { %v565_v22 = vsel %vm9006_vm5, %v6570_v21, 0.0  ;;  %v5767_v23 = vpop.f32.mrb[17].mxu0 }
  0xfc   :  { %v566_v24 = vadd.f32 %v565_v22, %v564_v20 }
  0xfe   :  { %v6574_v25 = vpop.f32.mrb[18].mxu0 }
  0xff   :  { %v567_v26 = vsel %vm9006_vm5, %v6574_v25, 0.0  ;;  %v5770_v27 = vpop.f32.mrb[19].mxu0 }
 0x100   :  { %v568_v28 = vadd.f32 %v567_v26, %v566_v24 }
 0x102   :  { %v6578_v29 = vpop.f32.mrb[20].mxu0 }
 0x103   :  { %v569_v30 = vsel %vm9006_vm5, %v6578_v29, 0.0  ;;  %v5773_v31 = vpop.f32.mrb[21].mxu0 }
 0x104   :  { %v570_v32 = vadd.f32 %v569_v30, %v568_v28 }
 0x106   :  { %v6582_v33 = vpop.f32.mrb[22].mxu0 }
 0x107   :  { %v571_v34 = vsel %vm9006_vm5, %v6582_v33, 0.0  ;;  %v5776_v35 = vpop.f32.mrb[23].mxu0 }
 0x108   :  { %v572_v36 = vadd.f32 %v571_v34, %v570_v32 }
 0x10a   :  { %v6586_v37 = vpop.f32.mrb[24].mxu0 }
 0x10b   :  { %v573_v38 = vsel %vm9006_vm5, %v6586_v37, 0.0  ;;  %v5779_v39 = vpop.f32.mrb[25].mxu0 }
 0x10c   :  { %v574_v40 = vadd.f32 %v573_v38, %v572_v36 }
 0x10e   :  { %v6590_v41 = vpop.f32.mrb[26].mxu0 }
 0x10f   :  { %v575_v42 = vsel %vm9006_vm5, %v6590_v41, 0.0  ;;  %v5782_v43 = vpop.f32.mrb[27].mxu0 }
 0x110   :  { %v576_v44 = vadd.f32 %v575_v42, %v574_v40 }
 0x112   :  { %v6594_v45 = vpop.f32.mrb[28].mxu0 }
 0x113   :  { %v577_v46 = vsel %vm9006_vm5, %v6594_v45, 0.0  ;;  %v5785_v47 = vpop.f32.mrb[29].mxu0 }
 0x114   :  { %v578_v48 = vadd.f32 %v577_v46, %v576_v44 }
 0x116   :  { %v6598_v49 = vpop.f32.mrb[30].mxu0 }
 0x117   :  { %v579_v50 = vsel %vm9006_vm5, %v6598_v49, 0.0  ;;  %v5788_v51 = vpop.f32.mrb[31].mxu0 }
 0x118   :  { %v580_v52 = vadd.f32 %v579_v50, %v578_v48 }
 0x11a   :  { %v6602_v53 = vpop.f32.mrb[32].mxu0 }
 0x11b   :  { %v581_v55 = vsel %vm9006_vm5, %v6602_v53, 0.0  ;;  %v5791_v57 = vpop.f32.mrb[33].mxu0 }
 0x11c   :  { %v582_v58 = vadd.f32 %v581_v55, %v580_v52 }
 0x11e   :  { %v6606_v59 = vpop.f32.mrb[34].mxu0 }
 0x11f   :  { %v583_v60 = vsel %vm9006_vm5, %v6606_v59, 0.0  ;;  %v5794_v62 = vpop.f32.mrb[35].mxu0 }
 0x120   :  { %v584_v63 = vadd.f32 %v583_v60, %v582_v58 }
 0x122   :  { %v6610_v0 = vpop.f32.mrb[36].mxu0 }
 0x123   :  { %v585_v2 = vsel %vm9006_vm5, %v6610_v0, 0.0  ;;  %v5797_v3 = vpop.f32.mrb[37].mxu0 }
 0x124   :  { %v586_v4 = vadd.f32 %v585_v2, %v584_v63 }
 0x126   :  { %v6614_v6 = vpop.f32.mrb[38].mxu0 }
 0x127   :  { %v587_v7 = vsel %vm9006_vm5, %v6614_v6, 0.0  ;;  %v5800_v8 = vpop.f32.mrb[39].mxu0 }
 0x128   :  { %v588_v10 = vadd.f32 %v587_v7, %v586_v4 }
 0x12a   :  { %v6618_v11 = vpop.f32.mrb[40].mxu0 }
 0x12b   :  { %v589_v12 = vsel %vm9006_vm5, %v6618_v11, 0.0  ;;  %v5803_v14 = vpop.f32.mrb[41].mxu0 }
 0x12c   :  { %v590_v15 = vadd.f32 %v589_v12, %v588_v10 }
 0x12e   :  { %v6622_v16 = vpop.f32.mrb[42].mxu0 }
 0x12f   :  { %v591_v18 = vsel %vm9006_vm5, %v6622_v16, 0.0  ;;  %v5806_v19 = vpop.f32.mrb[43].mxu0 }
 0x130   :  { %v592_v20 = vadd.f32 %v591_v18, %v590_v15 }
 0x132   :  { %v6626_v22 = vpop.f32.mrb[44].mxu0 }
 0x133   :  { %v593_v23 = vsel %vm9006_vm5, %v6626_v22, 0.0  ;;  %v5809_v24 = vpop.f32.mrb[45].mxu0 }
 0x134   :  { %v594_v26 = vadd.f32 %v593_v23, %v592_v20 }
 0x136   :  { %v6630_v27 = vpop.f32.mrb[46].mxu0 }
 0x137   :  { %v595_v28 = vsel %vm9006_vm5, %v6630_v27, 0.0  ;;  %v5812_v30 = vpop.f32.mrb[47].mxu0 }
 0x138   :  { %v596_v31 = vadd.f32 %v595_v28, %v594_v26 }
 0x13a   :  { %v6634_v32 = vpop.f32.mrb[48].mxu0 }
 0x13b   :  { %v597_v34 = vsel %vm9006_vm5, %v6634_v32, 0.0  ;;  %v5815_v35 = vpop.f32.mrb[49].mxu0 }
 0x13c   :  { %v598_v36 = vadd.f32 %v597_v34, %v596_v31 }
 0x13e   :  { %v6638_v38 = vpop.f32.mrb[50].mxu0 }
 0x13f   :  { %v599_v39 = vsel %vm9006_vm5, %v6638_v38, 0.0  ;;  %v5818_v40 = vpop.f32.mrb[51].mxu0 }
 0x140   :  { %v600_v42 = vadd.f32 %v599_v39, %v598_v36 }
 0x142   :  { %v6642_v43 = vpop.f32.mrb[52].mxu0 }
 0x143   :  { %v601_v44 = vsel %vm9006_vm5, %v6642_v43, 0.0  ;;  %v5821_v46 = vpop.f32.mrb[53].mxu0 }
 0x144   :  { %v602_v47 = vadd.f32 %v601_v44, %v600_v42 }
 0x146   :  { %v6646_v48 = vpop.f32.mrb[54].mxu0 }
 0x147   :  { %v603_v50 = vsel %vm9006_vm5, %v6646_v48, 0.0  ;;  %v5824_v51 = vpop.f32.mrb[55].mxu0 }
 0x148   :  { %v604_v52 = vadd.f32 %v603_v50, %v602_v47 }
 0x14a   :  { %v6650_v55 = vpop.f32.mrb[56].mxu0 }
 0x14b   :  { %v605_v57 = vsel %vm9006_vm5, %v6650_v55, 0.0  ;;  %v5827_v58 = vpop.f32.mrb[57].mxu0 }
 0x14c   :  { %v606_v60 = vadd.f32 %v605_v57, %v604_v52 }
 0x14e   :  { %v6654_v62 = vpop.f32.mrb[58].mxu0 }
 0x14f   :  { %v607_v63 = vsel %vm9006_vm5, %v6654_v62, 0.0  ;;  %v5830_v2 = vpop.f32.mrb[59].mxu0 }
 0x150   :  { %v608_v3 = vadd.f32 %v607_v63, %v606_v60 }
 0x152   :  { %v6658_v4 = vpop.f32.mrb[60].mxu0 }
 0x153   :  { %v609_v7 = vsel %vm9006_vm5, %v6658_v4, 0.0  ;;  %v5833_v8 = vpop.f32.mrb[61].mxu0 }
 0x154   :  { %v610_v10 = vadd.f32 %v609_v7, %v608_v3 }
 0x156   :  { %v6662_v12 = vpop.f32.mrb[62].mxu0 }
 0x157   :  { %v611_v14 = vsel %vm9006_vm5, %v6662_v12, 0.0  ;;  %v5836_v15 = vpop.f32.mrb[63].mxu0 }
 0x158   :  { %v612_v18 = vadd.f32 %v611_v14, %v610_v10 }
 0x15a   :  { %v6666_v19 = vpop.f32.mrb[64].mxu0 }
 0x15b   :  { %v613_v20 = vsel %vm9006_vm5, %v6666_v19, 0.0  ;;  %v5839_v23 = vpop.f32.mrb[65].mxu0 }
 0x15c   :  { %v614_v24 = vadd.f32 %v613_v20, %v612_v18 }
 0x15e   :  { %v6670_v26 = vpop.f32.mrb[66].mxu0 }
 0x15f   :  { %v615_v28 = vsel %vm9006_vm5, %v6670_v26, 0.0  ;;  %v5842_v30 = vpop.f32.mrb[67].mxu0 }
 0x160   :  { %v616_v31 = vadd.f32 %v615_v28, %v614_v24 }
 0x162   :  { %v6674_v34 = vpop.f32.mrb[68].mxu0 }
 0x163   :  { %v617_v35 = vsel %vm9006_vm5, %v6674_v34, 0.0  ;;  %v5845_v36 = vpop.f32.mrb[69].mxu0 }
 0x164   :  { %v618_v39 = vadd.f32 %v617_v35, %v616_v31 }
 0x166   :  { %v6678_v40 = vpop.f32.mrb[70].mxu0 }
 0x167   :  { %v619_v42 = vsel %vm9006_vm5, %v6678_v40, 0.0  ;;  %v5848_v44 = vpop.f32.mrb[71].mxu0 }
 0x168   :  { %v620_v46 = vadd.f32 %v619_v42, %v618_v39 }
 0x16a   :  { %v6682_v47 = vpop.f32.mrb[72].mxu0 }
 0x16b   :  { %v621_v50 = vsel %vm9006_vm5, %v6682_v47, 0.0  ;;  %v5851_v51 = vpop.f32.mrb[73].mxu0 }
 0x16c   :  { %v622_v52 = vadd.f32 %v621_v50, %v620_v46 }
 0x16e   :  { %v6686_v57 = vpop.f32.mrb[74].mxu0 }
 0x16f   :  { %v623_v58 = vsel %vm9006_vm5, %v6686_v57, 0.0  ;;  %v5854_v60 = vpop.f32.mrb[75].mxu0 }
 0x170   :  { %v624_v63 = vadd.f32 %v623_v58, %v622_v52 }
 0x172   :  { %v6690_v2 = vpop.f32.mrb[76].mxu0 }
 0x173   :  { %v625_v3 = vsel %vm9006_vm5, %v6690_v2, 0.0  ;;  %v5857_v7 = vpop.f32.mrb[77].mxu0 }
 0x174   :  { %v626_v8 = vadd.f32 %v625_v3, %v624_v63 }
 0x176   :  { %v6694_v10 = vpop.f32.mrb[78].mxu0 }
 0x177   :  { %v627_v14 = vsel %vm9006_vm5, %v6694_v10, 0.0  ;;  %v5860_v15 = vpop.f32.mrb[79].mxu0 }
 0x178   :  { %v628_v18 = vadd.f32 %v627_v14, %v626_v8 }
 0x17a   :  { %v6698_v20 = vpop.f32.mrb[80].mxu0 }
 0x17b   :  { %v629_v23 = vsel %vm9006_vm5, %v6698_v20, 0.0  ;;  %v5863_v24 = vpop.f32.mrb[81].mxu0 }
 0x17c   :  { %v630_v28 = vadd.f32 %v629_v23, %v628_v18 }
 0x17e   :  { %v6702_v30 = vpop.f32.mrb[82].mxu0 }
 0x17f   :  { %v631_v31 = vsel %vm9006_vm5, %v6702_v30, 0.0  ;;  %v5866_v35 = vpop.f32.mrb[83].mxu0 }
 0x180   :  { %v632_v36 = vadd.f32 %v631_v31, %v630_v28 }
 0x182   :  { %v6706_v39 = vpop.f32.mrb[84].mxu0 }
 0x183   :  { %v633_v42 = vsel %vm9006_vm5, %v6706_v39, 0.0  ;;  %v5869_v44 = vpop.f32.mrb[85].mxu0 }
 0x184   :  { %v634_v46 = vadd.f32 %v633_v42, %v632_v36 }
 0x186   :  { %v6710_v50 = vpop.f32.mrb[86].mxu0 }
 0x187   :  { %v635_v51 = vsel %vm9006_vm5, %v6710_v50, 0.0  ;;  %v5872_v52 = vpop.f32.mrb[87].mxu0 }
 0x188   :  { %v636_v58 = vadd.f32 %v635_v51, %v634_v46 }
 0x18a   :  { %v6714_v60 = vpop.f32.mrb[88].mxu0 }
 0x18b   :  { %9010 = vst [vmem:[#allocation10_spill] sm:$0xff] %v6714_v60  ;;  %v637_v63 = vsel %vm9006_vm5, %v6714_v60, 0.0  ;;  %v5875_v3 = vpop.f32.mrb[89].mxu0 }
 0x18c   :  { %v638_v7 = vadd.f32 %v637_v63, %v636_v58 }
 0x18e   :  { %v6718_v8 = vpop.f32.mrb[90].mxu0 }
 0x18f   :  { %9011 = vst [vmem:[#allocation11_spill] sm:$0xff] %v6718_v8  ;;  %v639_v14 = vsel %vm9006_vm5, %v6718_v8, 0.0  ;;  %v5878_v15 = vpop.f32.mrb[91].mxu0 }
 0x190   :  { %v640_v18 = vadd.f32 %v639_v14, %v638_v7 }
 0x192   :  { %v6722_v23 = vpop.f32.mrb[92].mxu0 }
 0x193   :  { %v641_v24 = vsel %vm9006_vm5, %v6722_v23, 0.0  ;;  %v5881_v28 = vpop.f32.mrb[93].mxu0 }
 0x194   :  { %v642_v31 = vadd.f32 %v641_v24, %v640_v18 }
 0x196   :  { %v538_v35 = vpop.f32.mrb[94].mxu0 }
 0x197   :  { %v643_v36 = vsel %vm9006_vm5, %v538_v35, 0.0  ;;  %v5884_v42 = vpop.f32.mrb[95].mxu0 }
 0x198   :  { %v644_v44 = vadd.f32 %v643_v36, %v642_v31 }
 0x19a   :  { %v543_v46 = vpop.f32.mrb[96].mxu0 }
 0x19b   :  { %v645_v51 = vsel %vm9006_vm5, %v543_v46, 0.0  ;;  %v5887_v52 = vpop.f32.mrb[97].mxu0 }
 0x19c   :  { %v646_v58 = vadd.f32 %v645_v51, %v644_v44 }
 0x19e   :  { %v647_v63 = vrot.slane %v646_v58, 4 }
 0x1a0   :  { %v648_v3 = vadd.f32 %v647_v63, %v646_v58 }
 0x1a2   :  { %v649_v7 = vrot.slane %v648_v3, 2 }
 0x1a4   :  { %v650_v14 = vadd.f32 %v649_v7, %v648_v3 }
 0x1a6   :  { %v651_v15 = vrot.slane %v650_v14, 1 }
 0x1a8   :  { %v652_v8 = vadd.f32 %v651_v15, %v650_v14 }
 0x1aa   :  { %v653_v60 = vmul.f32 0.0025510204, %v652_v8 }
 0x1ac   :  { %v6729_v28 = vsub.f32 %v6538_v54, %v653_v60  ;;  %v6732_v18 = vsub.f32 %v6540_v56, %v653_v60  ;;  %v6735_v24 = vsub.f32 %v6546_v61, %v653_v60  ;;  %v6738_v31 = vsub.f32 %v6550_v1, %v653_v60 }
 0x1ad   :  { %v6741_v36 = vsub.f32 %v6554_v5, %v653_v60  ;;  %v6744_v42 = vsub.f32 %v6558_v9, %v653_v60  ;;  %v6747_v8 = vsub.f32 %v6562_v13, %v653_v60  ;;  %v6750_v54 = vsub.f32 %v6566_v17, %v653_v60 }
 0x1ae   :  { %v6753_v56 = vsub.f32 %v6570_v21, %v653_v60  ;;  %v6756_v61 = vsub.f32 %v6574_v25, %v653_v60  ;;  %v6759_v1 = vsub.f32 %v6578_v29, %v653_v60  ;;  %v6762_v5 = vsub.f32 %v6582_v33, %v653_v60 }
 0x1af   :  { %v6765_v9 = vsub.f32 %v6586_v37, %v653_v60  ;;  %v6768_v13 = vsub.f32 %v6590_v41, %v653_v60  ;;  %v6771_v17 = vsub.f32 %v6594_v45, %v653_v60  ;;  %v6774_v21 = vsub.f32 %v6598_v49, %v653_v60 }
 0x1b0   :  { %v6777_v25 = vsub.f32 %v6602_v53, %v653_v60  ;;  %v6780_v29 = vsub.f32 %v6606_v59, %v653_v60  ;;  %v6783_v33 = vsub.f32 %v6610_v0, %v653_v60  ;;  %v6786_v37 = vsub.f32 %v6614_v6, %v653_v60 }
 0x1b1   :  { %v6789_v41 = vsub.f32 %v6618_v11, %v653_v60  ;;  %v6792_v45 = vsub.f32 %v6622_v16, %v653_v60  ;;  %v6795_v49 = vsub.f32 %v6626_v22, %v653_v60  ;;  %v6798_v53 = vsub.f32 %v6630_v27, %v653_v60 }
 0x1b2   :  { %v6801_v59 = vsub.f32 %v6634_v32, %v653_v60  ;;  %v6804_v0 = vsub.f32 %v6638_v38, %v653_v60  ;;  %v6807_v6 = vsub.f32 %v6642_v43, %v653_v60  ;;  %v6810_v11 = vsub.f32 %v6646_v48, %v653_v60 }
 0x1b3   :  { %v6813_v16 = vsub.f32 %v6650_v55, %v653_v60  ;;  %v6816_v22 = vsub.f32 %v6654_v62, %v653_v60  ;;  %v6819_v27 = vsub.f32 %v6658_v4, %v653_v60  ;;  %v6822_v32 = vsub.f32 %v6662_v12, %v653_v60 }
 0x1b4   :  { %v6825_v38 = vsub.f32 %v6666_v19, %v653_v60  ;;  %v6828_v43 = vsub.f32 %v6670_v26, %v653_v60  ;;  %v6831_v48 = vsub.f32 %v6674_v34, %v653_v60  ;;  %v6834_v55 = vsub.f32 %v6678_v40, %v653_v60 }
 0x1b5   :  { %v6837_v62 = vsub.f32 %v6682_v47, %v653_v60  ;;  %v6840_v4 = vsub.f32 %v6686_v57, %v653_v60  ;;  %v6843_v12 = vsub.f32 %v6690_v2, %v653_v60  ;;  %v6846_v19 = vsub.f32 %v6694_v10, %v653_v60  ;;  %v9015_v57 = vld [vmem:[#allocation10_spill] sm:$0xff]  ;;  %v9017_v2 = vld [vmem:[#allocation11_spill] sm:$0xff] }
 0x1b6   :  { %v6849_v26 = vsub.f32 %v6698_v20, %v653_v60  ;;  %v6852_v34 = vsub.f32 %v6702_v30, %v653_v60  ;;  %v6855_v40 = vsub.f32 %v6706_v39, %v653_v60  ;;  %v6858_v47 = vsub.f32 %v6710_v50, %v653_v60 }
 0x1b7   :  { %v6861_v44 = vsub.f32 %v9015_v57, %v653_v60  ;;  %v6864_v51 = vsub.f32 %v9017_v2, %v653_v60  ;;  %v6867_v10 = vsub.f32 %v6722_v23, %v653_v60  ;;  %v6869_v20 = vsub.f32 %v538_v35, %v653_v60 }
 0x1b8   :  { %9012 = vst [vmem:[#allocation12_spill] sm:$0xff] %v6852_v34  ;;  %9013 = vst [vmem:[#allocation13_spill] sm:$0xff] %v6855_v40  ;;  %v6871_v52 = vsub.f32 %v543_v46, %v653_v60  ;;  %v703_v30 = vmul.f32 %v6729_v28, %v6729_v28  ;;  %v704_v39 = vmul.f32 %v6732_v18, %v6732_v18 }
 0x1b9   :  { %9014 = vst [vmem:[#allocation14_spill] sm:$0xff] %v6858_v47  ;;  %9016 = vst [vmem:[#allocation10_spill] sm:$0xff] %v6861_v44  ;;  %v705_v50 = vmul.f32 %v6735_v24, %v6735_v24  ;;  %v706_v58 = vmul.f32 %v6738_v31, %v6738_v31  ;;  %v707_v60 = vmul.f32 %v6741_v36, %v6741_v36 }
 0x1ba   :  { %v752_v63 = vsel %vm9006_vm5, %v703_v30, 0.0  ;;  %v753_v23 = vsel %vm9006_vm5, %v704_v39, 0.0  ;;  %v708_v7 = vmul.f32 %v6744_v42, %v6744_v42  ;;  %v709_v57 = vmul.f32 %v6747_v8, %v6747_v8 }
 0x1bb   :  { %v754_v35 = vadd.f32 %v753_v23, %v752_v63  ;;  %v755_v46 = vsel %vm9006_vm5, %v705_v50, 0.0  ;;  %v757_v14 = vsel %vm9006_vm5, %v706_v58, 0.0  ;;  %v759_v2 = vsel %vm9006_vm5, %v707_v60, 0.0 }
 0x1bc   :  { %v710_v39 = vmul.f32 %v6750_v54, %v6750_v54  ;;  %v761_v63 = vsel %vm9006_vm5, %v708_v7, 0.0  ;;  %v711_v50 = vmul.f32 %v6753_v56, %v6753_v56  ;;  %v712_v58 = vmul.f32 %v6756_v61, %v6756_v61 }
 0x1bd   :  { %v756_v3 = vadd.f32 %v755_v46, %v754_v35  ;;  %v763_v35 = vsel %vm9006_vm5, %v709_v57, 0.0  ;;  %v713_v60 = vmul.f32 %v6759_v1, %v6759_v1  ;;  %v714_v7 = vmul.f32 %v6762_v5, %v6762_v5 }
 0x1be   :  { %v715_v57 = vmul.f32 %v6765_v9, %v6765_v9 }
 0x1bf   :  { %v758_v15 = vadd.f32 %v757_v14, %v756_v3  ;;  %v765_v3 = vsel %vm9006_vm5, %v710_v39, 0.0  ;;  %v716_v39 = vmul.f32 %v6768_v13, %v6768_v13 }
 0x1c1   :  { %v760_v30 = vadd.f32 %v759_v2, %v758_v15  ;;  %v767_v15 = vsel %vm9006_vm5, %v711_v50, 0.0  ;;  %v717_v50 = vmul.f32 %v6771_v17, %v6771_v17 }
 0x1c3   :  { %v762_v23 = vadd.f32 %v761_v63, %v760_v30  ;;  %v769_v30 = vsel %vm9006_vm5, %v712_v58, 0.0  ;;  %v718_v58 = vmul.f32 %v6774_v21, %v6774_v21 }
 0x1c5   :  { %v764_v46 = vadd.f32 %v763_v35, %v762_v23  ;;  %v771_v23 = vsel %vm9006_vm5, %v713_v60, 0.0  ;;  %v719_v60 = vmul.f32 %v6777_v25, %v6777_v25 }
 0x1c7   :  { %v766_v14 = vadd.f32 %v765_v3, %v764_v46  ;;  %v773_v46 = vsel %vm9006_vm5, %v714_v7, 0.0  ;;  %v720_v7 = vmul.f32 %v6780_v29, %v6780_v29 }
 0x1c9   :  { %v768_v2 = vadd.f32 %v767_v15, %v766_v14  ;;  %v775_v14 = vsel %vm9006_vm5, %v715_v57, 0.0  ;;  %v721_v57 = vmul.f32 %v6783_v33, %v6783_v33 }
 0x1cb   :  { %v770_v63 = vadd.f32 %v769_v30, %v768_v2  ;;  %v777_v2 = vsel %vm9006_vm5, %v716_v39, 0.0  ;;  %v722_v39 = vmul.f32 %v6786_v37, %v6786_v37 }
 0x1cd   :  { %v772_v35 = vadd.f32 %v771_v23, %v770_v63  ;;  %v779_v63 = vsel %vm9006_vm5, %v717_v50, 0.0  ;;  %v723_v50 = vmul.f32 %v6789_v41, %v6789_v41 }
 0x1cf   :  { %v774_v3 = vadd.f32 %v773_v46, %v772_v35  ;;  %v781_v35 = vsel %vm9006_vm5, %v718_v58, 0.0  ;;  %v724_v58 = vmul.f32 %v6792_v45, %v6792_v45 }
 0x1d1   :  { %v776_v15 = vadd.f32 %v775_v14, %v774_v3  ;;  %v783_v3 = vsel %vm9006_vm5, %v719_v60, 0.0  ;;  %v725_v60 = vmul.f32 %v6795_v49, %v6795_v49 }
 0x1d3   :  { %v778_v30 = vadd.f32 %v777_v2, %v776_v15  ;;  %v785_v15 = vsel %vm9006_vm5, %v720_v7, 0.0  ;;  %v726_v7 = vmul.f32 %v6798_v53, %v6798_v53 }
 0x1d5   :  { %v780_v23 = vadd.f32 %v779_v63, %v778_v30  ;;  %v787_v30 = vsel %vm9006_vm5, %v721_v57, 0.0  ;;  %v727_v57 = vmul.f32 %v6801_v59, %v6801_v59 }
 0x1d7   :  { %v782_v46 = vadd.f32 %v781_v35, %v780_v23  ;;  %v789_v23 = vsel %vm9006_vm5, %v722_v39, 0.0  ;;  %v728_v39 = vmul.f32 %v6804_v0, %v6804_v0 }
 0x1d9   :  { %v784_v14 = vadd.f32 %v783_v3, %v782_v46  ;;  %v791_v46 = vsel %vm9006_vm5, %v723_v50, 0.0  ;;  %v729_v50 = vmul.f32 %v6807_v6, %v6807_v6 }
 0x1db   :  { %v786_v2 = vadd.f32 %v785_v15, %v784_v14  ;;  %v793_v14 = vsel %vm9006_vm5, %v724_v58, 0.0  ;;  %v730_v58 = vmul.f32 %v6810_v11, %v6810_v11 }
 0x1dd   :  { %v788_v63 = vadd.f32 %v787_v30, %v786_v2  ;;  %v795_v2 = vsel %vm9006_vm5, %v725_v60, 0.0  ;;  %v731_v60 = vmul.f32 %v6813_v16, %v6813_v16 }
 0x1df   :  { %v790_v35 = vadd.f32 %v789_v23, %v788_v63  ;;  %v797_v63 = vsel %vm9006_vm5, %v726_v7, 0.0  ;;  %v732_v7 = vmul.f32 %v6816_v22, %v6816_v22 }
 0x1e1   :  { %v792_v3 = vadd.f32 %v791_v46, %v790_v35  ;;  %v799_v35 = vsel %vm9006_vm5, %v727_v57, 0.0  ;;  %v733_v57 = vmul.f32 %v6819_v27, %v6819_v27 }
 0x1e3   :  { %v794_v15 = vadd.f32 %v793_v14, %v792_v3  ;;  %v801_v3 = vsel %vm9006_vm5, %v728_v39, 0.0  ;;  %v734_v39 = vmul.f32 %v6822_v32, %v6822_v32 }
 0x1e5   :  { %v796_v30 = vadd.f32 %v795_v2, %v794_v15  ;;  %v803_v15 = vsel %vm9006_vm5, %v729_v50, 0.0  ;;  %v735_v50 = vmul.f32 %v6825_v38, %v6825_v38 }
 0x1e7   :  { %v798_v23 = vadd.f32 %v797_v63, %v796_v30  ;;  %v805_v30 = vsel %vm9006_vm5, %v730_v58, 0.0  ;;  %v736_v58 = vmul.f32 %v6828_v43, %v6828_v43 }
 0x1e9   :  { %v800_v46 = vadd.f32 %v799_v35, %v798_v23  ;;  %v807_v23 = vsel %vm9006_vm5, %v731_v60, 0.0  ;;  %v737_v60 = vmul.f32 %v6831_v48, %v6831_v48 }
 0x1eb   :  { %v802_v14 = vadd.f32 %v801_v3, %v800_v46  ;;  %v809_v46 = vsel %vm9006_vm5, %v732_v7, 0.0  ;;  %v738_v7 = vmul.f32 %v6834_v55, %v6834_v55 }
 0x1ed   :  { %v804_v2 = vadd.f32 %v803_v15, %v802_v14  ;;  %v811_v14 = vsel %vm9006_vm5, %v733_v57, 0.0  ;;  %v739_v57 = vmul.f32 %v6837_v62, %v6837_v62 }
 0x1ef   :  { %v806_v63 = vadd.f32 %v805_v30, %v804_v2  ;;  %v813_v2 = vsel %vm9006_vm5, %v734_v39, 0.0  ;;  %v740_v39 = vmul.f32 %v6840_v4, %v6840_v4 }
 0x1f1   :  { %v808_v35 = vadd.f32 %v807_v23, %v806_v63  ;;  %v815_v63 = vsel %vm9006_vm5, %v735_v50, 0.0  ;;  %v741_v50 = vmul.f32 %v6843_v12, %v6843_v12 }
 0x1f3   :  { %v810_v3 = vadd.f32 %v809_v46, %v808_v35  ;;  %v817_v35 = vsel %vm9006_vm5, %v736_v58, 0.0  ;;  %v742_v58 = vmul.f32 %v6846_v19, %v6846_v19 }
 0x1f5   :  { %v812_v15 = vadd.f32 %v811_v14, %v810_v3  ;;  %v819_v3 = vsel %vm9006_vm5, %v737_v60, 0.0  ;;  %v743_v60 = vmul.f32 %v6849_v26, %v6849_v26 }
 0x1f7   :  { %v814_v30 = vadd.f32 %v813_v2, %v812_v15  ;;  %v821_v15 = vsel %vm9006_vm5, %v738_v7, 0.0  ;;  %v744_v7 = vmul.f32 %v6852_v34, %v6852_v34 }
 0x1f9   :  { %v816_v23 = vadd.f32 %v815_v63, %v814_v30  ;;  %v823_v30 = vsel %vm9006_vm5, %v739_v57, 0.0  ;;  %v745_v57 = vmul.f32 %v6855_v40, %v6855_v40 }
 0x1fb   :  { %v818_v46 = vadd.f32 %v817_v35, %v816_v23  ;;  %v825_v23 = vsel %vm9006_vm5, %v740_v39, 0.0  ;;  %v746_v39 = vmul.f32 %v6858_v47, %v6858_v47 }
 0x1fd   :  { %v820_v14 = vadd.f32 %v819_v3, %v818_v46  ;;  %v827_v46 = vsel %vm9006_vm5, %v741_v50, 0.0  ;;  %v747_v50 = vmul.f32 %v6861_v44, %v6861_v44 }
 0x1ff   :  { %v822_v2 = vadd.f32 %v821_v15, %v820_v14  ;;  %v829_v14 = vsel %vm9006_vm5, %v742_v58, 0.0  ;;  %v748_v58 = vmul.f32 %v6864_v51, %v6864_v51 }
 0x201   :  { %v824_v63 = vadd.f32 %v823_v30, %v822_v2  ;;  %v831_v2 = vsel %vm9006_vm5, %v743_v60, 0.0  ;;  %v749_v60 = vmul.f32 %v6867_v10, %v6867_v10 }
 0x203   :  { %v826_v35 = vadd.f32 %v825_v23, %v824_v63  ;;  %v833_v63 = vsel %vm9006_vm5, %v744_v7, 0.0  ;;  %v750_v7 = vmul.f32 %v6869_v20, %v6869_v20 }
 0x205   :  { %v828_v3 = vadd.f32 %v827_v46, %v826_v35  ;;  %v835_v35 = vsel %vm9006_vm5, %v745_v57, 0.0  ;;  %v751_v57 = vmul.f32 %v6871_v52, %v6871_v52 }
 0x207   :  { %v830_v15 = vadd.f32 %v829_v14, %v828_v3  ;;  %v837_v3 = vsel %vm9006_vm5, %v746_v39, 0.0  ;;  %v845_v39 = vsel %vm9006_vm5, %v750_v7, 0.0 }
 0x209   :  { %v832_v30 = vadd.f32 %v831_v2, %v830_v15  ;;  %v839_v15 = vsel %vm9006_vm5, %v747_v50, 0.0 }
 0x20b   :  { %v834_v23 = vadd.f32 %v833_v63, %v832_v30  ;;  %v841_v30 = vsel %vm9006_vm5, %v748_v58, 0.0 }
 0x20d   :  { %v836_v46 = vadd.f32 %v835_v35, %v834_v23  ;;  %v843_v23 = vsel %vm9006_vm5, %v749_v60, 0.0  ;;  %v7025_v60 = vld [vmem:[%s8995_s5] ss:$0 sm:$0xff] }
 0x20f   :  { %v838_v14 = vadd.f32 %v837_v3, %v836_v46  ;;  %v847_v3 = vsel %vm9006_vm5, %v751_v57, 0.0 }
 0x211   :  { %v840_v2 = vadd.f32 %v839_v15, %v838_v14 }
 0x213   :  { %v842_v63 = vadd.f32 %v841_v30, %v840_v2 }
 0x215   :  { %v844_v35 = vadd.f32 %v843_v23, %v842_v63 }
 0x217   :  { %v846_v46 = vadd.f32 %v845_v39, %v844_v35 }
 0x219   :  { %v848_v44 = vadd.f32 %v847_v3, %v846_v46 }
 0x21b   :  { %v849_v50 = vrot.slane %v848_v44, 4 }
 0x21d   :  { %v850_v14 = vadd.f32 %v849_v50, %v848_v44 }
 0x21f   :  { %v851_v15 = vrot.slane %v850_v14, 2 }
 0x221   :  { %v852_v47 = vadd.f32 %v851_v15, %v850_v14 }
 0x223   :  { %v853_v40 = vrot.slane %v852_v47, 1 }
 0x225   :  { %v854_v34 = vadd.f32 %v853_v40, %v852_v47  ;;  %v7038_v40 = vld [vmem:[%s8996_s6] ss:$0 sm:$0xff] }
 0x227   :  { %v855_v58 = vmul.f32 0.0025510204, %v854_v34 }
 0x229   :  { %v856_v2 = vadd.f32 1e-05, %v855_v58 }
 0x22b   :  { %6148 = vrsqrt.f32 %v856_v2 }
 0x235   :  { %v7020_v30 = vpop.eup %6148 }
 0x236   :  { %v903_v7 = vmul.f32 %v7020_v30, %v6864_v51  ;;  %v904_v44 = vmul.f32 %v7020_v30, %v6867_v10  ;;  %v905_v63 = vmul.f32 %v7020_v30, %v6869_v20  ;;  %v906_v34 = vmul.f32 %v7020_v30, %v6871_v52 }
 0x237   :  { %v7046_v10 = vmul.f32 %v7020_v30, %v6729_v28  ;;  %v859_v46 = vmul.f32 %v7020_v30, %v6732_v18  ;;  %v860_v3 = vmul.f32 %v7020_v30, %v6735_v24  ;;  %v861_v50 = vmul.f32 %v7020_v30, %v6738_v31 }
 0x238   :  { %v956_v47 = vmul.f32 %v7025_v60, %v903_v7  ;;  %v957_v57 = vmul.f32 %v7025_v60, %v904_v44  ;;  %v958_v51 = vmul.f32 %v7025_v60, %v905_v63  ;;  %v959_v23 = vmul.f32 %v7025_v60, %v906_v34 }
 0x239   :  { %v862_v28 = vmul.f32 %v7020_v30, %v6741_v36  ;;  %v863_v7 = vmul.f32 %v7020_v30, %v6744_v42  ;;  %v864_v44 = vmul.f32 %v7020_v30, %v6747_v8  ;;  %v865_v18 = vmul.f32 %v7020_v30, %v6750_v54 }
 0x23a   :  { %v1009_v20 = vadd.f32 %v7038_v40, %v956_v47  ;;  %v1010_v52 = vadd.f32 %v7038_v40, %v957_v57  ;;  %v1011_v35 = vadd.f32 %v7038_v40, %v958_v51  ;;  %v1012_v39 = vadd.f32 %v7038_v40, %v959_v23  ;;  %v9018_v57 = vld [vmem:[#allocation12_spill] sm:$0xff] }
 0x23b   :  { %v866_v24 = vmul.f32 %v7020_v30, %v6753_v56  ;;  %v867_v31 = vmul.f32 %v7020_v30, %v6756_v61  ;;  %v868_v36 = vmul.f32 %v7020_v30, %v6759_v1  ;;  %v869_v42 = vmul.f32 %v7020_v30, %v6762_v5 }
 0x23c   :  { %v1058_v14 = vmax.f32 %v1009_v20, 0.0  ;;  %v1059_v15 = vmax.f32 %v1010_v52, 0.0  ;;  %v1060_v58 = vmax.f32 %v1011_v35, 0.0  ;;  %v1061_v2 = vmax.f32 %v1012_v39, 0.0  ;;  %v9021_v52 = vld [vmem:[#allocation10_spill] sm:$0xff] }
 0x23d   :  { %v870_v8 = vmul.f32 %v7020_v30, %v6765_v9  ;;  %v871_v54 = vmul.f32 %v7020_v30, %v6768_v13  ;;  %v872_v56 = vmul.f32 %v7020_v30, %v6771_v17  ;;  %v873_v63 = vmul.f32 %v7020_v30, %v6774_v21 }
 0x23e   :  { %1107 = vst.msk [vmem:[#allocation2 + $0x168] sm:$0xff] %vm9006_vm5, %v1058_v14  ;;  %1108 = vst.msk [vmem:[#allocation2 + $0x170] sm:$0xff] %vm9006_vm5, %v1059_v15  ;;  %v874_v61 = vmul.f32 %v7020_v30, %v6777_v25  ;;  %v875_v1 = vmul.f32 %v7020_v30, %v6780_v29  ;;  %v876_v5 = vmul.f32 %v7020_v30, %v6783_v33 }
 0x23f   :  { %1109 = vst.msk [vmem:[#allocation2 + $0x178] sm:$0xff] %vm9006_vm5, %v1060_v58  ;;  %1110 = vst.msk [vmem:[#allocation2 + $0x180] sm:$0xff] %vm9006_vm5, %v1061_v2  ;;  %v877_v9 = vmul.f32 %v7020_v30, %v6786_v37  ;;  %v878_v13 = vmul.f32 %v7020_v30, %v6789_v41  ;;  %v879_v17 = vmul.f32 %v7020_v30, %v6792_v45 }
 0x240   :  { %v880_v21 = vmul.f32 %v7020_v30, %v6795_v49  ;;  %v881_v25 = vmul.f32 %v7020_v30, %v6798_v53  ;;  %v882_v29 = vmul.f32 %v7020_v30, %v6801_v59  ;;  %v883_v33 = vmul.f32 %v7020_v30, %v6804_v0 }
 0x241   :  { %v884_v37 = vmul.f32 %v7020_v30, %v6807_v6  ;;  %v885_v41 = vmul.f32 %v7020_v30, %v6810_v11  ;;  %v886_v45 = vmul.f32 %v7020_v30, %v6813_v16  ;;  %v887_v49 = vmul.f32 %v7020_v30, %v6816_v22 }
 0x242   :  { %v888_v53 = vmul.f32 %v7020_v30, %v6819_v27  ;;  %v889_v59 = vmul.f32 %v7020_v30, %v6822_v32  ;;  %v890_v0 = vmul.f32 %v7020_v30, %v6825_v38  ;;  %v891_v6 = vmul.f32 %v7020_v30, %v6828_v43 }
 0x243   :  { %v892_v11 = vmul.f32 %v7020_v30, %v6831_v48  ;;  %v893_v16 = vmul.f32 %v7020_v30, %v6834_v55  ;;  %v894_v22 = vmul.f32 %v7020_v30, %v6837_v62  ;;  %v895_v32 = vmul.f32 %v7020_v30, %v6840_v4  ;;  %v9019_v4 = vld [vmem:[#allocation13_spill] sm:$0xff] }
 0x244   :  { %v7132_v38 = vmul.f32 %v7020_v30, %v6843_v12  ;;  %v7136_v43 = vmul.f32 %v7020_v30, %v6846_v19  ;;  %v7140_v48 = vmul.f32 %v7020_v30, %v6849_v26  ;;  %v7144_v51 = vmul.f32 %v7020_v30, %v9018_v57  ;;  %v9020_v12 = vld [vmem:[#allocation14_spill] sm:$0xff] }
 0x245   :  { %v7148_v23 = vmul.f32 %v7020_v30, %v9019_v4  ;;  %v7152_v20 = vmul.f32 %v7020_v30, %v9020_v12  ;;  %v7156_v26 = vmul.f32 %v7020_v30, %v9021_v52  ;;  %v911_v35 = vmul.f32 %v7025_v60, %v7046_v10 }
 0x246   :  { %v1461_v34 = vld [vmem:[#allocation2 + $0x16c] ss:$2 sm:$0x7f]  ;;  %v1463_v27 = vld [vmem:[#allocation2 + $0x16d] ss:$2 sm:$0x7f]  ;;  %v912_v39 = vmul.f32 %v7025_v60, %v859_v46  ;;  %v913_v14 = vmul.f32 %v7025_v60, %v860_v3  ;;  %v914_v15 = vmul.f32 %v7025_v60, %v861_v50  ;;  %v915_v58 = vmul.f32 %v7025_v60, %v862_v28 }
 0x247   :  { %v1465_v55 = vld [vmem:[#allocation2 + $0x17a] ss:$2 sm:$0x7f]  ;;  %v1467_v47 = vld [vmem:[#allocation2 + $0x17b] ss:$2 sm:$0x7f]  ;;  %v1468_v62 = vmax.f32 %v1461_v34, %v1463_v27  ;;  %v916_v2 = vmul.f32 %v7025_v60, %v863_v7  ;;  %v917_v27 = vmul.f32 %v7025_v60, %v864_v44  ;;  %v919_v30 = vmul.f32 %v7025_v60, %v866_v24 }
 0x248   :  { %v1469_v19 = vmax.f32 %v1465_v55, %v1467_v47  ;;  %v918_v55 = vmul.f32 %v7025_v60, %v865_v18  ;;  %v920_v47 = vmul.f32 %v7025_v60, %v867_v31  ;;  %v921_v10 = vmul.f32 %v7025_v60, %v868_v36 }
 0x249   :  { %v7171_v46 = vmul.f32 %v7025_v60, %v869_v42  ;;  %v7174_v3 = vmul.f32 %v7025_v60, %v870_v8  ;;  %v7177_v28 = vmul.f32 %v7025_v60, %v871_v54  ;;  %v7180_v7 = vmul.f32 %v7025_v60, %v872_v56 }
 0x24a   :  { %v1470_v34 = vmax.f32 %v1468_v62, %v1469_v19  ;;  %v7183_v44 = vmul.f32 %v7025_v60, %v873_v63  ;;  %v7186_v18 = vmul.f32 %v7025_v60, %v874_v61  ;;  %v7189_v24 = vmul.f32 %v7025_v60, %v875_v1 }
 0x24b   :  { %v7192_v31 = vmul.f32 %v7025_v60, %v876_v5  ;;  %v7195_v36 = vmul.f32 %v7025_v60, %v877_v9  ;;  %v7198_v54 = vmul.f32 %v7025_v60, %v878_v13  ;;  %v7201_v56 = vmul.f32 %v7025_v60, %v879_v17 }
 0x24c   :  { %v5447_v50 = vpack.c.bf16 %v1470_v34, %v1470_v34  ;;  %v7204_v63 = vmul.f32 %v7025_v60, %v880_v21  ;;  %v7207_v61 = vmul.f32 %v7025_v60, %v881_v25  ;;  %v7210_v1 = vmul.f32 %v7025_v60, %v882_v29 }
 0x24d   :  { %v7213_v5 = vmul.f32 %v7025_v60, %v883_v33  ;;  %v7216_v9 = vmul.f32 %v7025_v60, %v884_v37  ;;  %v7219_v13 = vmul.f32 %v7025_v60, %v885_v41  ;;  %v7222_v17 = vmul.f32 %v7025_v60, %v886_v45 }
 0x24e   :  { %v1476_v42 = vshrl.u32 %v5447_v50, 16  ;;  %v1479_v8 = vshll.u32 %v5447_v50, 16  ;;  %v7225_v21 = vmul.f32 %v7025_v60, %v887_v49  ;;  %v7230_v29 = vmul.f32 %v7025_v60, %v888_v53 }
 0x24f   :  { %v7233_v33 = vmul.f32 %v7025_v60, %v889_v59  ;;  %v7236_v37 = vmul.f32 %v7025_v60, %v890_v0  ;;  %v7241_v41 = vmul.f32 %v7025_v60, %v891_v6  ;;  %v7244_v45 = vmul.f32 %v7025_v60, %v892_v11 }
 0x250   :  { %v7227_v25 = vrot.slane %v1476_v42, 6  ;;  %v7238_v62 = vrot.slane %v1479_v8, 7  ;;  %v7247_v49 = vmul.f32 %v7025_v60, %v893_v16  ;;  %v7250_v53 = vmul.f32 %v7025_v60, %v894_v22 }
 0x251   :  { %v7253_v59 = vmul.f32 %v7025_v60, %v895_v32  ;;  %v964_v0 = vadd.f32 %v7038_v40, %v911_v35  ;;  %v965_v57 = vadd.f32 %v7038_v40, %v912_v39  ;;  %v966_v4 = vadd.f32 %v7038_v40, %v913_v14 }
 0x252   :  { %9022 = vst [vmem:[#allocation11_spill] sm:$0xff] %v7238_v62  ;;  %v967_v6 = vadd.f32 %v7038_v40, %v914_v15  ;;  %v968_v11 = vadd.f32 %v7038_v40, %v915_v58  ;;  %v969_v12 = vadd.f32 %v7038_v40, %v916_v2  ;;  %v970_v16 = vadd.f32 %v7038_v40, %v917_v27 }
 0x253   :  { %v971_v22 = vadd.f32 %v7038_v40, %v918_v55  ;;  %v972_v19 = vadd.f32 %v7038_v40, %v919_v30  ;;  %v973_v32 = vadd.f32 %v7038_v40, %v920_v47  ;;  %v974_v52 = vadd.f32 %v7038_v40, %v921_v10 }
 0x254   :  { %v1013_v35 = vmax.f32 %v964_v0, 0.0  ;;  %v1014_v39 = vmax.f32 %v965_v57, 0.0  ;;  %v1015_v34 = vmax.f32 %v966_v4, 0.0  ;;  %v1016_v14 = vmax.f32 %v967_v6, 0.0 }
 0x255   :  { %v1017_v50 = vmax.f32 %v968_v11, 0.0  ;;  %v1018_v15 = vmax.f32 %v969_v12, 0.0  ;;  %v1019_v42 = vmax.f32 %v970_v16, 0.0  ;;  %v1020_v58 = vmax.f32 %v971_v22, 0.0 }
 0x256   :  { %v1021_v8 = vmax.f32 %v972_v19, 0.0  ;;  %v1022_v2 = vmax.f32 %v973_v32, 0.0  ;;  %v1023_v62 = vmax.f32 %v974_v52, 0.0  ;;  %1062 = vst.msk [vmem:[#allocation2] sm:$0xff] %vm9006_vm5, %v1013_v35  ;;  %1063 = vst.msk [vmem:[#allocation2 + $0x8] sm:$0xff] %vm9006_vm5, %v1014_v39  ;;  %v949_v27 = vmul.f32 %v7025_v60, %v7132_v38 }
 0x257   :  { %1064 = vst.msk [vmem:[#allocation2 + $0x10] sm:$0xff] %vm9006_vm5, %v1015_v34  ;;  %v950_v55 = vmul.f32 %v7025_v60, %v7136_v43  ;;  %v951_v30 = vmul.f32 %v7025_v60, %v7140_v48  ;;  %v7277_v47 = vmul.f32 %v7025_v60, %v7144_v51  ;;  %1065 = vst.msk [vmem:[#allocation2 + $0x18] sm:$0xff] %vm9006_vm5, %v1016_v14 }
 0x258   :  { %1066 = vst.msk [vmem:[#allocation2 + $0x20] sm:$0xff] %vm9006_vm5, %v1017_v50  ;;  %1067 = vst.msk [vmem:[#allocation2 + $0x28] sm:$0xff] %vm9006_vm5, %v1018_v15  ;;  %v953_v38 = vmul.f32 %v7025_v60, %v7148_v23  ;;  %v954_v43 = vmul.f32 %v7025_v60, %v7152_v20  ;;  %v955_v48 = vmul.f32 %v7025_v60, %v7156_v26 }
 0x259   :  { %1068 = vst.msk [vmem:[#allocation2 + $0x30] sm:$0xff] %vm9006_vm5, %v1019_v42  ;;  %1069 = vst.msk [vmem:[#allocation2 + $0x38] sm:$0xff] %vm9006_vm5, %v1020_v58  ;;  %v7295_v51 = vadd.f32 %v7038_v40, %v7171_v46  ;;  %v7299_v23 = vadd.f32 %v7038_v40, %v7174_v3  ;;  %v7303_v20 = vadd.f32 %v7038_v40, %v7177_v28 }
 0x25a   :  { %1070 = vst.msk [vmem:[#allocation2 + $0x40] sm:$0xff] %vm9006_vm5, %v1021_v8  ;;  %1071 = vst.msk [vmem:[#allocation2 + $0x48] sm:$0xff] %vm9006_vm5, %v1022_v2  ;;  %v7307_v60 = vadd.f32 %v7038_v40, %v7180_v7  ;;  %v7311_v26 = vadd.f32 %v7038_v40, %v7183_v44  ;;  %v7315_v10 = vadd.f32 %v7038_v40, %v7186_v18  ;;  %v9025_v2 = vld [vmem:[#allocation11_spill] sm:$0xff] }
 0x25b   :  { %1072 = vst.msk [vmem:[#allocation2 + $0x50] sm:$0xff] %vm9006_vm5, %v1023_v62  ;;  %v7319_v46 = vadd.f32 %v7038_v40, %v7189_v24  ;;  %v7323_v3 = vadd.f32 %v7038_v40, %v7192_v31  ;;  %v7327_v28 = vadd.f32 %v7038_v40, %v7195_v36  ;;  %v7331_v7 = vadd.f32 %v7038_v40, %v7198_v54 }
 0x25c   :  { %v7335_v44 = vadd.f32 %v7038_v40, %v7201_v56  ;;  %v7339_v18 = vadd.f32 %v7038_v40, %v7204_v63  ;;  %v7343_v24 = vadd.f32 %v7038_v40, %v7207_v61  ;;  %v7347_v31 = vadd.f32 %v7038_v40, %v7210_v1 }
 0x25d   :  { %v7351_v36 = vadd.f32 %v7038_v40, %v7213_v5  ;;  %v7355_v54 = vadd.f32 %v7038_v40, %v7216_v9  ;;  %v7359_v56 = vadd.f32 %v7038_v40, %v7219_v13  ;;  %v1111_v63 = vld [vmem:[#allocation2] ss:$2 sm:$0x7f]  ;;  %v1113_v62 = vld [vmem:[#allocation2 + $0x1] ss:$2 sm:$0x7f]  ;;  %v7363_v61 = vadd.f32 %v7038_v40, %v7222_v17 }
 0x25e   :  { %v7367_v1 = vadd.f32 %v7038_v40, %v7225_v21  ;;  %v7371_v5 = vadd.f32 %v7038_v40, %v7230_v29  ;;  %v7375_v9 = vadd.f32 %v7038_v40, %v7233_v33  ;;  %v1115_v13 = vld [vmem:[#allocation2 + $0xe] ss:$2 sm:$0x7f]  ;;  %v1117_v0 = vld [vmem:[#allocation2 + $0xf] ss:$2 sm:$0x7f]  ;;  %v1118_v57 = vmax.f32 %v1111_v63, %v1113_v62 }
 0x25f   :  { %v7379_v4 = vadd.f32 %v7038_v40, %v7236_v37  ;;  %v7383_v17 = vadd.f32 %v7038_v40, %v7241_v41  ;;  %v7387_v21 = vadd.f32 %v7038_v40, %v7244_v45  ;;  %v1119_v29 = vmax.f32 %v1115_v13, %v1117_v0  ;;  %v1129_v6 = vld [vmem:[#allocation2 + $0x1c] ss:$2 sm:$0x7f]  ;;  %v1131_v11 = vld [vmem:[#allocation2 + $0x1d] ss:$2 sm:$0x7f] }
 0x260   :  { %v7391_v33 = vadd.f32 %v7038_v40, %v7247_v49  ;;  %v7395_v12 = vadd.f32 %v7038_v40, %v7250_v53  ;;  %v7399_v37 = vadd.f32 %v7038_v40, %v7253_v59  ;;  %v1125_v41 = vld [vmem:[#allocation3] sm:$0xf]  ;;  %v1136_v45 = vmax.f32 %v1129_v6, %v1131_v11 }
 0x261   :  { %v1133_v16 = vld [vmem:[#allocation2 + $0x2a] ss:$2 sm:$0x7f]  ;;  %v1135_v22 = vld [vmem:[#allocation2 + $0x2b] ss:$2 sm:$0x7f]  ;;  %v7402_v19 = vadd.f32 %v7038_v40, %v949_v27  ;;  %v7405_v49 = vadd.f32 %v7038_v40, %v950_v55  ;;  %v7408_v32 = vadd.f32 %v7038_v40, %v951_v30  ;;  %v1120_v53 = vmax.f32 %v1118_v57, %v1119_v29 }
 0x262   :  { %v1137_v52 = vmax.f32 %v1133_v16, %v1135_v22  ;;  %v1163_v59 = vld [vmem:[#allocation2 + $0x38] ss:$2 sm:$0x7f]  ;;  %v1165_v35 = vld [vmem:[#allocation2 + $0x39] ss:$2 sm:$0x7f]  ;;  %v7412_v39 = vadd.f32 %v7038_v40, %v7277_v47  ;;  %v7415_v34 = vadd.f32 %v7038_v40, %v953_v38  ;;  %v7424_v58 = vadd.f32 %v7038_v40, %v954_v43 }
 0x263   :  { %v1167_v50 = vld [vmem:[#allocation2 + $0x46] ss:$2 sm:$0x7f]  ;;  %v1169_v15 = vld [vmem:[#allocation2 + $0x47] ss:$2 sm:$0x7f]  ;;  %v1170_v42 = vmax.f32 %v1163_v59, %v1165_v35  ;;  %v7427_v8 = vadd.f32 %v7038_v40, %v955_v48  ;;  %v7431_v27 = vor.u32 %v9025_v2, %v7227_v25  ;;  %v1121_v55 = vpack.c.bf16 %v1120_v53, %v1120_v53 }
 0x264   :  { %v1138_v30 = vmax.f32 %v1136_v45, %v1137_v52  ;;  %v1171_v47 = vmax.f32 %v1167_v50, %v1169_v15  ;;  %v1024_v38 = vmax.f32 %v7295_v51, 0.0  ;;  %v1025_v63 = vmax.f32 %v7299_v23, 0.0  ;;  %v1186_v59 = vld [vmem:[#allocation3 + $0x8] sm:$0x7] }
 0x265   :  { %v1026_v62 = vmax.f32 %v7303_v20, 0.0  ;;  %v1027_v13 = vmax.f32 %v7307_v60, 0.0  ;;  %v1028_v43 = vmax.f32 %v7311_v26, 0.0  ;;  %v1126_v40 = vsel %vm7419_vm12, %v1121_v55, %v1125_v41 }
 0x266   :  { %v5436_v48 = vpack.c.bf16 %v1138_v30, %v1138_v30  ;;  %v1172_v0 = vmax.f32 %v1170_v42, %v1171_v47  ;;  %v1029_v25 = vmax.f32 %v7315_v10, 0.0  ;;  %1073 = vst.msk [vmem:[#allocation2 + $0x58] sm:$0xff] %vm9006_vm5, %v1024_v38  ;;  %1127 = vst [vmem:[#allocation3] sm:$0xf] %v1126_v40  ;;  %v1030_v51 = vmax.f32 %v7319_v46, 0.0 }
 0x267   :  { %v1031_v23 = vmax.f32 %v7323_v3, 0.0  ;;  %v1032_v20 = vmax.f32 %v7327_v28, 0.0  ;;  %v1033_v60 = vmax.f32 %v7331_v7, 0.0  ;;  %1074 = vst.msk [vmem:[#allocation2 + $0x60] sm:$0xff] %vm9006_vm5, %v1025_v63  ;;  %1075 = vst.msk [vmem:[#allocation2 + $0x68] sm:$0xff] %vm9006_vm5, %v1026_v62  ;;  %v1034_v29 = vmax.f32 %v7335_v44, 0.0 }
 0x268   :  { %1076 = vst.msk [vmem:[#allocation2 + $0x70] sm:$0xff] %vm9006_vm5, %v1027_v13  ;;  %1077 = vst.msk [vmem:[#allocation2 + $0x78] sm:$0xff] %vm9006_vm5, %v1028_v43  ;;  %v1144_v26 = vshll.u32 %v5436_v48, 16  ;;  %v1147_v10 = vshrl.u32 %v5436_v48, 16  ;;  %v5437_v57 = vpack.c.bf16 %v1172_v0, %v1172_v0  ;;  %v1035_v46 = vmax.f32 %v7339_v18, 0.0 }
 0x269   :  { %1078 = vst.msk [vmem:[#allocation2 + $0x80] sm:$0xff] %vm9006_vm5, %v1029_v25  ;;  %v1036_v3 = vmax.f32 %v7343_v24, 0.0  ;;  %v1037_v28 = vmax.f32 %v7347_v31, 0.0  ;;  %v1038_v7 = vmax.f32 %v7351_v36, 0.0  ;;  %1079 = vst.msk [vmem:[#allocation2 + $0x88] sm:$0xff] %vm9006_vm5, %v1030_v51  ;;  %v1039_v18 = vmax.f32 %v7355_v54, 0.0 }
 0x26a   :  { %1080 = vst.msk [vmem:[#allocation2 + $0x90] sm:$0xff] %vm9006_vm5, %v1031_v23  ;;  %1081 = vst.msk [vmem:[#allocation2 + $0x98] sm:$0xff] %vm9006_vm5, %v1032_v20  ;;  %v1146_v44 = vrot.slane %v1144_v26, 5  ;;  %v1149_v6 = vrot.slane %v1147_v10, 4  ;;  %v1177_v11 = vrot.slane %v5437_v57, 5  ;;  %v1040_v24 = vmax.f32 %v7359_v56, 0.0 }
 0x26b   :  { %1082 = vst.msk [vmem:[#allocation2 + $0xa0] sm:$0xff] %vm9006_vm5, %v1033_v60  ;;  %1083 = vst.msk [vmem:[#allocation2 + $0xa8] sm:$0xff] %vm9006_vm5, %v1034_v29  ;;  %v1041_v31 = vmax.f32 %v7363_v61, 0.0  ;;  %v1042_v36 = vmax.f32 %v7367_v1, 0.0  ;;  %v1043_v41 = vmax.f32 %v7371_v5, 0.0  ;;  %v1044_v61 = vmax.f32 %v7375_v9, 0.0 }
 0x26c   :  { %1084 = vst.msk [vmem:[#allocation2 + $0xb0] sm:$0xff] %vm9006_vm5, %v1035_v46  ;;  %1085 = vst.msk [vmem:[#allocation2 + $0xb8] sm:$0xff] %vm9006_vm5, %v1036_v3  ;;  %v1150_v16 = vor.u32 %v1149_v6, %v1146_v44  ;;  %v1178_v56 = vrot.slane %v1177_v11, 4  ;;  %v1045_v1 = vmax.f32 %v7379_v4, 0.0  ;;  %v1046_v5 = vmax.f32 %v7383_v17, 0.0 }
 0x26d   :  { %1086 = vst.msk [vmem:[#allocation2 + $0xc0] sm:$0xff] %vm9006_vm5, %v1037_v28  ;;  %1087 = vst.msk [vmem:[#allocation2 + $0xc8] sm:$0xff] %vm9006_vm5, %v1038_v7  ;;  %v1047_v22 = vmax.f32 %v7387_v21, 0.0  ;;  %v1048_v45 = vmax.f32 %v7391_v33, 0.0  ;;  %v1049_v53 = vmax.f32 %v7395_v12, 0.0  ;;  %v1050_v17 = vmax.f32 %v7399_v37, 0.0 }
 0x26e   :  { %1182 = vst.msk [vmem:[#allocation3 + $0x4] sm:$0x8] %vm1154_vm8, %v1177_v11  ;;  %v1151_v9 = vrot.slane %v1150_v16, 4  ;;  %v1157_v4 = vld [vmem:[#allocation3] sm:$0x8]  ;;  %v1051_v21 = vmax.f32 %v7402_v19, 0.0 }
 0x26f   :  { %1088 = vst.msk [vmem:[#allocation2 + $0xd0] sm:$0xff] %vm9006_vm5, %v1039_v18  ;;  %1089 = vst.msk [vmem:[#allocation2 + $0xd8] sm:$0xff] %vm9006_vm5, %v1040_v24  ;;  %v1052_v33 = vmax.f32 %v7405_v49, 0.0  ;;  %v1158_v12 = vsel %vm7472_vm14, %v1146_v44, %v1157_v4  ;;  %v1053_v35 = vmax.f32 %v7408_v32, 0.0  ;;  %v1054_v50 = vmax.f32 %v7412_v39, 0.0  ;;  %v5943_v4 = vld [vmem:[%s8992_s2 + $0x40] sm:$0xff]  }
 0x270   :  { %1090 = vst.msk [vmem:[#allocation2 + $0xe0] sm:$0xff] %vm9006_vm5, %v1041_v31  ;;  %1091 = vst.msk [vmem:[#allocation2 + $0xe8] sm:$0xff] %vm9006_vm5, %v1042_v36  ;;  %v1055_v15 = vmax.f32 %v7415_v34, 0.0  ;;  %v1190_v42 = vld [vmem:[#allocation2 + $0x54] ss:$2 sm:$0x7f]  ;;  %v1187_v49 = vsel %vm7486_vm15, %v1178_v56, %v1186_v59  ;;  %5499 = vmatprep.subr.bf16.mxu1 %v5943_v4 }
 0x271   :  { %1092 = vst.msk [vmem:[#allocation2 + $0xf0] sm:$0xff] %vm9006_vm5, %v1043_v41  ;;  %1093 = vst.msk [vmem:[#allocation2 + $0xf8] sm:$0xff] %vm9006_vm5, %v1044_v61  ;;  %v1056_v37 = vmax.f32 %v7424_v58, 0.0  ;;  %v1057_v19 = vmax.f32 %v7427_v8, 0.0  ;;  %v1483_v39 = vrot.slane %v7431_v27, 4  ;;  %v5962_v41 = vld [vmem:[%s8992_s2 + $0x80] sm:$0xff]  }
 0x272   :  { %1094 = vst.msk [vmem:[#allocation2 + $0x100] sm:$0xff] %vm9006_vm5, %v1045_v1  ;;  %1095 = vst.msk [vmem:[#allocation2 + $0x108] sm:$0xff] %vm9006_vm5, %v1046_v5  ;;  %v1192_v32 = vld [vmem:[#allocation2 + $0x55] ss:$2 sm:$0x7f] }
 0x273   :  { %1096 = vst.msk [vmem:[#allocation2 + $0x110] sm:$0xff] %vm9006_vm5, %v1047_v22  ;;  %1097 = vst.msk [vmem:[#allocation2 + $0x118] sm:$0xff] %vm9006_vm5, %v1048_v45  ;;  %v1194_v34 = vld [vmem:[#allocation2 + $0x62] ss:$2 sm:$0x7f]  ;;  %v1197_v55 = vmax.f32 %v1190_v42, %v1192_v32 }
 0x274   :  { %1098 = vst.msk [vmem:[#allocation2 + $0x120] sm:$0xff] %vm9006_vm5, %v1049_v53  ;;  %1159 = vst [vmem:[#allocation3] sm:$0x8] %v1158_v12  ;;  %v1196_v2 = vld [vmem:[#allocation2 + $0x63] ss:$2 sm:$0x7f] }
 0x275   :  { %1161 = vst.msk [vmem:[#allocation3 + $0x4] sm:$0x7] %vm9008_vm10, %v1151_v9  ;;  %1188 = vst [vmem:[#allocation3 + $0x8] sm:$0x7] %v1187_v49  ;;  %v1198_v58 = vmax.f32 %v1194_v34, %v1196_v2 }
 0x276   :  { %1099 = vst.msk [vmem:[#allocation2 + $0x128] sm:$0xff] %vm9006_vm5, %v1050_v17  ;;  %1100 = vst.msk [vmem:[#allocation2 + $0x130] sm:$0xff] %vm9006_vm5, %v1051_v21  ;;  %v1224_v8 = vld [vmem:[#allocation2 + $0x70] ss:$2 sm:$0x7f] }
 0x277   :  { %1101 = vst.msk [vmem:[#allocation2 + $0x138] sm:$0xff] %vm9006_vm5, %v1052_v33  ;;  %1102 = vst.msk [vmem:[#allocation2 + $0x140] sm:$0xff] %vm9006_vm5, %v1053_v35  ;;  %v1226_v30 = vld [vmem:[#allocation2 + $0x71] ss:$2 sm:$0x7f]  ;;  %v1199_v62 = vmax.f32 %v1197_v55, %v1198_v58 }
 0x278   :  { %1103 = vst.msk [vmem:[#allocation2 + $0x148] sm:$0xff] %vm9006_vm5, %v1054_v50  ;;  %1104 = vst.msk [vmem:[#allocation2 + $0x150] sm:$0xff] %vm9006_vm5, %v1055_v15  ;;  %v1228_v47 = vld [vmem:[#allocation2 + $0x7e] ss:$2 sm:$0x7f]  ;;  %v1231_v63 = vmax.f32 %v1224_v8, %v1226_v30 }
 0x279   :  { %1105 = vst.msk [vmem:[#allocation2 + $0x158] sm:$0xff] %vm9006_vm5, %v1056_v37  ;;  %1106 = vst.msk [vmem:[#allocation2 + $0x160] sm:$0xff] %vm9006_vm5, %v1057_v19  ;;  %v1230_v38 = vld [vmem:[#allocation2 + $0x7f] ss:$2 sm:$0x7f]  ;;  %v5438_v43 = vpack.c.bf16 %v1199_v62, %v1199_v62  ;;  %vm9009_vm5 = vcmask 517120  }
 0x27a   :  { %1489 = vst.msk [vmem:[#allocation3 + $0x30] sm:$0x1] %vm1282_vm13, %v1483_v39  ;;  %v1232_v13 = vmax.f32 %v1228_v47, %v1230_v38  ;;  %v1251_v10 = vld [vmem:[#allocation2 + $0x8c] ss:$2 sm:$0x7f]  ;;  %vm7544_vm10 = vmor %vm1123_vm7, %vm1524_vm2 }
 0x27b   :  { %v1760_v40 = vld [vmem:[#allocation3] sm:$0x8]  ;;  %v1253_v57 = vld [vmem:[#allocation2 + $0x8d] ss:$2 sm:$0x7f]  ;;  %v1205_v28 = vshrl.u32 %v5438_v43, 16  ;;  %vm7566_vm2 = vmand %vm9009_vm5, %vm1245_vm0 }
 0x27c   :  { %v1761_v48 = vld [vmem:[#allocation3 + $0x4] sm:$0xf]  ;;  %v1513_v0 = vld [vmem:[#allocation3] sm:$0xf]  ;;  %v1233_v25 = vmax.f32 %v1231_v63, %v1232_v13  ;;  %v1775_v51 = vshrl.u32 %v1760_v40, 16  ;;  %v1208_v36 = vshll.u32 %v5438_v43, 16  ;;  %v1258_v50 = vmax.f32 %v1251_v10, %v1253_v57 }
 0x27d   :  { %v1780_v23 = vshrl.u32 %v1761_v48, 16  ;;  %v1783_v20 = vshll.u32 %v1761_v48, 16  ;;  %v1514_v60 = vld [vmem:[#allocation3 + $0x4] sm:$0xf]  ;;  %v1527_v26 = vshrl.u32 %v1513_v0, 16  ;;  %v1530_v29 = vshll.u32 %v1513_v0, 16 }
 0x27e   :  { %v1536_v46 = vshll.u32 %v1514_v60, 16  ;;  %v1540_v3 = vshrl.u32 %v1514_v60, 16  ;;  %v1255_v7 = vld [vmem:[#allocation2 + $0x9a] ss:$2 sm:$0x7f]  ;;  %v5191_v18 = vrot.slane %v1775_v51, 11  ;;  %v5439_v9 = vpack.c.bf16 %v1233_v25, %v1233_v25 }
 0x27f   :  { %v1257_v44 = vld [vmem:[#allocation2 + $0x9b] ss:$2 sm:$0x7f]  ;;  %v1285_v6 = vld [vmem:[#allocation2 + $0xa8] ss:$2 sm:$0x7f] }
 0x280   :  { %v1287_v11 = vld [vmem:[#allocation2 + $0xa9] ss:$2 sm:$0x7f]  ;;  %v7523_v24 = vrot.slane %v1780_v23, 7  ;;  %v1529_v31 = vrot.slane %v1527_v26, 4  ;;  %v1532_v16 = vrot.slane %v1530_v29, 5  ;;  %v1259_v32 = vmax.f32 %v1255_v7, %v1257_v44 }
 0x281   :  { %v1538_v56 = vrot.slane %v1536_v46, 5  ;;  %v1542_v61 = vrot.slane %v1540_v3, 4  ;;  %v1207_v1 = vrot.slane %v1205_v28, 5  ;;  %v1218_v5 = vld [vmem:[#allocation3 + $0x8] sm:$0xc]  ;;  %v1210_v45 = vrot.slane %v1208_v36, 6 }
 0x282   :  { %v1785_v22 = vor.u32 %v1783_v20, %v7523_v24  ;;  %v1787_v53 = vrot.slane %v7523_v24, 4  ;;  %v1289_v59 = vld [vmem:[#allocation2 + $0xb6] ss:$2 sm:$0x7f]  ;;  %v1533_v17 = vor.u32 %v1532_v16, %v1529_v31  ;;  %v1292_v39 = vmax.f32 %v1285_v6, %v1287_v11  ;;  %v1351_v6 = vld [vmem:[#allocation3 + $0x1c] sm:$0xf] }
 0x283   :  { %v1543_v33 = vor.u32 %v1542_v61, %v1538_v56  ;;  %v1291_v12 = vld [vmem:[#allocation2 + $0xb7] ss:$2 sm:$0x7f]  ;;  %v1312_v35 = vld [vmem:[#allocation2 + $0xc4] ss:$2 sm:$0x7f]  ;;  %v7550_v37 = vor.u32 %v1210_v45, %v1207_v1  ;;  %v1260_v0 = vmax.f32 %v1258_v50, %v1259_v32 }
 0x284   :  { %v1786_v42 = vsel %vm7527_vm11, %v5191_v18, %v1785_v22  ;;  %v1314_v19 = vld [vmem:[#allocation2 + $0xc5] ss:$2 sm:$0x7f]  ;;  %v1316_v49 = vld [vmem:[#allocation2 + $0xd2] ss:$2 sm:$0x7f]  ;;  %v1293_v8 = vmax.f32 %v1289_v59, %v1291_v12 }
 0x285   :  { %1873 = vrot.lane.b32.xlu1 %v1786_v42, %s6184_s27  ;;  %v1534_v34 = vrot.slane %v1533_v17, 4  ;;  %v7553_v2 = vrot.slane %v1543_v33, 4  ;;  %v1318_v55 = vld [vmem:[#allocation2 + $0xd3] ss:$2 sm:$0x7f]  ;;  %v1238_v58 = vrot.slane %v5439_v9, 6  ;;  %v1219_v30 = vsel %vm7538_vm3, %v7550_v37, %v1218_v5 }
 0x286   :  { %v1340_v47 = vld [vmem:[#allocation2 + $0xe0] ss:$2 sm:$0x7f]  ;;  %v1342_v38 = vld [vmem:[#allocation2 + $0xe1] ss:$2 sm:$0x7f]  ;;  %v1319_v25 = vmax.f32 %v1312_v35, %v1314_v19  ;;  %v1320_v51 = vmax.f32 %v1316_v49, %v1318_v55  ;;  %v7562_v10 = vmax.f32 %v1292_v39, %v1293_v8  ;;  %v5440_v31 = vpack.c.bf16 %v1260_v0, %v1260_v0 }
 0x287   :  { %v1539_v63 = vsel %vm7544_vm10, %v1534_v34, %v1538_v56  ;;  %1220 = vst [vmem:[#allocation3 + $0x8] sm:$0xc] %v1219_v30  ;;  %v1344_v62 = vld [vmem:[#allocation2 + $0xee] ss:$2 sm:$0x7f]  ;;  %v1347_v43 = vmax.f32 %v1340_v47, %v1342_v38  ;;  %v1212_v17 = vrot.slane %v7550_v37, 4 }
 0x288   :  { %v1346_v13 = vld [vmem:[#allocation2 + $0xef] ss:$2 sm:$0x7f]  ;;  %1243 = vst.msk [vmem:[#allocation3 + $0xc] sm:$0xc] %vm1215_vm4, %v1238_v58  ;;  %1635 = vrot.lane.b32.xlu0 %v1539_v63, %s6184_s27  ;;  %v1321_v36 = vmax.f32 %v1319_v25, %v1320_v51  ;;  %v5441_v59 = vpack.c.bf16 %v7562_v10, %v7562_v10  ;;  %v1239_v33 = vrot.slane %v1238_v58, 4 }
 0x289   :  { %v1355_v40 = vld [vmem:[#allocation2 + $0xfc] ss:$2 sm:$0x7f]  ;;  %v1357_v48 = vld [vmem:[#allocation2 + $0xfd] ss:$2 sm:$0x7f]  ;;  %v1348_v23 = vmax.f32 %v1344_v62, %v1346_v13 }
 0x28a   :  { %v1359_v20 = vld [vmem:[#allocation2 + $0x10a] ss:$2 sm:$0x7f]  ;;  %v1361_v60 = vld [vmem:[#allocation2 + $0x10b] ss:$2 sm:$0x7f]  ;;  %v1362_v26 = vmax.f32 %v1355_v40, %v1357_v48  ;;  %v7576_v8 = vpack.c.bf16 %v1321_v36, %v1321_v36 }
 0x28b   :  { %v1385_v57 = vld [vmem:[#allocation2 + $0x118] ss:$2 sm:$0x7f]  ;;  %v1387_v29 = vld [vmem:[#allocation2 + $0x119] ss:$2 sm:$0x7f]  ;;  %v1363_v46 = vmax.f32 %v1359_v20, %v1361_v60  ;;  %v1349_v3 = vmax.f32 %v1347_v43, %v1348_v23 }
 0x28c   :  { %vm1277_vm7 = vsmask.f32 7942  ;;  %v1389_v28 = vld [vmem:[#allocation2 + $0x126] ss:$2 sm:$0x7f]  ;;  %v1392_v5 = vmax.f32 %v1385_v57, %v1387_v29  ;;  %v1266_v38 = vshrl.u32 %v5440_v31, 16 }
 0x28d   :  { %v1391_v7 = vld [vmem:[#allocation2 + $0x127] ss:$2 sm:$0x7f]  ;;  %v1247_v44 = vld [vmem:[#allocation3 + $0x10] sm:$0x3]  ;;  %v1350_v16 = vpack.c.bf16 %v1349_v3, %v1349_v3  ;;  %v1364_v45 = vmax.f32 %v1362_v26, %v1363_v46  ;;  %v1269_v13 = vshll.u32 %v5440_v31, 16 }
 0x28e   :  { %v1408_v11 = vld [vmem:[#allocation2 + $0x134] ss:$2 sm:$0x7f]  ;;  %v1410_v18 = vld [vmem:[#allocation2 + $0x135] ss:$2 sm:$0x7f]  ;;  %v1393_v12 = vmax.f32 %v1389_v28, %v1391_v7  ;;  %v1248_v34 = vsel %vm7566_vm2, %v1239_v33, %v1247_v44 }
 0x28f   :  { %v1412_v56 = vld [vmem:[#allocation2 + $0x142] ss:$2 sm:$0x7f]  ;;  %v1414_v61 = vld [vmem:[#allocation2 + $0x143] ss:$2 sm:$0x7f]  ;;  %v1415_v22 = vmax.f32 %v1408_v11, %v1410_v18  ;;  %v1352_v37 = vsel %vm7419_vm12, %v1350_v16, %v1351_v6  ;;  %v5443_v63 = vpack.c.bf16 %v1364_v45, %v1364_v45 }
 0x290   :  { %v1762_v9 = vld [vmem:[#allocation3 + $0x8] sm:$0xf]  ;;  %v1416_v35 = vmax.f32 %v1412_v56, %v1414_v61  ;;  %1222 = vst.msk [vmem:[#allocation3 + $0xc] sm:$0x3] %vm9009_vm5, %v1212_v17  ;;  %1249 = vst [vmem:[#allocation3 + $0x10] sm:$0x3] %v1248_v34  ;;  %v1394_v48 = vmax.f32 %v1392_v5, %v1393_v12 }
 0x291   :  { %v1515_v4 = vld [vmem:[#allocation3 + $0x8] sm:$0xf]  ;;  %v1789_v50 = vshrl.u32 %v1762_v9, 16  ;;  %v1792_v42 = vshll.u32 %v1762_v9, 16  ;;  %1353 = vst [vmem:[#allocation3 + $0x1c] sm:$0xf] %v1352_v37 }
 0x292   :  { %v1546_v19 = vshll.u32 %v1515_v4, 16  ;;  %v1550_v49 = vshrl.u32 %v1515_v4, 16  ;;  %v1438_v32 = vld [vmem:[#allocation2 + $0x150] ss:$2 sm:$0x7f]  ;;  %v1417_v55 = vmax.f32 %v1415_v22, %v1416_v35  ;;  %v1268_v25 = vrot.slane %v1266_v38, 6 }
 0x293   :  { %v1440_v39 = vld [vmem:[#allocation2 + $0x151] ss:$2 sm:$0x7f]  ;;  %v7580_v58 = vrot.slane %v1789_v50, 7  ;;  %v5944_v23 = vld [vmem:[%s8992_s2] sm:$0xff]   ;;  %v1271_v20 = vrot.slane %v1269_v13, 7  ;;  %v5444_v56 = vpack.c.bf16 %v1394_v48, %v1394_v48 }
 0x294   :  { %v7582_v30 = vrot.slane %v1546_v19, 5  ;;  %v1442_v47 = vld [vmem:[#allocation2 + $0x15e] ss:$2 sm:$0x7f]  ;;  %v1445_v43 = vmax.f32 %v1438_v32, %v1440_v39  ;;  %v7584_v40 = vrot.slane %v1550_v49, 4  ;;  %vm1276_vm12 = vcmask 519169   ;;  %5500 = vmatpush3.bf16.msra.mxu1 %v5944_v23 }
 0x295   :  { %v1444_v62 = vld [vmem:[#allocation2 + $0x15f] ss:$2 sm:$0x7f]  ;;  %v1794_v0 = vor.u32 %v1792_v42, %v7580_v58  ;;  %v7595_v60 = vpack.c.bf16 %v1417_v55, %v1417_v55  ;;  %vm7606_vm9 = vmand %vm1276_vm12, %vm1277_vm7  ;;  %v1327_v57 = vshrl.u32 %v7576_v8, 16  ;;  %v1299_v29 = vrot.slane %v5441_v59, 7  ;;  %v5947_v11 = vld [vmem:[%s8992_s2 + $0x50] sm:$0xff]  }
 0x296   :  { %v1549_v14 = vsel %vm7544_vm10, %v7553_v2, %v7582_v30  ;;  %v1446_v51 = vmax.f32 %v1442_v47, %v1444_v62  ;;  %v5945_v26 = vld [vmem:[%s8992_s2 + $0x48] sm:$0xff]   ;;  %v1370_v46 = vshll.u32 %v5443_v63, 16  ;;  %v1272_v24 = vor.u32 %v1271_v20, %v1268_v25  ;;  %vm7620_vm7 = vmand %vm1282_vm13, %vm1306_vm1  ;;  %v1308_v44 = vld [vmem:[#allocation3 + $0x18] sm:$0x1] }
 0x297   :  { %1637 = vrot.lane.b32.xlu0 %v1549_v14, %s6184_s27  ;;  %v1795_v2 = vsel %vm7527_vm11, %v1787_v53, %v1794_v0  ;;  %v5946_v3 = vld [vmem:[%s8992_s2 + $0x8] sm:$0xff]   ;;  %v1796_v53 = vrot.slane %v7580_v58, 4  ;;  %v1553_v28 = vor.u32 %v7584_v40, %v7582_v30  ;;  %v1373_v6 = vshrl.u32 %v5443_v63, 16  ;;  %5501 = vmatprep.subr.bf16.mxu1 %v5945_v26  ;;  %v1516_v18 = vld [vmem:[#allocation3 + $0xc] sm:$0xf]  ;;  %v5949_v39 = vld [vmem:[%s8992_s2 + $0x58] sm:$0xff]  }
 0x298   :  { %1875 = vrot.lane.b32.xlu1 %v1795_v2, %s6184_s27  ;;  %v1763_v31 = vld [vmem:[#allocation3 + $0xc] sm:$0xf]  ;;  %v1300_v36 = vrot.slane %v1299_v29, 4  ;;  %1304 = vst.msk [vmem:[#allocation3 + $0x14] sm:$0xe] %vm1276_vm12, %v1299_v29  ;;  %v1372_v16 = vrot.slane %v1370_v46, 5  ;;  %v1447_v61 = vmax.f32 %v1445_v43, %v1446_v51  ;;  %5502 = vmatpush3.bf16.msra.mxu1 %v5946_v3 }
 0x299   :  { %v1279_v5 = vld [vmem:[#allocation3 + $0x10] sm:$0xe]  ;;  %v1556_v22 = vshll.u32 %v1516_v18, 16  ;;  %v1560_v45 = vshrl.u32 %v1516_v18, 16  ;;  %v1798_v59 = vshrl.u32 %v1763_v31, 16  ;;  %v1801_v9 = vshll.u32 %v1763_v31, 16  ;;  %5503 = vmatprep.subr.bf16.mxu1 %v5947_v11 }
 0x29a   :  { %v1280_v4 = vsel %vm7606_vm9, %v1272_v24, %v1279_v5  ;;  %v1273_v17 = vrot.slane %v1272_v24, 4  ;;  %v1309_v33 = vsel %vm7620_vm7, %v1300_v36, %v1308_v44  ;;  %v1375_v12 = vrot.slane %v1373_v6, 4  ;;  %v1380_v35 = vld [vmem:[#allocation3 + $0x1c] sm:$0x8]  ;;  %v5948_v50 = vld [vmem:[%s8992_s2 + $0x10] sm:$0xff]   ;;  %v5950_v48 = vld [vmem:[%s8992_s2 + $0x18] sm:$0xff]  }
 0x29b   :  { %1281 = vst [vmem:[#allocation3 + $0x10] sm:$0xe] %v1280_v4  ;;  %v7635_v42 = vrot.slane %v1556_v22, 5  ;;  %v1562_v19 = vrot.slane %v1560_v45, 4  ;;  %v7637_v49 = vrot.slane %v1798_v59, 7  ;;  %v1381_v32 = vsel %vm7472_vm14, %v1372_v16, %v1380_v35  ;;  %v5951_v51 = vld [vmem:[%s8992_s2 + $0x60] sm:$0xff]  }
 0x29c   :  { %1310 = vst [vmem:[#allocation3 + $0x18] sm:$0x1] %v1309_v33  ;;  %1283 = vst.msk [vmem:[#allocation3 + $0x14] sm:$0x1] %vm1282_vm13, %v1273_v17  ;;  %vm1334_vm1 = vsmask.f32 7938  ;;  %v1376_v34 = vor.u32 %v1375_v12, %v1372_v16  ;;  %5504 = vmatpush3.bf16.msra.mxu1 %v5948_v50  ;;  %v5446_v25 = vpack.c.bf16 %v1447_v61, %v1447_v61 }
 0x29d   :  { %1382 = vst [vmem:[#allocation3 + $0x1c] sm:$0x8] %v1381_v32  ;;  %v1399_v55 = vrot.slane %v5444_v56, 5  ;;  %v1423_v37 = vshrl.u32 %v7595_v60, 16  ;;  %v1490_v58 = vld [vmem:[#allocation3] sm:$0xf]  ;;  %v1563_v30 = vor.u32 %v1562_v19, %v7635_v42  ;;  %v1803_v47 = vor.u32 %v1801_v9, %v7637_v49  ;;  %5505 = vmatprep.subr.bf16.mxu1 %v5949_v39  ;;  %vm7673_vm14 = vmand %vm1122_vm6, %vm1334_vm1 }
 0x29e   :  { %v1329_v54 = vrot.slane %v1327_v57, 7  ;;  %v1404_v38 = vld [vmem:[#allocation3 + $0x24] sm:$0x7]  ;;  %v1426_v63 = vshll.u32 %v7595_v60, 16  ;;  %v7649_v62 = vld [vmem:[#allocation3 + $0x8] sm:$0xf] }
 0x29f   :  { %1502 = vst.msk [vmem:[#allocation6] sm:$0xf] %vm1122_vm6, %v1490_v58  ;;  %v1554_v13 = vrot.slane %v1553_v28, 4  ;;  %v1377_v43 = vrot.slane %v1376_v34, 4  ;;  %v1400_v40 = vrot.slane %v1399_v55, 4  ;;  %v1804_v14 = vsel %vm7527_vm11, %v1796_v53, %v1803_v47  ;;  %v5952_v2 = vld [vmem:[%s8992_s2 + $0x20] sm:$0xff]  }
 0x2a0   :  { %1403 = vst.msk [vmem:[#allocation3 + $0x20] sm:$0x8] %vm1154_vm8, %v1399_v55  ;;  %v1491_v0 = vld [vmem:[#allocation3 + $0x4] sm:$0xf]  ;;  %v1493_v23 = vld [vmem:[#allocation3 + $0xc] sm:$0xf]  ;;  %1877 = vrot.lane.b32.xlu0 %v1804_v14, %s6184_s27  ;;  %5506 = vmatpush3.bf16.msra.mxu1 %v5950_v48 }
 0x2a1   :  { %1503 = vst.msk [vmem:[#allocation6 + $0x14] sm:$0xf] %vm1122_vm6, %v1491_v0  ;;  %v1330_v20 = vshll.u32 %v7576_v8, 16  ;;  %vm9042_vm8 = vcmask 518144   ;;  %v1405_v60 = vsel %vm7486_vm15, %v1400_v40, %v1404_v38  ;;  %v1425_v26 = vrot.slane %v1423_v37, 5  ;;  %v5953_v3 = vld [vmem:[%s8992_s2 + $0x68] sm:$0xff]   ;;  %5507 = vmatprep.subr.bf16.mxu1 %v5951_v51 }
 0x2a2   :  { %1383 = vst.msk [vmem:[#allocation3 + $0x20] sm:$0x7] %vm9042_vm8, %v1377_v43  ;;  %v1564_v57 = vrot.slane %v1563_v30, 4  ;;  %1406 = vst [vmem:[#allocation3 + $0x24] sm:$0x7] %v1405_v60  ;;  %v1428_v8 = vrot.slane %v1426_v63, 6  ;;  %v1559_v7 = vsel %vm7544_vm10, %v1554_v13, %v7635_v42 }
 0x2a3   :  { %1505 = vst.msk [vmem:[#allocation6 + $0x3c] sm:$0xf] %vm1122_vm6, %v1493_v23  ;;  %v7677_v46 = vrot.slane %v5446_v25, 6  ;;  %v2200_v52 = vshrl.u32 %v7649_v62, 16  ;;  %v1492_v24 = vld [vmem:[#allocation3 + $0x8] sm:$0xf]  ;;  %v1332_v44 = vor.u32 %v1330_v20, %v1329_v54 }
 0x2a4   :  { %v1517_v53 = vld [vmem:[#allocation3 + $0x10] sm:$0xf]  ;;  %v1336_v6 = vld [vmem:[#allocation3 + $0x18] sm:$0xf]  ;;  %1504 = vst.msk [vmem:[#allocation6 + $0x28] sm:$0xf] %vm1122_vm6, %v1492_v24  ;;  %1639 = vrot.lane.b32.xlu0 %v1559_v7, %s6184_s27  ;;  %5508 = vmatpush3.bf16.msra.mxu1 %v5952_v2  ;;  %v1429_v40 = vor.u32 %v1428_v8, %v1425_v26 }
 0x2a5   :  { %v1764_v28 = vld [vmem:[#allocation3 + $0x10] sm:$0xf]  ;;  %v1566_v11 = vshll.u32 %v1517_v53, 16  ;;  %v1570_v18 = vshrl.u32 %v1517_v53, 16  ;;  %v1518_v16 = vld [vmem:[#allocation3 + $0x14] sm:$0xf]  ;;  %v1337_v56 = vsel %vm7673_vm14, %v1332_v44, %v1336_v6  ;;  %5509 = vmatprep.subr.bf16.mxu1 %v5953_v3 }
 0x2a6   :  { %v1807_v31 = vshrl.u32 %v1764_v28, 16  ;;  %v1810_v36 = vshll.u32 %v1764_v28, 16  ;;  %1456 = vst.msk [vmem:[#allocation3 + $0x28] sm:$0xc] %vm1215_vm4, %v7677_v46  ;;  %v1576_v61 = vshll.u32 %v1518_v16, 16  ;;  %v1580_v5 = vshrl.u32 %v1518_v16, 16 }
 0x2a7   :  { %v1765_v22 = vld [vmem:[#allocation3 + $0x14] sm:$0xf]  ;;  %v1520_v45 = vld [vmem:[#allocation3 + $0x1c] sm:$0xf]  ;;  %v1568_v59 = vrot.slane %v1566_v11, 5  ;;  %v1572_v50 = vrot.slane %v1570_v18, 4 }
 0x2a8   :  { %v1809_v9 = vrot.slane %v1807_v31, 7  ;;  %1338 = vst [vmem:[#allocation3 + $0x18] sm:$0xf] %v1337_v56  ;;  %v1816_v4 = vshrl.u32 %v1765_v22, 16  ;;  %v1819_v17 = vshll.u32 %v1765_v22, 16  ;;  %v1578_v12 = vrot.slane %v1576_v61, 5 }
 0x2a9   :  { %v7692_v33 = vld [vmem:[#allocation3 + $0xc] sm:$0xf]  ;;  %v1582_v35 = vrot.slane %v1580_v5, 4  ;;  %v1596_v42 = vshll.u32 %v1520_v45, 16  ;;  %v5954_v19 = vld [vmem:[%s8992_s2 + $0x28] sm:$0xff]   ;;  %v1569_v32 = vsel %vm7544_vm10, %v1564_v57, %v1568_v59  ;;  %v1805_v58 = vrot.slane %v7637_v49, 4 }
 0x2aa   :  { %v1812_v39 = vor.u32 %v1810_v36, %v1809_v9  ;;  %v1814_v34 = vrot.slane %v1809_v9, 4  ;;  %v7699_v55 = vrot.slane %v1816_v4, 7  ;;  %v5955_v37 = vld [vmem:[%s8992_s2 + $0x70] sm:$0xff]   ;;  %1641 = vrot.lane.b32.xlu1 %v1569_v32, %s6184_s27  ;;  %v1573_v47 = vor.u32 %v1572_v50, %v1568_v59  ;;  %v1521_v54 = vld [vmem:[#allocation3 + $0x20] sm:$0xf]  ;;  %5510 = vmatpush3.bf16.msra.mxu1 %v5954_v19  ;;  %v5957_v29 = vld [vmem:[%s8992_s2 + $0x78] sm:$0xff]  }
 0x2ab   :  { %v1583_v30 = vor.u32 %v1582_v35, %v1578_v12  ;;  %v1600_v38 = vshrl.u32 %v1520_v45, 16  ;;  %v1767_v63 = vld [vmem:[#allocation3 + $0x1c] sm:$0xf]  ;;  %v7707_v43 = vrot.slane %v1596_v42, 5  ;;  %v2209_v48 = vshrl.u32 %v7692_v33, 16  ;;  %v5956_v23 = vld [vmem:[%s8992_s2 + $0x30] sm:$0xff]   ;;  %5511 = vmatprep.subr.bf16.mxu1 %v5955_v37 }
 0x2ac   :  { %v1821_v13 = vor.u32 %v1819_v17, %v7699_v55  ;;  %v1813_v0 = vsel %vm7527_vm11, %v1805_v58, %v1812_v39  ;;  %v1574_v14 = vrot.slane %v1573_v47, 4  ;;  %v7712_v51 = vld [vmem:[#allocation3 + $0x20] sm:$0xf]  ;;  %v7714_v49 = vrot.slane %v2200_v52, 7  ;;  %v1433_v57 = vld [vmem:[#allocation3 + $0x24] sm:$0xc] }
 0x2ad   :  { %v1602_v25 = vrot.slane %v1600_v38, 4  ;;  %v1584_v20 = vrot.slane %v1583_v30, 4  ;;  %v1606_v26 = vshll.u32 %v1521_v54, 16  ;;  %v1834_v2 = vshrl.u32 %v1767_v63, 16  ;;  %v1939_v11 = vld [vmem:[#allocation3 + $0x4] sm:$0xf] }
 0x2ae   :  { %v1822_v60 = vsel %vm7527_vm11, %v1814_v34, %v1821_v13  ;;  %1879 = vrot.lane.b32.xlu1 %v1813_v0, %s6184_s27  ;;  %v1579_v3 = vsel %vm7544_vm10, %v1574_v14, %v1578_v12  ;;  %v1610_v24 = vshrl.u32 %v1521_v54, 16  ;;  %v1837_v53 = vshll.u32 %v1767_v63, 16  ;;  %5512 = vmatpush3.bf16.msra.mxu1 %v5956_v23  ;;  %v5958_v56 = vld [vmem:[%s8992_s2 + $0x38] sm:$0xff]   ;;  %v5961_v59 = vld [vmem:[%s8992_s2 + $0xc0] sm:$0xff]   ;;  %v1457_v19 = vld [vmem:[#allocation3 + $0x2c] sm:$0x3] }
 0x2af   :  { %v1519_v8 = vld [vmem:[#allocation3 + $0x18] sm:$0xf]  ;;  %1881 = vrot.lane.b32.xlu0 %v1822_v60, %s6184_s27  ;;  %v1603_v6 = vor.u32 %v1602_v25, %v7707_v43  ;;  %v7729_v31 = vrot.slane %v1834_v2, 7  ;;  %v1843_v36 = vshrl.u32 %v7712_v51, 16  ;;  %v1430_v16 = vrot.slane %v1429_v40, 4  ;;  %5513 = vmatprep.subr.bf16.mxu1 %v5957_v29 }
 0x2b0   :  { %v1766_v52 = vld [vmem:[#allocation3 + $0x18] sm:$0xf]  ;;  %v1586_v28 = vshll.u32 %v1519_v8, 16  ;;  %v1590_v7 = vshrl.u32 %v1519_v8, 16  ;;  %v1434_v45 = vsel %vm7538_vm3, %v1429_v40, %v1433_v57  ;;  %v7741_v9 = vrot.slane %v1606_v26, 5 }
 0x2b1   :  { %v1825_v44 = vshrl.u32 %v1766_v52, 16  ;;  %v1828_v18 = vshll.u32 %v1766_v52, 16  ;;  %v1839_v4 = vor.u32 %v1837_v53, %v7729_v31  ;;  %1435 = vst [vmem:[#allocation3 + $0x24] sm:$0xc] %v1434_v45  ;;  %1436 = vst.msk [vmem:[#allocation3 + $0x28] sm:$0x3] %vm9009_vm5, %v1430_v16 }
 0x2b2   :  { %v1588_v61 = vrot.slane %v1586_v28, 5  ;;  %v1592_v22 = vrot.slane %v1590_v7, 4  ;;  %v1951_v17 = vshrl.u32 %v1939_v11, 16  ;;  %v1954_v12 = vshll.u32 %v1939_v11, 16  ;;  %v1495_v32 = vld [vmem:[#allocation3 + $0x14] sm:$0xf]  ;;  %5514 = vmatpush3.bf16.msra.mxu1 %v5958_v56 }
 0x2b3   :  { %v1827_v5 = vrot.slane %v1825_v44, 7  ;;  %1643 = vrot.lane.b32.xlu0 %v1579_v3, %s6184_s27  ;;  %v1823_v39 = vrot.slane %v7699_v55, 4  ;;  %v1604_v34 = vrot.slane %v1603_v6, 4  ;;  %v1612_v37 = vrot.slane %v1610_v24, 4  ;;  %v7750_v30 = vld [vmem:[#allocation3 + $0x8] sm:$0xf]  ;;  %5551 = vmatprep.subr.bf16.mxu1 %v5961_v59 }
 0x2b4   :  { %v1589_v21 = vsel %vm7544_vm10, %v1584_v20, %v1588_v61  ;;  %v1593_v42 = vor.u32 %v1592_v22, %v1588_v61  ;;  %v1453_v58 = vrot.slane %v7677_v46, 4  ;;  %1507 = vst.msk [vmem:[#allocation6 + $0x64] sm:$0xf] %vm1122_vm6, %v1495_v32  ;;  %v7755_v54 = vrot.slane %v1843_v36, 7  ;;  %v1494_v63 = vld [vmem:[#allocation3 + $0x10] sm:$0xf] }
 0x2b5   :  { %v1830_v35 = vor.u32 %v1828_v18, %v1827_v5  ;;  %v1832_v50 = vrot.slane %v1827_v5, 4  ;;  %1645 = vrot.lane.b32.xlu1 %v1589_v21, %s6184_s27  ;;  %v1497_v13 = vld [vmem:[#allocation3 + $0x1c] sm:$0xf]  ;;  %v1846_v55 = vshll.u32 %v7712_v51, 16  ;;  %v2212_v40 = vshll.u32 %v7692_v33, 16 }
 0x2b6   :  { %v1594_v38 = vrot.slane %v1593_v42, 4  ;;  %v1458_v46 = vsel %vm7566_vm2, %v1453_v58, %v1457_v19  ;;  %1506 = vst.msk [vmem:[#allocation6 + $0x50] sm:$0xf] %vm1122_vm6, %v1494_v63  ;;  %1509 = vst.msk [vmem:[#allocation6 + $0x8c] sm:$0xf] %vm1122_vm6, %v1497_v13  ;;  %v1841_v14 = vrot.slane %v7729_v31, 4  ;;  %v1613_v25 = vor.u32 %v1612_v37, %v7741_v9 }
 0x2b7   :  { %v1840_v47 = vsel %vm7527_vm11, %v1832_v50, %v1839_v4  ;;  %v1831_v0 = vsel %vm7527_vm11, %v1823_v39, %v1830_v35  ;;  %1459 = vst [vmem:[#allocation3 + $0x2c] sm:$0x3] %v1458_v46  ;;  %v2207_v23 = vrot.slane %v7714_v49, 4  ;;  %v1496_v51 = vld [vmem:[#allocation3 + $0x18] sm:$0xf]  ;;  %v7772_v1 = vrot.slane %v2209_v48, 7 }
 0x2b8   :  { %1885 = vrot.lane.b32.xlu0 %v1840_v47, %s6184_s27  ;;  %v1953_v20 = vrot.slane %v1951_v17, 4  ;;  %v1956_v60 = vrot.slane %v1954_v12, 5  ;;  %v1960_v26 = vshll.u32 %v7750_v30, 16  ;;  %v7775_v2 = vld [vmem:[#allocation3 + $0xc] sm:$0xf]  ;;  %v1609_v29 = vsel %vm7544_vm10, %v1604_v34, %v7741_v9 }
 0x2b9   :  { %1883 = vrot.lane.b32.xlu1 %v1831_v0, %s6184_s27  ;;  %1508 = vst.msk [vmem:[#allocation6 + $0x78] sm:$0xf] %vm1122_vm6, %v1496_v51  ;;  %v1498_v57 = vld [vmem:[#allocation3 + $0x20] sm:$0xf]  ;;  %v1848_v8 = vor.u32 %v1846_v55, %v7755_v54  ;;  %v1599_v33 = vsel %vm7544_vm10, %v1594_v38, %v7707_v43  ;;  %v1522_v48 = vld [vmem:[#allocation3 + $0x24] sm:$0xf]  ;;  %v2214_v50 = vor.u32 %v2212_v40, %v7772_v1 }
 0x2ba   :  { %v1523_v52 = vld [vmem:[#allocation3 + $0x28] sm:$0x3]  ;;  %v1769_v3 = vld [vmem:[#allocation3 + $0x24] sm:$0xf]  ;;  %1510 = vst.msk [vmem:[#allocation6 + $0xa0] sm:$0xf] %vm1122_vm6, %v1498_v57  ;;  %v1957_v22 = vor.u32 %v1956_v60, %v1953_v20 }
 0x2bb   :  { %v1616_v24 = vshll.u32 %v1522_v48, 16  ;;  %v1620_v53 = vshrl.u32 %v1522_v48, 16  ;;  %v1626_v28 = vshll.u32 %v1523_v52, 16  ;;  %v1770_v7 = vld [vmem:[#allocation3 + $0x28] sm:$0xf]  ;;  %v1852_v44 = vshrl.u32 %v1769_v3, 16 }
 0x2bc   :  { %1647 = vrot.lane.b32.xlu0 %v1599_v33, %s6184_s27  ;;  %v1614_v6 = vrot.slane %v1613_v25, 4  ;;  %v1861_v11 = vshrl.u32 %v1770_v7, 16  ;;  %v1630_v18 = vshrl.u32 %v1523_v52, 16  ;;  %v1964_v31 = vshrl.u32 %v7750_v30, 16  ;;  %v7792_v12 = vld [vmem:[#allocation3 + $0x10] sm:$0xf] }
 0x2bd   :  { %1649 = vrot.lane.b32.xlu1 %v1609_v29, %s6184_s27  ;;  %v1618_v43 = vrot.slane %v1616_v24, 5  ;;  %v1622_v36 = vrot.slane %v1620_v53, 4  ;;  %v1854_v16 = vrot.slane %v1852_v44, 7  ;;  %v1855_v56 = vshll.u32 %v1769_v3, 16  ;;  %v7800_v19 = vld [vmem:[#allocation3 + $0x14] sm:$0xf] }
 0x2be   :  { %v1628_v61 = vrot.slane %v1626_v28, 5  ;;  %v1632_v5 = vrot.slane %v1630_v18, 4  ;;  %v1970_v45 = vshll.u32 %v7775_v2, 16  ;;  %v1863_v4 = vrot.slane %v1861_v11, 7  ;;  %v1499_v32 = vld [vmem:[#allocation3 + $0x24] sm:$0xf] }
 0x2bf   :  { %v1623_v59 = vor.u32 %v1622_v36, %v1618_v43  ;;  %v1619_v9 = vsel %vm7544_vm10, %v1614_v6, %v1618_v43  ;;  %v1857_v17 = vor.u32 %v1855_v56, %v1854_v16  ;;  %v1849_v21 = vsel %vm7527_vm11, %v1841_v14, %v1848_v8  ;;  %v1942_v30 = vld [vmem:[#allocation3 + $0x10] sm:$0xf]  ;;  %1511 = vst.msk [vmem:[#allocation6 + $0xb4] sm:$0xf] %vm1122_vm6, %v1499_v32  ;;  %v1771_v47 = vld [vmem:[#allocation3 + $0x2c] sm:$0x1] }
 0x2c0   :  { %1651 = vrot.lane.b32.xlu0 %v1619_v9, %s6184_s27  ;;  %v1850_v35 = vrot.slane %v7755_v54, 4  ;;  %v1974_v42 = vshrl.u32 %v7775_v2, 16  ;;  %v1864_v34 = vshll.u32 %v1770_v7, 16  ;;  %v7803_v37 = vrot.slane %v1960_v26, 5  ;;  %v1500_v13 = vld [vmem:[#allocation3 + $0x28] sm:$0x1] }
 0x2c1   :  { %1887 = vrot.lane.b32.xlu1 %v1849_v21, %s6184_s27  ;;  %v1624_v39 = vrot.slane %v1623_v59, 4  ;;  %v1966_v58 = vrot.slane %v1964_v31, 4  ;;  %v1633_v38 = vor.u32 %v1632_v5, %v1628_v61  ;;  %v7808_v54 = vsel %vm7527_vm11, %v2207_v23, %v2214_v50  ;;  %v2182_v14 = vld [vmem:[#allocation3 + $0x4] sm:$0x8]  ;;  %v1943_v25 = vld [vmem:[#allocation3 + $0x14] sm:$0xf] }
 0x2c2   :  { %v1958_v63 = vrot.slane %v1957_v22, 4  ;;  %v1859_v55 = vrot.slane %v1854_v16, 4  ;;  %v1866_v46 = vor.u32 %v1864_v34, %v1863_v4  ;;  %v1858_v40 = vsel %vm7527_vm11, %v1850_v35, %v1857_v17  ;;  %1512 = vst.msk [vmem:[#allocation6 + $0xc8] sm:$0x1] %vm1282_vm13, %v1500_v13  ;;  %v1917_v26 = vld [vmem:[#allocation3 + $0x4] sm:$0xf] }
 0x2c3   :  { %v7812_v0 = vrot.slane %v1970_v45, 5  ;;  %v1629_v51 = vsel %vm7544_vm10, %v1624_v39, %v1628_v61  ;;  %v1868_v23 = vrot.slane %v1863_v4, 4  ;;  %v2218_v20 = vshrl.u32 %v7792_v12, 16  ;;  %1928 = vst.msk [vmem:[#allocation6 + $0x8] sm:$0xf] %vm1122_vm6, %v1917_v26 }
 0x2c4   :  { %1889 = vrot.lane.b32.xlu0 %v1858_v40, %s6184_s27  ;;  %v2227_v60 = vshrl.u32 %v7800_v19, 16  ;;  %v1870_v2 = vshll.u32 %v1771_v47, 16  ;;  %v1967_v57 = vor.u32 %v1966_v58, %v7803_v37  ;;  %v1976_v29 = vrot.slane %v1974_v42, 4  ;;  %v1918_v24 = vld [vmem:[#allocation3 + $0x8] sm:$0xf] }
 0x2c5   :  { %1653 = vrot.lane.b32.xlu1 %v1629_v51, %s6184_s27  ;;  %v1980_v8 = vshll.u32 %v1942_v30, 16  ;;  %v1634_v33 = vrot.slane %v1633_v38, 4  ;;  %v2195_v48 = vshrl.u32 %v2182_v14, 16  ;;  %v2220_v52 = vrot.slane %v2218_v20, 7  ;;  %v7828_v6 = vld [vmem:[#allocation3 + $0x18] sm:$0xf] }
 0x2c6   :  { %v1984_v3 = vshrl.u32 %v1942_v30, 16  ;;  %v7823_v53 = vrot.slane %v2227_v60, 7  ;;  %v1977_v28 = vor.u32 %v1976_v29, %v7812_v0  ;;  %v1990_v44 = vshll.u32 %v1943_v25, 16  ;;  %1929 = vst.msk [vmem:[#allocation6 + $0x1c] sm:$0xf] %vm1122_vm6, %v1918_v24 }
 0x2c7   :  { %v7826_v7 = vrot.slane %v1980_v8, 5  ;;  %v1867_v11 = vsel %vm7527_vm11, %v1859_v55, %v1866_v46  ;;  %v1872_v18 = vsel %vm7527_vm11, %v1868_v23, %v1870_v2  ;;  %v2203_v31 = vshll.u32 %v7649_v62, 16  ;;  %v7837_v36 = vld [vmem:[#allocation3 + $0x1c] sm:$0xf]  ;;  %v1944_v16 = vld [vmem:[#allocation3 + $0x18] sm:$0xf] }
 0x2c8   :  { %1655 = vrot.lane.b32.xlu0 %v1634_v33, %s6184_s27  ;;  %v1986_v43 = vrot.slane %v1984_v3, 4  ;;  %v1963_v56 = vsel %vm7544_vm10, %v1958_v63, %v7803_v37  ;;  %v7843_v61 = vrot.slane %v1967_v57, 4  ;;  %v2230_v5 = vshll.u32 %v7800_v19, 16  ;;  %v1919_v45 = vld [vmem:[#allocation3 + $0xc] sm:$0xf] }
 0x2c9   :  { %1891 = vrot.lane.b32.xlu1 %v1867_v11, %s6184_s27  ;;  %v1994_v22 = vshrl.u32 %v1943_v25, 16  ;;  %v5193_v59 = vrot.slane %v2195_v48, 11  ;;  %v2205_v9 = vor.u32 %v2203_v31, %v7714_v49  ;;  %v2236_v4 = vshrl.u32 %v7828_v6, 16  ;;  %v1945_v17 = vld [vmem:[#allocation3 + $0x1c] sm:$0xf] }
 0x2ca   :  { %v1987_v62 = vor.u32 %v1986_v43, %v7826_v7  ;;  %1930 = vst.msk [vmem:[#allocation6 + $0x30] sm:$0xf] %vm1122_vm6, %v1919_v45  ;;  %v1920_v21 = vld [vmem:[#allocation3 + $0x10] sm:$0xf]  ;;  %v2225_v35 = vrot.slane %v2220_v52, 4  ;;  %v2232_v50 = vor.u32 %v2230_v5, %v7823_v53  ;;  %v1978_v42 = vrot.slane %v1977_v28, 4 }
 0x2cb   :  { %v7851_v32 = vrot.slane %v1990_v44, 5  ;;  %1931 = vst.msk [vmem:[#allocation6 + $0x44] sm:$0xf] %vm1122_vm6, %v1920_v21  ;;  %v2216_v49 = vrot.slane %v7772_v1, 4  ;;  %v2221_v19 = vshll.u32 %v7792_v12, 16  ;;  %v2245_v39 = vshrl.u32 %v7837_v36, 16 }
 0x2cc   :  { %2059 = vrot.lane.b32.xlu0 %v1963_v56, %s6184_s27  ;;  %v2000_v34 = vshll.u32 %v1944_v16, 16  ;;  %v1946_v37 = vld [vmem:[#allocation3 + $0x20] sm:$0xf]  ;;  %v7859_v58 = vrot.slane %v1987_v62, 4  ;;  %v1996_v30 = vrot.slane %v1994_v22, 4  ;;  %v2004_v47 = vshrl.u32 %v1944_v16, 16 }
 0x2cd   :  { %1893 = vrot.lane.b32.xlu1 %v1872_v18, %s6184_s27  ;;  %v2010_v38 = vshll.u32 %v1945_v17, 16  ;;  %v1921_v63 = vld [vmem:[#allocation3 + $0x14] sm:$0xf]  ;;  %v1973_v13 = vsel %vm7544_vm10, %v7843_v61, %v7812_v0  ;;  %v2206_v1 = vsel %vm7527_vm11, %v5193_v59, %v2205_v9  ;;  %v2238_v12 = vrot.slane %v2236_v4, 7  ;;  %v1922_v46 = vld [vmem:[#allocation3 + $0x18] sm:$0xf] }
 0x2ce   :  { %v7867_v55 = vrot.slane %v2000_v34, 5  ;;  %1932 = vst.msk [vmem:[#allocation6 + $0x58] sm:$0xf] %vm1122_vm6, %v1921_v63  ;;  %v1924_v40 = vld [vmem:[#allocation3 + $0x20] sm:$0xf]  ;;  %v7872_v14 = vsel %vm7527_vm11, %v2225_v35, %v2232_v50  ;;  %v1983_v25 = vsel %vm7544_vm10, %v1978_v42, %v7826_v7  ;;  %v2248_v0 = vshll.u32 %v7837_v36, 16 }
 0x2cf   :  { %v2006_v51 = vrot.slane %v2004_v47, 4  ;;  %v7878_v23 = vld [vmem:[#allocation3 + $0x20] sm:$0xf]  ;;  %1933 = vst.msk [vmem:[#allocation6 + $0x6c] sm:$0xf] %vm1122_vm6, %v1922_v46  ;;  %v2223_v60 = vor.u32 %v2221_v19, %v2220_v52  ;;  %v7883_v26 = vrot.slane %v2245_v39, 7  ;;  %v1993_v8 = vsel %vm7544_vm10, %v7859_v58, %v7851_v32 }
 0x2d0   :  { %1935 = vst.msk [vmem:[#allocation6 + $0x94] sm:$0xf] %vm1122_vm6, %v1924_v40  ;;  %v1923_v20 = vld [vmem:[#allocation3 + $0x1c] sm:$0xf]  ;;  %2293 = vrot.lane.b32.xlu0 %v2206_v1, %s6184_s27  ;;  %v2014_v2 = vshrl.u32 %v1945_v17, 16  ;;  %v2020_v29 = vshll.u32 %v1946_v37, 16  ;;  %v1997_v33 = vor.u32 %v1996_v30, %v7851_v32 }
 0x2d1   :  { %v1947_v57 = vld [vmem:[#allocation3 + $0x24] sm:$0xf]  ;;  %1934 = vst.msk [vmem:[#allocation6 + $0x80] sm:$0xf] %vm1122_vm6, %v1923_v20  ;;  %2295 = vrot.lane.b32.xlu1 %v7808_v54, %s6184_s27  ;;  %v7893_v48 = vrot.slane %v2010_v38, 5  ;;  %v2024_v52 = vshrl.u32 %v1946_v37, 16  ;;  %v2007_v7 = vor.u32 %v2006_v51, %v7867_v55  ;;  %v2224_v56 = vsel %vm7527_vm11, %v2216_v49, %v2223_v60 }
 0x2d2   :  { %v2190_v3 = vld [vmem:[#allocation3 + $0x24] sm:$0xf]  ;;  %v1486_v24 = vld [vmem:[#allocation3 + $0x2c] sm:$0xe]  ;;  %v2243_v28 = vrot.slane %v2238_v12, 4  ;;  %v2239_v44 = vshll.u32 %v7828_v6, 16  ;;  %v2250_v61 = vor.u32 %v2248_v0, %v7883_v26 }
 0x2d3   :  { %v7897_v11 = vrot.slane %v2020_v29, 5  ;;  %v1926_v54 = vld [vmem:[#allocation3 + $0x28] sm:$0xf]  ;;  %v2026_v18 = vrot.slane %v2024_v52, 4  ;;  %v2030_v31 = vshll.u32 %v1947_v57, 16  ;;  %v2016_v43 = vrot.slane %v2014_v2, 4 }
 0x2d4   :  { %v2254_v36 = vshrl.u32 %v7878_v23, 16  ;;  %1937 = vst.msk [vmem:[#allocation6 + $0xbc] sm:$0xf] %vm1122_vm6, %v1926_v54  ;;  %v1925_v16 = vld [vmem:[#allocation3 + $0x24] sm:$0xf]  ;;  %2063 = vrot.lane.b32.xlu0 %v1983_v25, %s6184_s27  ;;  %v2034_v5 = vshrl.u32 %v1947_v57, 16  ;;  %v2241_v9 = vor.u32 %v2239_v44, %v2238_v12  ;;  %v1487_v42 = vsel %vm7606_vm9, %v7431_v27, %v1486_v24 }
 0x2d5   :  { %v2263_v6 = vshrl.u32 %v2190_v3, 16  ;;  %v1948_v22 = vld [vmem:[#allocation3 + $0x28] sm:$0xf]  ;;  %1936 = vst.msk [vmem:[#allocation6 + $0xa8] sm:$0xf] %vm1122_vm6, %v1925_v16  ;;  %2061 = vrot.lane.b32.xlu1 %v1973_v13, %s6184_s27  ;;  %v1998_v45 = vrot.slane %v1997_v33, 4  ;;  %v2017_v62 = vor.u32 %v2016_v43, %v7893_v48  ;;  %v2027_v35 = vor.u32 %v2026_v18, %v7897_v11 }
 0x2d6   :  { %v2234_v59 = vrot.slane %v7823_v53, 4  ;;  %v1927_v4 = vld [vmem:[#allocation3 + $0x2c] sm:$0x1]  ;;  %v2337_v17 = vld [vmem:[#allocation3 + $0x8] sm:$0xf]  ;;  %v7909_v21 = vrot.slane %v2007_v7, 4  ;;  %v7923_v19 = vsel %vm7527_vm11, %v2243_v28, %v2250_v61 }
 0x2d7   :  { %v7912_v50 = vrot.slane %v2263_v6, 7  ;;  %v7917_v49 = vld [vmem:[#allocation3 + $0x28] sm:$0xf]  ;;  %1938 = vst.msk [vmem:[#allocation6 + $0xd0] sm:$0x1] %vm1282_vm13, %v1927_v4  ;;  %v7925_v39 = vrot.slane %v2030_v31, 5  ;;  %v2003_v1 = vsel %vm7544_vm10, %v1998_v45, %v7867_v55 }
 0x2d8   :  { %v2338_v53 = vld [vmem:[#allocation3 + $0xc] sm:$0xf]  ;;  %2348 = vst.msk [vmem:[#allocation6 + $0x10] sm:$0xf] %vm1122_vm6, %v2337_v17  ;;  %v2256_v34 = vrot.slane %v2254_v36, 7  ;;  %v2040_v37 = vshll.u32 %v1948_v22, 16  ;;  %2297 = vrot.lane.b32.xlu0 %v2224_v56, %s6184_s27  ;;  %v2242_v12 = vsel %vm7527_vm11, %v2234_v59, %v2241_v9 }
 0x2d9   :  { %1488 = vst [vmem:[#allocation3 + $0x2c] sm:$0xe] %v1487_v42  ;;  %2349 = vst.msk [vmem:[#allocation6 + $0x24] sm:$0xf] %vm1122_vm6, %v2338_v53  ;;  %v2339_v10 = vld [vmem:[#allocation3 + $0x10] sm:$0xf]  ;;  %2299 = vrot.lane.b32.xlu1 %v7872_v14, %s6184_s27  ;;  %v2013_v14 = vsel %vm7544_vm10, %v7909_v21, %v7893_v48 }
 0x2da   :  { %v7929_v27 = vrot.slane %v2017_v62, 4  ;;  %v2266_v30 = vshll.u32 %v2190_v3, 16  ;;  %v2044_v47 = vshrl.u32 %v1948_v22, 16  ;;  %v2036_v38 = vrot.slane %v2034_v5, 4  ;;  %v1682_v63 = vld [vmem:[#allocation3 + $0x4] sm:$0xf] }
 0x2db   :  { %v2340_v13 = vld [vmem:[#allocation3 + $0x14] sm:$0xf]  ;;  %2350 = vst.msk [vmem:[#allocation6 + $0x38] sm:$0xf] %vm1122_vm6, %v2339_v10  ;;  %v2252_v46 = vrot.slane %v7883_v26, 4  ;;  %v2272_v40 = vshrl.u32 %v7917_v49, 16 }
 0x2dc   :  { %v1681_v25 = vld [vmem:[#allocation3] sm:$0xe]  ;;  %2351 = vst.msk [vmem:[#allocation6 + $0x4c] sm:$0xf] %vm1122_vm6, %v2340_v13  ;;  %v2341_v0 = vld [vmem:[#allocation3 + $0x18] sm:$0xf]  ;;  %v2268_v55 = vor.u32 %v2266_v30, %v7912_v50  ;;  %v2037_v52 = vor.u32 %v2036_v38, %v7925_v39  ;;  %2067 = vrot.lane.b32.xlu0 %v2003_v1, %s6184_s27  ;;  %v2023_v28 = vsel %vm7544_vm10, %v7929_v27, %v7897_v11 }
 0x2dd   :  { %v2342_v51 = vld [vmem:[#allocation3 + $0x1c] sm:$0xf]  ;;  %v7946_v20 = vrot.slane %v2027_v35, 4  ;;  %v2257_v60 = vshll.u32 %v7878_v23, 16  ;;  %2352 = vst.msk [vmem:[#allocation6 + $0x60] sm:$0xf] %vm1122_vm6, %v2341_v0  ;;  %2065 = vrot.lane.b32.xlu1 %v1993_v8, %s6184_s27 }
 0x2de   :  { %2353 = vst.msk [vmem:[#allocation6 + $0x74] sm:$0xf] %vm1122_vm6, %v2342_v51  ;;  %v2343_v26 = vld [vmem:[#allocation3 + $0x20] sm:$0xf]  ;;  %v2344_v2 = vld [vmem:[#allocation3 + $0x24] sm:$0xf] }
 0x2df   :  { %v2261_v57 = vrot.slane %v2256_v34, 4  ;;  %v7952_v29 = vrot.slane %v2040_v37, 5  ;;  %v2046_v33 = vrot.slane %v2044_v47, 4  ;;  %v1683_v3 = vld [vmem:[#allocation3 + $0x8] sm:$0xf]  ;;  %v2033_v23 = vsel %vm7544_vm10, %v7946_v20, %v7925_v39 }
 0x2e0   :  { %2354 = vst.msk [vmem:[#allocation6 + $0x88] sm:$0xf] %vm1122_vm6, %v2343_v26  ;;  %2355 = vst.msk [vmem:[#allocation6 + $0x9c] sm:$0xf] %vm1122_vm6, %v2344_v2  ;;  %v2345_v24 = vld [vmem:[#allocation3 + $0x28] sm:$0xf]  ;;  %v2259_v7 = vor.u32 %v2257_v60, %v2256_v34  ;;  %2301 = vrot.lane.b32.xlu0 %v2242_v12, %s6184_s27 }
 0x2e1   :  { %vm1703_vm15 = vcmask 1042432   ;;  %v1684_v44 = vld [vmem:[#allocation3 + $0xc] sm:$0xf]  ;;  %v1685_v54 = vld [vmem:[#allocation3 + $0x10] sm:$0xf]  ;;  %v7973_v31 = vrot.slane %v2272_v40, 7  ;;  %v7979_v36 = vsel %vm7527_vm11, %v2261_v57, %v2268_v55  ;;  %v2047_v5 = vor.u32 %v2046_v33, %v7952_v29  ;;  %2303 = vrot.lane.b32.xlu1 %v7923_v19, %s6184_s27 }
 0x2e2   :  { %2356 = vst.msk [vmem:[#allocation6 + $0xb0] sm:$0xf] %vm1122_vm6, %v2345_v24  ;;  %v2347_v18 = vld [vmem:[#allocation3 + $0x30] sm:$0x1]  ;;  %v2270_v43 = vrot.slane %v7912_v50, 4  ;;  %vm1704_vm3 = vcmask 1046532   ;;  %v7983_v16 = vsel %vm7527_vm11, %v2252_v46, %v2259_v7 }
 0x2e3   :  { %v1708_v11 = vrot.slane %v1682_v63, 5  ;;  %2358 = vst.msk [vmem:[#allocation6 + $0xd8] sm:$0x1] %vm1282_vm13, %v2347_v18  ;;  %v1949_v56 = vld [vmem:[#allocation3 + $0x2c] sm:$0x3]  ;;  %v2275_v32 = vshll.u32 %v7917_v49, 16  ;;  %vm7987_vm2 = vmor %vm1703_vm15, %vm1704_vm3 }
 0x2e4   :  { %v2192_v61 = vld [vmem:[#allocation3 + $0x2c] sm:$0xf]  ;;  %v5190_v8 = vrot.slane %v1681_v25, 9  ;;  %v2050_v6 = vshll.u32 %v1949_v56, 16  ;;  %v7992_v22 = vrot.slane %v2037_v52, 4  ;;  %vm2126_vm12 = vcmask 1044484   ;;  %2071 = vrot.lane.b32.xlu0 %v2023_v28, %s6184_s27 }
 0x2e5   :  { %v2281_v45 = vshrl.u32 %v2192_v61, 16  ;;  %v1686_v59 = vld [vmem:[#allocation3 + $0x14] sm:$0xf]  ;;  %v2054_v9 = vshrl.u32 %v1949_v56, 16  ;;  %v1710_v4 = vrot.slane %v1708_v11, 4  ;;  %v1711_v17 = vrot.slane %v1683_v3, 5  ;;  %2069 = vrot.lane.b32.xlu1 %v2013_v14, %s6184_s27 }
 0x2e6   :  { %v1709_v62 = vsel %vm7987_vm2, %v5190_v8, %v1708_v11  ;;  %v1687_v35 = vld [vmem:[#allocation3 + $0x18] sm:$0xf]  ;;  %v7999_v50 = vrot.slane %v2050_v6, 5  ;;  %v2277_v42 = vor.u32 %v2275_v32, %v7973_v31  ;;  %v1714_v49 = vrot.slane %v1684_v44, 5  ;;  %v1688_v34 = vld [vmem:[#allocation3 + $0x1c] sm:$0xf] }
 0x2e7   :  { %1749 = vst.msk [vmem:[#allocation6 + $0x4] sm:$0xf] %vm1122_vm6, %v1709_v62  ;;  %v1717_v53 = vrot.slane %v1685_v54, 5  ;;  %v1689_v37 = vld [vmem:[#allocation3 + $0x20] sm:$0xf]  ;;  %v8003_v10 = vrot.slane %v2281_v45, 7  ;;  %v1712_v27 = vsel %vm7987_vm2, %v1710_v4, %v1711_v17  ;;  %v2043_v13 = vsel %vm7544_vm10, %v7992_v22, %v7952_v29 }
 0x2e8   :  { %v1713_v30 = vrot.slane %v1711_v17, 4  ;;  %v1720_v47 = vrot.slane %v1686_v59, 5  ;;  %v1690_v38 = vld [vmem:[#allocation3 + $0x24] sm:$0xf]  ;;  %v1691_v63 = vld [vmem:[#allocation3 + $0x28] sm:$0x3]  ;;  %v8017_v40 = vsel %vm7527_vm11, %v2270_v43, %v2277_v42  ;;  %2305 = vrot.lane.b32.xlu0 %v7983_v16, %s6184_s27 }
 0x2e9   :  { %v8007_v19 = vrot.slane %v2047_v5, 4  ;;  %v2284_v1 = vshll.u32 %v2192_v61, 16  ;;  %1750 = vst.msk [vmem:[#allocation6 + $0x18] sm:$0xf] %vm1122_vm6, %v1712_v27  ;;  %v1716_v12 = vrot.slane %v1714_v49, 4  ;;  %v8019_v25 = vrot.slane %v2054_v9, 4  ;;  %2073 = vrot.lane.b32.xlu1 %v2033_v23, %s6184_s27 }
 0x2ea   :  { %v2104_v46 = vld [vmem:[#allocation3 + $0x8] sm:$0xf]  ;;  %v1715_v0 = vsel %vm7987_vm2, %v1713_v30, %v1714_v49  ;;  %v1719_v51 = vrot.slane %v1717_v53, 4  ;;  %v2105_v55 = vld [vmem:[#allocation3 + $0xc] sm:$0xf]  ;;  %v1722_v2 = vrot.slane %v1720_v47, 4 }
 0x2eb   :  { %v2053_v60 = vsel %vm7544_vm10, %v8007_v19, %v7999_v50  ;;  %1751 = vst.msk [vmem:[#allocation6 + $0x2c] sm:$0xf] %vm1122_vm6, %v1715_v0  ;;  %v1718_v26 = vsel %vm7987_vm2, %v1716_v12, %v1717_v53  ;;  %v1723_v57 = vrot.slane %v1687_v35, 5  ;;  %v2103_v29 = vld [vmem:[#allocation3 + $0x4] sm:$0x8]  ;;  %v8037_v33 = vor.u32 %v2284_v1, %v8003_v10 }
 0x2ec   :  { %1752 = vst.msk [vmem:[#allocation6 + $0x40] sm:$0xf] %vm1122_vm6, %v1718_v26  ;;  %v1721_v48 = vsel %vm7987_vm2, %v1719_v51, %v1720_v47  ;;  %v1726_v21 = vrot.slane %v1688_v34, 5  ;;  %v1729_v14 = vrot.slane %v1689_v37, 5  ;;  %v2106_v52 = vld [vmem:[#allocation3 + $0x10] sm:$0xf]  ;;  %v2057_v43 = vor.u32 %v8019_v25, %v7999_v50  ;;  %2075 = vrot.lane.b32.xlu0 %v2043_v13, %s6184_s27 }
 0x2ed   :  { %v2107_v3 = vld [vmem:[#allocation3 + $0x14] sm:$0xf]  ;;  %1753 = vst.msk [vmem:[#allocation6 + $0x54] sm:$0xf] %vm1122_vm6, %v1721_v48  ;;  %v1724_v24 = vsel %vm7987_vm2, %v1722_v2, %v1723_v57  ;;  %v1725_v28 = vrot.slane %v1723_v57, 4  ;;  %v1732_v7 = vrot.slane %v1690_v38, 5  ;;  %2307 = vrot.lane.b32.xlu1 %v7979_v36, %s6184_s27 }
 0x2ee   :  { %v1735_v44 = vrot.slane %v1691_v63, 5  ;;  %v2108_v54 = vld [vmem:[#allocation3 + $0x18] sm:$0xf]  ;;  %v2109_v18 = vld [vmem:[#allocation3 + $0x1c] sm:$0xf]  ;;  %v1728_v11 = vrot.slane %v1726_v21, 4 }
 0x2ef   :  { %1754 = vst.msk [vmem:[#allocation6 + $0x68] sm:$0xf] %vm1122_vm6, %v1724_v24  ;;  %v1731_v56 = vrot.slane %v1729_v14, 4  ;;  %v2130_v61 = vrot.slane %v2104_v46, 7  ;;  %v2110_v32 = vld [vmem:[#allocation3 + $0x20] sm:$0xf]  ;;  %v1727_v8 = vsel %vm7987_vm2, %v1725_v28, %v1726_v21 }
 0x2f0   :  { %v1734_v16 = vrot.slane %v1732_v7, 4  ;;  %v1737_v5 = vrot.slane %v1735_v44, 4  ;;  %v2133_v6 = vrot.slane %v2105_v55, 7  ;;  %v2111_v22 = vld [vmem:[#allocation3 + $0x24] sm:$0xf]  ;;  %v1730_v59 = vsel %vm7987_vm2, %v1728_v11, %v1729_v14  ;;  %2309 = vrot.lane.b32.xlu0 %v8017_v40, %s6184_s27 }
 0x2f1   :  { %v2346_v45 = vld [vmem:[#allocation3 + $0x2c] sm:$0xf]  ;;  %1755 = vst.msk [vmem:[#allocation6 + $0x7c] sm:$0xf] %vm1122_vm6, %v1727_v8  ;;  %v1733_v9 = vsel %vm7987_vm2, %v1731_v56, %v1732_v7  ;;  %v2132_v62 = vrot.slane %v2130_v61, 4  ;;  %v5192_v4 = vrot.slane %v2103_v29, 11  ;;  %2077 = vrot.lane.b32.xlu1 %v2053_v60, %s6184_s27 }
 0x2f2   :  { %2357 = vst.msk [vmem:[#allocation6 + $0xc4] sm:$0xf] %vm1122_vm6, %v2346_v45  ;;  %vm9047_vm9 = vcmask 1040384   ;;  %1756 = vst.msk [vmem:[#allocation6 + $0x90] sm:$0xf] %vm1122_vm6, %v1730_v59  ;;  %v1736_v20 = vsel %vm7987_vm2, %v1734_v16, %v1735_v44  ;;  %v2136_v23 = vrot.slane %v2106_v52, 7 }
 0x2f3   :  { %vm8066_vm7 = vmor %vm9047_vm9, %vm2126_vm12  ;;  %1757 = vst.msk [vmem:[#allocation6 + $0xa4] sm:$0xf] %vm1122_vm6, %v1733_v9  ;;  %v2139_v17 = vrot.slane %v2107_v3, 7  ;;  %v2135_v35 = vrot.slane %v2133_v6, 4  ;;  %v2112_v42 = vld [vmem:[#allocation3 + $0x28] sm:$0xf] }
 0x2f4   :  { %1759 = vst.msk [vmem:[#allocation6 + $0xcc] sm:$0x1] %vm1282_vm13, %v1737_v5  ;;  %v2134_v49 = vsel %vm8066_vm7, %v2132_v62, %v2133_v6  ;;  %v2131_v53 = vsel %vm8066_vm7, %v5192_v4, %v2130_v61  ;;  %v2142_v34 = vrot.slane %v2108_v54, 7  ;;  %v2145_v37 = vrot.slane %v2109_v18, 7  ;;  %v2113_v27 = vld [vmem:[#allocation3 + $0x2c] sm:$0xf] }
 0x2f5   :  { %1758 = vst.msk [vmem:[#allocation6 + $0xb8] sm:$0xf] %vm1122_vm6, %v1736_v20  ;;  %2172 = vst.msk [vmem:[#allocation6 + $0x20] sm:$0xf] %vm1122_vm6, %v2134_v49  ;;  %v2138_v30 = vrot.slane %v2136_v23, 4  ;;  %v2137_v47 = vsel %vm8066_vm7, %v2135_v35, %v2136_v23  ;;  %v2141_v38 = vrot.slane %v2139_v17, 4 }
 0x2f6   :  { %2171 = vst.msk [vmem:[#allocation6 + $0xc] sm:$0xf] %vm1122_vm6, %v2131_v53  ;;  %v2148_v63 = vrot.slane %v2110_v32, 7  ;;  %2173 = vst.msk [vmem:[#allocation6 + $0x34] sm:$0xf] %vm1122_vm6, %v2137_v47  ;;  %v2144_v13 = vrot.slane %v2142_v34, 4 }
 0x2f7   :  { %v2151_v1 = vrot.slane %v2111_v22, 7  ;;  %v2147_v12 = vrot.slane %v2145_v37, 4  ;;  %v2154_v46 = vrot.slane %v2112_v42, 7  ;;  %v2140_v0 = vsel %vm8066_vm7, %v2138_v30, %v2139_v17  ;;  %v2193_v52 = vld [vmem:[#allocation3 + $0x30] sm:$0x1]  ;;  %v1874_v24 = vpop.permute.xlu1 %1873  ;;  %v5963_v11 = vld [vmem:[%s8992_s2 + $0xc8] sm:$0xff]  }
 0x2f8   :  { %v2143_v36 = vsel %vm8066_vm7, %v2141_v38, %v2142_v34  ;;  %v2150_v51 = vrot.slane %v2148_v63, 4  ;;  %v2157_v55 = vrot.slane %v2113_v27, 7  ;;  %2174 = vst.msk [vmem:[#allocation6 + $0x48] sm:$0xf] %vm1122_vm6, %v2140_v0  ;;  %v2146_v26 = vsel %vm8066_vm7, %v2144_v13, %v2145_v37  ;;  %v5964_v56 = vld [vmem:[%s8992_s2 + $0x88] sm:$0xff]   ;;  %v5967_v32 = vld [vmem:[%s8992_s2 + $0xd0] sm:$0xff]  }
 0x2f9   :  { %2175 = vst.msk [vmem:[#allocation6 + $0x5c] sm:$0xf] %vm1122_vm6, %v2143_v36  ;;  %v2149_v2 = vsel %vm8066_vm7, %v2147_v12, %v2148_v63  ;;  %v2156_v57 = vrot.slane %v2154_v46, 4  ;;  %v2153_v29 = vrot.slane %v2151_v1, 4  ;;  %2176 = vst.msk [vmem:[#allocation6 + $0x70] sm:$0xf] %vm1122_vm6, %v2146_v26 }
 0x2fa   :  { %v2152_v40 = vsel %vm8066_vm7, %v2150_v51, %v2151_v1  ;;  %2177 = vst.msk [vmem:[#allocation6 + $0x84] sm:$0xf] %vm1122_vm6, %v2149_v2  ;;  %v2159_v48 = vrot.slane %v2157_v55, 4  ;;  %v2279_v21 = vrot.slane %v7973_v31, 4  ;;  %v2058_v14 = vrot.slane %v2057_v43, 4  ;;  %v1636_v28 = vpop.permute.xlu0 %1635  ;;  %v5968_v8 = vld [vmem:[%s8992_s2 + $0x90] sm:$0xff]  }
 0x2fb   :  { %2178 = vst.msk [vmem:[#allocation6 + $0x98] sm:$0xf] %vm1122_vm6, %v2152_v40  ;;  %v2158_v19 = vsel %vm8066_vm7, %v2156_v57, %v2157_v55  ;;  %v2155_v60 = vsel %vm8066_vm7, %v2153_v29, %v2154_v46  ;;  %v2288_v50 = vrot.slane %v8003_v10, 4  ;;  %v2290_v25 = vshll.u32 %v2193_v52, 16  ;;  %v5971_v5 = vld [vmem:[%s8992_s2 + $0xd8] sm:$0xff]   ;;  %v5975_v59 = vld [vmem:[%s8992_s2 + $0xe0] sm:$0xff]  }
 0x2fc   :  { %2180 = vst.msk [vmem:[#allocation6 + $0xc0] sm:$0xf] %vm1122_vm6, %v2158_v19  ;;  %2179 = vst.msk [vmem:[#allocation6 + $0xac] sm:$0xf] %vm1122_vm6, %v2155_v60  ;;  %v2287_v31 = vsel %vm7527_vm11, %v2279_v21, %v8037_v33  ;;  %2079 = vrot.lane.b32.xlu0 %v2058_v14, %s6184_s27  ;;  %vm1668_vm1 = vcmask 1043968   ;;  %v5972_v6 = vld [vmem:[%s8992_s2 + $0x98] sm:$0xff]  }
 0x2fd   :  { %2181 = vst.msk [vmem:[#allocation6 + $0xd4] sm:$0x1] %vm1282_vm13, %v2159_v48  ;;  %2311 = vrot.lane.b32.xlu1 %v2287_v31, %s6184_s27  ;;  %v2292_v3 = vsel %vm7527_vm11, %v2288_v50, %v2290_v25  ;;  %v5976_v9 = vld [vmem:[%s8992_s2 + $0xa0] sm:$0xff]   ;;  %v5977_v4 = vld [vmem:[%s8992_s2 + $0xe8] sm:$0xff]   ;;  %v5982_v34 = vld [vmem:[%s8992_s2 + $0xf0] sm:$0xff]   ;;  %vm1679_vm13 = vcmask 1040896  }
 0x2fe   :  { %1906 = vst.msk [vmem:[#allocation6 + $0x4] sm:$0xf] %vm1668_vm1, %v1874_v24  ;;  %1669 = vst.msk [vmem:[#allocation6] sm:$0xf] %vm1668_vm1, %v1636_v28  ;;  %v5978_v49 = vld [vmem:[%s8992_s2 + $0xa8] sm:$0xff]   ;;  %v5983_v30 = vld [vmem:[%s8992_s2 + $0xb0] sm:$0xff]  }
 0x2ff   :  { %v5984_v47 = vld [vmem:[%s8992_s2 + $0xf8] sm:$0xff]   ;;  %v8194_v12 = vld [vmem:[%s8992_s2 + $0x100] sm:$0xff]   ;;  %vm9050_vm11 = vcmask 523264  }
 0x300   :  { %v5985_v13 = vld [vmem:[%s8992_s2 + $0xb8] sm:$0xff]   ;;  %vm9051_vm8 = vmmov %vm9050_vm11 }
 0x301   :  { %2313 = vrot.lane.b32.xlu1 %v2292_v3, %s6184_s27  ;;  %vm9052_vm14 = vmmov %vm9051_vm8 }
 0x302   :  { %vm9053_vm15 = vmmov %vm9051_vm8 }
 0x303   :  { %vm9054_vm3 = vmmov %vm9051_vm8 }
 0x304   :  { %vm9055_vm12 = vmmov %vm9054_vm3 }
 0x305   :  { %v2359_v7 = vld [vmem:[#allocation6] sm:$0xff]  ;;  %vm9056_vm9 = vmmov %vm9054_vm3 }
 0x309   :  { %v1638_v33 = vpop.permute.xlu0 %1637 }
 0x30a   :  { %1670 = vst.msk [vmem:[#allocation6 + $0x14] sm:$0xf] %vm1668_vm1, %v1638_v33  ;;  %v1876_v10 = vpop.permute.xlu1 %1875 }
 0x30b   :  { %1907 = vst.msk [vmem:[#allocation6 + $0x18] sm:$0xf] %vm1668_vm1, %v1876_v10 }
 0x312   :  { %v2362_v44 = vld [vmem:[#allocation6 + $0x14] sm:$0xff]  ;;  %v1878_v18 = vpop.permute.xlu0 %1877 }
 0x313   :  { %v5959_v54 = vld [vmem:[#allocation6 + $0x4] ss:$20 sps:$4 sm:$0xff]   ;;  %v5194_v43 = vcombine.low %v2359_v7, %v2362_v44  ;;  %1908 = vst.msk [vmem:[#allocation6 + $0x2c] sm:$0xf] %vm1668_vm1, %v1878_v18 }
 0x314   :  { %2872 = vmatprep.mubr.bf16.mxu1 %v5959_v54 }
 0x315   :  { %2873 = vmatmul.mubr.bf16.vlgmr.msra.gmra.mrb[0].mxu1 %v5194_v43 }
 0x316   :  { %5552 = vmatpush3.bf16.msra.mxu1 %v5962_v41  ;;  %v1640_v61 = vpop.permute.xlu0 %1639 }
 0x317   :  { %5553 = vmatprep.subr.bf16.mxu1 %v5963_v11  ;;  %1671 = vst.msk [vmem:[#allocation6 + $0x28] sm:$0xf] %vm1668_vm1, %v1640_v61 }
 0x31a   :  { %5554 = vmatpush3.bf16.msra.mxu1 %v5964_v56 }
 0x31b   :  { %5555 = vmatprep.subr.bf16.mxu1 %v5967_v32 }
 0x31c   :  { %v1642_v16 = vpop.permute.xlu1 %1641 }
 0x31d   :  { %1672 = vst.msk [vmem:[#allocation6 + $0x3c] sm:$0xf] %vm1668_vm1, %v1642_v16  ;;  %v5993_v16 = vld [vmem:[%s8992_s2 + $0x108] sm:$0xff]  }
 0x31e   :  { %5556 = vmatpush3.bf16.msra.mxu1 %v5968_v8  ;;  %v2365_v23 = vld [vmem:[#allocation6 + $0x28] sm:$0xff] }
 0x31f   :  { %5557 = vmatprep.subr.bf16.mxu1 %v5971_v5 }
 0x320   :  { %v1880_v22 = vpop.permute.xlu1 %1879 }
 0x321   :  { %v1882_v45 = vpop.permute.xlu0 %1881  ;;  %1909 = vst.msk [vmem:[#allocation6 + $0x40] sm:$0xf] %vm1668_vm1, %v1880_v22 }
 0x322   :  { %1910 = vst.msk [vmem:[#allocation6 + $0x54] sm:$0xf] %vm1668_vm1, %v1882_v45  ;;  %5558 = vmatpush3.bf16.msra.mxu1 %v5972_v6  ;;  %v5996_v45 = vld [vmem:[%s8992_s2 + $0x110] sm:$0xff]  }
 0x323   :  { %5559 = vmatprep.subr.bf16.mxu1 %v5975_v59 }
 0x325   :  { %v1644_v62 = vpop.permute.xlu0 %1643 }
 0x326   :  { %1673 = vst.msk [vmem:[#allocation6 + $0x50] sm:$0xf] %vm1668_vm1, %v1644_v62  ;;  %5560 = vmatpush3.bf16.msra.mxu1 %v5976_v9 }
 0x327   :  { %v1646_v20 = vpop.permute.xlu1 %1645  ;;  %5561 = vmatprep.subr.bf16.mxu1 %v5977_v4 }
 0x328   :  { %1674 = vst.msk [vmem:[#allocation6 + $0x64] sm:$0xf] %vm1668_vm1, %v1646_v20  ;;  %v2368_v17 = vld [vmem:[#allocation6 + $0x3c] sm:$0xff] }
 0x329   :  { %v5965_v35 = vld [vmem:[#allocation6 + $0x2c] ss:$20 sps:$4 sm:$0xff]   ;;  %v5199_v53 = vcombine.low %v2365_v23, %v2368_v17  ;;  %v6001_v23 = vld [vmem:[%s8992_s2 + $0x118] sm:$0xff]  }
 0x32a   :  { %v1886_v42 = vpop.permute.xlu0 %1885  ;;  %2880 = vmatprep.mubr.bf16.mxu1 %v5965_v35  ;;  %5562 = vmatpush3.bf16.msra.mxu1 %v5978_v49 }
 0x32b   :  { %1912 = vst.msk [vmem:[#allocation6 + $0x7c] sm:$0xf] %vm1668_vm1, %v1886_v42  ;;  %v1884_v37 = vpop.permute.xlu1 %1883  ;;  %2881 = vmatmul.mubr.bf16.gmra.mrb[4].mxu1 %v5199_v53  ;;  %5563 = vmatprep.subr.bf16.mxu1 %v5982_v34 }
 0x32c   :  { %1911 = vst.msk [vmem:[#allocation6 + $0x68] sm:$0xf] %vm1668_vm1, %v1884_v37 }
 0x32d   :  { %v2371_v63 = vld [vmem:[#allocation6 + $0x50] sm:$0xff] }
 0x32e   :  { %v1648_v27 = vpop.permute.xlu0 %1647  ;;  %5564 = vmatpush3.bf16.msra.mxu1 %v5983_v30 }
 0x32f   :  { %1675 = vst.msk [vmem:[#allocation6 + $0x78] sm:$0xf] %vm1668_vm1, %v1648_v27  ;;  %v1650_v38 = vpop.permute.xlu1 %1649  ;;  %5565 = vmatprep.subr.bf16.mxu1 %v5984_v47 }
 0x330   :  { %1676 = vst.msk [vmem:[#allocation6 + $0x8c] sm:$0xf] %vm1668_vm1, %v1650_v38 }
 0x332   :  { %v1652_v1 = vpop.permute.xlu0 %1651  ;;  %5566 = vmatpush3.bf16.msra.mxu1 %v5985_v13 }
 0x333   :  { %v1888_v46 = vpop.permute.xlu1 %1887  ;;  %v2374_v0 = vld [vmem:[#allocation6 + $0x64] sm:$0xff]  ;;  %1677 = vst.msk [vmem:[#allocation6 + $0xa0] sm:$0xf] %vm1668_vm1, %v1652_v1  ;;  %5888 = vmatprep.subr.bf16.mxu1 %v8194_v12 }
 0x334   :  { %v5969_v36 = vld [vmem:[#allocation6 + $0x54] ss:$20 sps:$4 sm:$0xff]   ;;  %1913 = vst.msk [vmem:[#allocation6 + $0x90] sm:$0xf] %vm1668_vm1, %v1888_v46  ;;  %v5204_v51 = vcombine.low %v2371_v63, %v2374_v0 }
 0x335   :  { %2888 = vmatprep.mubr.bf16.mxu1 %v5969_v36 }
 0x336   :  { %2889 = vmatmul.mubr.bf16.gmra.mrb[8].mxu1 %v5204_v51  ;;  %v1890_v55 = vpop.permute.xlu0 %1889  ;;  %v2377_v2 = vld [vmem:[#allocation6 + $0x78] sm:$0xff] }
 0x337   :  { %v1654_v26 = vpop.permute.xlu1 %1653  ;;  %1914 = vst.msk [vmem:[#allocation6 + $0xa4] sm:$0xf] %vm1668_vm1, %v1890_v55 }
 0x338   :  { %1678 = vst.msk [vmem:[#allocation6 + $0xb4] sm:$0xf] %vm1668_vm1, %v1654_v26  ;;  %v6003_v26 = vld [vmem:[#allocation6 + $0x10] ss:$20 sps:$4 sm:$0xff]  }
 0x33a   :  { %v1656_v57 = vpop.permute.xlu0 %1655 }
 0x33b   :  { %v1892_v29 = vpop.permute.xlu1 %1891  ;;  %v2380_v40 = vld [vmem:[#allocation6 + $0x8c] sm:$0xff]  ;;  %1680 = vst.msk [vmem:[#allocation6 + $0xc8] sm:$0x1] %vm1679_vm13, %v1656_v57  ;;  %v6005_v57 = vld [vmem:[#allocation6 + $0x60] ss:$20 sps:$4 sm:$0xff]  }
 0x33c   :  { %v5973_v48 = vld [vmem:[#allocation6 + $0x7c] ss:$20 sps:$4 sm:$0xff]   ;;  %1915 = vst.msk [vmem:[#allocation6 + $0xb8] sm:$0xf] %vm1668_vm1, %v1892_v29  ;;  %v5209_v21 = vcombine.low %v2377_v2, %v2380_v40  ;;  %v6004_v2 = vld [vmem:[#allocation6 + $0x38] ss:$20 sps:$4 sm:$0xff]  }
 0x33d   :  { %2896 = vmatprep.mubr.bf16.mxu1 %v5973_v48  ;;  %v6006_v29 = vld [vmem:[#allocation6 + $0x88] ss:$20 sps:$4 sm:$0xff]   ;;  %v6007_v40 = vld [vmem:[#allocation6 + $0xb0] ss:$20 sps:$4 sm:$0xff]  }
 0x33e   :  { %2897 = vmatmul.mubr.bf16.gmra.mrb[12].mxu1 %v5209_v21  ;;  %v2060_v14 = vpop.permute.xlu0 %2059  ;;  %v2383_v60 = vld [vmem:[#allocation6 + $0xa0] sm:$0xff]  ;;  %v6008_v48 = vld [vmem:[#allocation6 + $0xd8] ss:$0 sps:$4 sm:$0x11]  }
 0x33f   :  { %v1894_v19 = vpop.permute.xlu1 %1893  ;;  %2092 = vst.msk [vmem:[#allocation6 + $0x8] sm:$0xf] %vm1668_vm1, %v2060_v14 }
 0x340   :  { %1916 = vst.msk [vmem:[#allocation6 + $0xcc] sm:$0x1] %vm1679_vm13, %v1894_v19 }
 0x342   :  { %v2294_v52 = vpop.permute.xlu0 %2293 }
 0x343   :  { %v2296_v31 = vpop.permute.xlu1 %2295  ;;  %v2386_v50 = vld [vmem:[#allocation6 + $0xb4] sm:$0xff]  ;;  %2326 = vst.msk [vmem:[#allocation6 + $0xc] sm:$0xf] %vm1668_vm1, %v2294_v52 }
 0x344   :  { %v5979_v25 = vld [vmem:[#allocation6 + $0xa4] ss:$20 sps:$4 sm:$0xff]   ;;  %2327 = vst.msk [vmem:[#allocation6 + $0x20] sm:$0xf] %vm1668_vm1, %v2296_v31  ;;  %v5214_v3 = vcombine.low %v2383_v60, %v2386_v50 }
 0x345   :  { %2904 = vmatprep.mubr.bf16.mxu1 %v5979_v25 }
 0x346   :  { %2905 = vmatmul.mubr.bf16.gmra.mrb[16].mxu1 %v5214_v3  ;;  %v2064_v24 = vpop.permute.xlu0 %2063 }
 0x347   :  { %v2062_v28 = vpop.permute.xlu1 %2061  ;;  %v2389_v33 = vld [vmem:[#allocation6 + $0xc8] sm:$0x11]  ;;  %2094 = vst.msk [vmem:[#allocation6 + $0x30] sm:$0xf] %vm1668_vm1, %v2064_v24 }
 0x348   :  { %2093 = vst.msk [vmem:[#allocation6 + $0x1c] sm:$0xf] %vm1668_vm1, %v2062_v28  ;;  %v5220_v10 = vcombine.high %v2389_v33, %v2389_v33  ;;  %v5219_v44 = vcombine.low %v2389_v33, %v2389_v33 }
 0x34a   :  { %2912 = vmatprep.mubr.bf16.mxu1 %v5220_v10  ;;  %v2298_v41 = vpop.permute.xlu0 %2297  ;;  %v2360_v11 = vld [vmem:[#allocation6 + $0x8] sm:$0xff] }
 0x34b   :  { %v2300_v7 = vpop.permute.xlu1 %2299  ;;  %2328 = vst.msk [vmem:[#allocation6 + $0x34] sm:$0xf] %vm1668_vm1, %v2298_v41  ;;  %v5986_v43 = vld [vmem:[#allocation6 + $0xc] ss:$20 sps:$4 sm:$0xff]  }
 0x34c   :  { %2329 = vst.msk [vmem:[#allocation6 + $0x48] sm:$0xf] %vm1668_vm1, %v2300_v7 }
 0x34e   :  { %2913 = vmatmul.mubr.bf16.gmra.mrb[20].mxu1 %v5219_v44  ;;  %v2068_v54 = vpop.permute.xlu0 %2067 }
 0x34f   :  { %v2066_v18 = vpop.permute.xlu1 %2065  ;;  %2096 = vst.msk [vmem:[#allocation6 + $0x58] sm:$0xf] %vm1668_vm1, %v2068_v54  ;;  %2952 = vmatprep.mubr.bf16.mxu1 %v5986_v43  ;;  %v2363_v32 = vld [vmem:[#allocation6 + $0x1c] sm:$0xff] }
 0x350   :  { %2095 = vst.msk [vmem:[#allocation6 + $0x44] sm:$0xf] %vm1668_vm1, %v2066_v18  ;;  %v5196_v8 = vcombine.low %v2360_v11, %v2363_v32 }
 0x352   :  { %v2302_v56 = vpop.permute.xlu0 %2301  ;;  %v2366_v59 = vld [vmem:[#allocation6 + $0x30] sm:$0xff] }
 0x353   :  { %v2304_v61 = vpop.permute.xlu1 %2303  ;;  %2330 = vst.msk [vmem:[#allocation6 + $0x5c] sm:$0xf] %vm1668_vm1, %v2302_v56  ;;  %v5989_v22 = vld [vmem:[#allocation6 + $0x34] ss:$20 sps:$4 sm:$0xff]  }
 0x354   :  { %2331 = vst.msk [vmem:[#allocation6 + $0x70] sm:$0xf] %vm1668_vm1, %v2304_v61 }
 0x356   :  { %2953 = vmatmul.mubr.bf16.vlgmr.msra.gmra.mrb[24].mxu1 %v5196_v8  ;;  %v2072_v5 = vpop.permute.xlu0 %2071 }
 0x357   :  { %v2070_v6 = vpop.permute.xlu1 %2069  ;;  %5889 = vmatpush3.bf16.msra.mxu1 %v8194_v12  ;;  %2098 = vst.msk [vmem:[#allocation6 + $0x80] sm:$0xf] %vm1668_vm1, %v2072_v5  ;;  %2960 = vmatprep.mubr.bf16.mxu1 %v5989_v22  ;;  %v2369_v4 = vld [vmem:[#allocation6 + $0x44] sm:$0xff] }
 0x358   :  { %2097 = vst.msk [vmem:[#allocation6 + $0x6c] sm:$0xf] %vm1668_vm1, %v2070_v6  ;;  %5890 = vmatprep.subr.bf16.mxu1 %v5993_v16  ;;  %v5201_v20 = vcombine.low %v2366_v59, %v2369_v4 }
 0x35a   :  { %v2306_v9 = vpop.permute.xlu0 %2305  ;;  %v2372_v49 = vld [vmem:[#allocation6 + $0x58] sm:$0xff] }
 0x35b   :  { %v2074_v62 = vpop.permute.xlu1 %2073  ;;  %2332 = vst.msk [vmem:[#allocation6 + $0x84] sm:$0xf] %vm1668_vm1, %v2306_v9  ;;  %5891 = vmatpush3.bf16.msra.mxu1 %v5993_v16  ;;  %v5991_v42 = vld [vmem:[#allocation6 + $0x5c] ss:$20 sps:$4 sm:$0xff]  }
 0x35c   :  { %2099 = vst.msk [vmem:[#allocation6 + $0x94] sm:$0xf] %vm1668_vm1, %v2074_v62  ;;  %5892 = vmatprep.subr.bf16.mxu1 %v5996_v45 }
 0x35e   :  { %2961 = vmatmul.mubr.bf16.gmra.mrb[28].mxu1 %v5201_v20  ;;  %v2076_v17 = vpop.permute.xlu0 %2075 }
 0x35f   :  { %v2308_v35 = vpop.permute.xlu1 %2307  ;;  %2100 = vst.msk [vmem:[#allocation6 + $0xa8] sm:$0xf] %vm1668_vm1, %v2076_v17  ;;  %5893 = vmatpush3.bf16.msra.mxu1 %v5996_v45  ;;  %2968 = vmatprep.mubr.bf16.mxu1 %v5991_v42  ;;  %v2375_v37 = vld [vmem:[#allocation6 + $0x6c] sm:$0xff] }
 0x360   :  { %2333 = vst.msk [vmem:[#allocation6 + $0x98] sm:$0xf] %vm1668_vm1, %v2308_v35  ;;  %5894 = vmatprep.subr.bf16.mxu1 %v6001_v23  ;;  %v5206_v27 = vcombine.low %v2372_v49, %v2375_v37 }
 0x362   :  { %v2310_v53 = vpop.permute.xlu0 %2309  ;;  %v2378_v63 = vld [vmem:[#allocation6 + $0x80] sm:$0xff] }
 0x363   :  { %v2078_v34 = vpop.permute.xlu1 %2077  ;;  %2334 = vst.msk [vmem:[#allocation6 + $0xac] sm:$0xf] %vm1668_vm1, %v2310_v53  ;;  %5895 = vmatpush3.bf16.msra.mxu1 %v6001_v23 }
 0x364   :  { %2101 = vst.msk [vmem:[#allocation6 + $0xbc] sm:$0xf] %vm1668_vm1, %v2078_v34 }
 0x366   :  { %2969 = vmatmul.mubr.bf16.gmra.mrb[32].mxu1 %v5206_v27 }
 0x367   :  { %v5994_v38 = vld [vmem:[#allocation6 + $0x84] ss:$20 sps:$4 sm:$0xff]  }
 0x368   :  { %2976 = vmatprep.mubr.bf16.mxu1 %v5994_v38  ;;  %v2381_v1 = vld [vmem:[#allocation6 + $0x94] sm:$0xff] }
 0x369   :  { %v5211_v12 = vcombine.low %v2378_v63, %v2381_v1 }
 0x36b   :  { %v5999_v36 = vld [vmem:[#allocation6 + $0xa8] ss:$20 sps:$4 sm:$0xff]  }
 0x36e   :  { %v2080_v30 = vpop.permute.xlu0 %2079  ;;  %2977 = vmatmul.mubr.bf16.gmra.mrb[36].mxu1 %v5211_v12 }
 0x36f   :  { %v2312_v47 = vpop.permute.xlu1 %2311  ;;  %2102 = vst.msk [vmem:[#allocation6 + $0xd0] sm:$0x1] %vm1679_vm13, %v2080_v30 }
 0x370   :  { %2335 = vst.msk [vmem:[#allocation6 + $0xc0] sm:$0xf] %vm1668_vm1, %v2312_v47 }
 0x373   :  { %v2314_v13 = vpop.permute.xlu1 %2313 }
 0x374   :  { %2336 = vst.msk [vmem:[#allocation6 + $0xd4] sm:$0x1] %vm1679_vm13, %v2314_v13  ;;  %vm9057_vm13 = vmmov %vm9054_vm3 }
 0x377   :  { %v5997_v46 = vld [vmem:[#allocation6 + $0xac] ss:$20 sps:$4 sm:$0xff]  }
 0x378   :  { %2984 = vmatprep.mubr.bf16.mxu1 %v5997_v46 }
 0x379   :  { %2985 = vmatmul.mubr.bf16.gmra.mrb[40].mxu1 %v5999_v36 }
 0x37b   :  { %v2390_v0 = vld [vmem:[#allocation6 + $0xd0] sm:$0x11] }
 0x37c   :  { %v5222_v51 = vcombine.high %v2390_v0, %v2390_v0  ;;  %v5221_v55 = vcombine.low %v2390_v0, %v2390_v0 }
 0x37e   :  { %2992 = vmatprep.mubr.bf16.mxu1 %v5222_v51 }
 0x381   :  { %2993 = vmatmul.mubr.bf16.gmra.mrb[44].mxu1 %v5221_v55 }
 0x382   :  { %5896 = vmatprep.mubr.msk.bf16.mxu1 %vm9050_vm11, %v6003_v26  ;;  %vm9058_vm11 = vmmov %vm9054_vm3 }
 0x389   :  { %5897 = vmatmul.mubr.msk.bf16.vlgmr.msra.gmra.mrb[48].mxu1 %vm9051_vm8, %v6004_v2  ;;  %vm9059_vm8 = vmmov %vm9054_vm3 }
 0x38a   :  { %5900 = vmatprep.mubr.msk.bf16.mxu1 %vm9052_vm14, %v6005_v57  ;;  %vm9060_vm14 = vmmov %vm9054_vm3 }
 0x391   :  { %5901 = vmatmul.mubr.msk.bf16.gmra.mrb[52].mxu1 %vm9053_vm15, %v6006_v29  ;;  %vm9061_vm15 = vmmov %vm9054_vm3 }
 0x392   :  { %5904 = vmatprep.mubr.msk.bf16.mxu1 %vm9054_vm3, %v6007_v40 }
 0x399   :  { %5905 = vmatmul.mubr.msk.bf16.gmra.mrb[56].mxu1 %vm9055_vm12, %v6008_v48  ;;  %vm9062_vm12 = vmmov %vm9054_vm3 }
 0x3e8   :  { %v5515_v21 = vpop.f32.mrb[0].mxu1 }
 0x3e9   :  { %v5516_v14 = vpop.f32.mrb[1].mxu1 }
 0x3ea   :  { %v5517_v19 = vadd.f32 %v5516_v14, %v5515_v21  ;;  %v5518_v60 = vpop.f32.mrb[2].mxu1 }
 0x3eb   :  { %v5519_v52 = vpop.f32.mrb[3].mxu1 }
 0x3ec   :  { %v5520_v31 = vadd.f32 %v5519_v52, %v5518_v60 }
 0x3fe   :  { %v5521_v50 = vpop.f32.mrb[4].mxu1 }
 0x3ff   :  { %v5522_v25 = vpop.f32.mrb[5].mxu1 }
 0x400   :  { %v5523_v3 = vadd.f32 %v5522_v25, %v5521_v50  ;;  %v5524_v24 = vpop.f32.mrb[6].mxu1 }
 0x401   :  { %v5525_v28 = vpop.f32.mrb[7].mxu1 }
 0x402   :  { %v5526_v33 = vadd.f32 %v5525_v28, %v5524_v24 }
 0x409   :  { %v5527_v10 = vpop.f32.mrb[8].mxu1 }
 0x40a   :  { %v5528_v41 = vpop.f32.mrb[9].mxu1 }
 0x40b   :  { %v5529_v7 = vadd.f32 %v5528_v41, %v5527_v10  ;;  %v5530_v44 = vpop.f32.mrb[10].mxu1 }
 0x40c   :  { %v5531_v54 = vpop.f32.mrb[11].mxu1 }
 0x40d   :  { %v5532_v18 = vadd.f32 %v5531_v54, %v5530_v44 }
 0x411   :  { %v5533_v43 = vpop.f32.mrb[12].mxu1 }
 0x412   :  { %v5534_v11 = vpop.f32.mrb[13].mxu1 }
 0x413   :  { %v5535_v56 = vadd.f32 %v5534_v11, %v5533_v43  ;;  %v5536_v61 = vpop.f32.mrb[14].mxu1 }
 0x414   :  { %v5537_v32 = vpop.f32.mrb[15].mxu1 }
 0x415   :  { %v5538_v8 = vadd.f32 %v5537_v32, %v5536_v61  ;;  %v6010_v32 = vld [vmem:[%s8993_s3 + $0x108] sm:$0xff]  }
 0x419   :  { %v5539_v16 = vpop.f32.mrb[16].mxu1 }
 0x41a   :  { %v5540_v5 = vpop.f32.mrb[17].mxu1 }
 0x41b   :  { %v5541_v6 = vadd.f32 %v5540_v5, %v5539_v16  ;;  %v5542_v22 = vpop.f32.mrb[18].mxu1  ;;  %v8259_v5 = vld [vmem:[%s8997_s7] sm:$0xff] }
 0x41c   :  { %v5543_v45 = vpop.f32.mrb[19].mxu1 }
 0x41d   :  { %v5544_v59 = vadd.f32 %v5543_v45, %v5542_v22 }
 0x421   :  { %v5545_v9 = vpop.f32.mrb[20].mxu1 }
 0x422   :  { %v5546_v62 = vpop.f32.mrb[21].mxu1 }
 0x423   :  { %v5547_v4 = vadd.f32 %v5546_v62, %v5545_v9  ;;  %v5548_v20 = vpop.f32.mrb[22].mxu1 }
 0x424   :  { %v5549_v23 = vpop.f32.mrb[23].mxu1 }
 0x429   :  { %v5567_v17 = vpop.f32.mrb[24].mxu1 }
 0x42a   :  { %v5568_v35 = vpop.f32.mrb[25].mxu1 }
 0x42b   :  { %v5569_v42 = vadd.f32 %v5568_v35, %v5567_v17  ;;  %v5570_v49 = vpop.f32.mrb[26].mxu1  ;;  %v6011_v17 = vld [vmem:[%s8993_s3 + $0x110] sm:$0xff]   ;;  %v8287_v35 = vld [vmem:[%s8997_s7 + $0x18] sm:$0xff] }
 0x42c   :  { %v5571_v53 = vpop.f32.mrb[27].mxu1 }
 0x42d   :  { %v5572_v34 = vadd.f32 %v5571_v53, %v5570_v49  ;;  %v2955_v37 = vadd.f32 %v5569_v42, %v5517_v19 }
 0x42f   :  { %v2958_v27 = vadd.f32 %v5572_v34, %v5520_v31 }
 0x431   :  { %v5573_v30 = vpop.f32.mrb[28].mxu1 }
 0x432   :  { %v5574_v47 = vpop.f32.mrb[29].mxu1 }
 0x433   :  { %v5575_v38 = vadd.f32 %v5574_v47, %v5573_v30  ;;  %v5576_v63 = vpop.f32.mrb[30].mxu1 }
 0x434   :  { %v5577_v13 = vpop.f32.mrb[31].mxu1 }
 0x435   :  { %v5578_v1 = vadd.f32 %v5577_v13, %v5576_v63  ;;  %v2963_v12 = vadd.f32 %v5575_v38, %v5523_v3  ;;  %v8302_v63 = vld [vmem:[%s8997_s7 + $0x20] sm:$0xff] }
 0x437   :  { %v2966_v46 = vadd.f32 %v5578_v1, %v5526_v33 }
 0x439   :  { %v5579_v0 = vpop.f32.mrb[32].mxu1 }
 0x43a   :  { %v5580_v36 = vpop.f32.mrb[33].mxu1 }
 0x43b   :  { %v5581_v51 = vadd.f32 %v5580_v36, %v5579_v0  ;;  %v5582_v55 = vpop.f32.mrb[34].mxu1  ;;  %v8310_v0 = vld [vmem:[%s8997_s7 + $0x30] sm:$0xff] }
 0x43c   :  { %v5583_v26 = vpop.f32.mrb[35].mxu1 }
 0x43d   :  { %v5584_v2 = vadd.f32 %v5583_v26, %v5582_v55  ;;  %v2971_v57 = vadd.f32 %v5581_v51, %v5529_v7  ;;  %v8315_v55 = vld [vmem:[%s8997_s7 + $0x28] sm:$0xff] }
 0x43f   :  { %v8242_v29 = vadd.f32 %v5584_v2, %v5532_v18 }
 0x441   :  { %v5585_v40 = vpop.f32.mrb[36].mxu1 }
 0x442   :  { %v5586_v48 = vpop.f32.mrb[37].mxu1 }
 0x443   :  { %v5587_v21 = vadd.f32 %v5586_v48, %v5585_v40  ;;  %v5588_v14 = vpop.f32.mrb[38].mxu1  ;;  %v8326_v48 = vld [vmem:[%s8997_s7 + $0x38] sm:$0xff] }
 0x444   :  { %v5589_v19 = vpop.f32.mrb[39].mxu1 }
 0x445   :  { %v5590_v60 = vadd.f32 %v5589_v19, %v5588_v14  ;;  %v2979_v52 = vadd.f32 %v5587_v21, %v5535_v56  ;;  %v6009_v56 = vld [vmem:[%s8993_s3 + $0x100] sm:$0xff]  }
 0x446   :  { %5908 = vmatprep.subr.bf16.mxu0 %v6009_v56 }
 0x447   :  { %v2982_v31 = vadd.f32 %v5590_v60, %v5538_v8  ;;  %5909 = vmatpush3.bf16.msra.mxu0 %v6009_v56 }
 0x448   :  { %5910 = vmatprep.subr.bf16.mxu0 %v6010_v32 }
 0x44b   :  { %5911 = vmatpush3.bf16.msra.mxu0 %v6010_v32 }
 0x44c   :  { %v5591_v50 = vpop.f32.mrb[40].mxu1  ;;  %5912 = vmatprep.subr.bf16.mxu0 %v6011_v17 }
 0x44d   :  { %v5592_v25 = vpop.f32.mrb[41].mxu1 }
 0x44e   :  { %v5593_v3 = vadd.f32 %v5592_v25, %v5591_v50  ;;  %v5594_v24 = vpop.f32.mrb[42].mxu1 }
 0x44f   :  { %v5595_v28 = vpop.f32.mrb[43].mxu1  ;;  %5913 = vmatpush3.bf16.msra.mxu0 %v6011_v17 }
 0x450   :  { %v5596_v33 = vadd.f32 %v5595_v28, %v5594_v24  ;;  %v8244_v10 = vadd.f32 %v5593_v3, %v5541_v6  ;;  %v6185_v6 = vmov 0   ;;  %v8340_v24 = vld [vmem:[%s8997_s7 + $0x40] sm:$0xff] }
 0x451   :  { %3258 = vst.msk [vmem:[#allocation5] sm:$0xff] %vm9056_vm9, %v6185_v6  ;;  %vm9063_vm9 = vmmov %vm9054_vm3 }
 0x452   :  { %v8246_v41 = vadd.f32 %v5596_v33, %v5544_v59  ;;  %3259 = vst.msk [vmem:[#allocation5 + $0x8] sm:$0xff] %vm9057_vm13, %v6185_v6  ;;  %v8268_v59 = vld [vmem:[%s8997_s7 + $0x10] sm:$0xff]  ;;  %vm9064_vm13 = vmmov %vm9054_vm3 }
 0x454   :  { %v5597_v7 = vpop.f32.mrb[44].mxu1 }
 0x455   :  { %v5598_v44 = vpop.f32.mrb[45].mxu1 }
 0x456   :  { %v5599_v54 = vadd.f32 %v5598_v44, %v5597_v7  ;;  %v5600_v18 = vpop.f32.mrb[46].mxu1 }
 0x457   :  { %v5601_v43 = vpop.f32.mrb[47].mxu1 }
 0x458   :  { %v2995_v11 = vadd.f32 %v5599_v54, %v5547_v4  ;;  %v8275_v4 = vld [vmem:[%s8997_s7 + $0x8] sm:$0xff]  ;;  %v8347_v54 = vld [vmem:[%s8997_s7 + $0x50] sm:$0x3] }
 0x459   :  { %v8352_v43 = vld [vmem:[%s8997_s7 + $0x48] sm:$0xff] }
 0x45c   :  { %v5898_v61 = vpop.f32.mrb[48].mxu1 }
 0x45d   :  { %v8254_v8 = vadd.f32 %v5898_v61, %v2963_v12  ;;  %v3034_v16 = vpop.f32.mrb[49].mxu1 }
 0x45e   :  { %v8263_v22 = vadd.f32 %v3034_v16, %v2955_v37  ;;  %v5899_v45 = vpop.f32.mrb[50].mxu1 }
 0x45f   :  { %v8270_v9 = vadd.f32 %v5899_v45, %v2966_v46  ;;  %v3037_v62 = vpop.f32.mrb[51].mxu1  ;;  %v3095_v42 = vmul.f32 %v8268_v59, %v8254_v8 }
 0x460   :  { %v3093_v20 = vmul.f32 %v8259_v5, %v8263_v22  ;;  %v8279_v23 = vadd.f32 %v3037_v62, %v2958_v27 }
 0x461   :  { %v3096_v34 = vmul.f32 %v8287_v35, %v8270_v9  ;;  %v3107_v13 = vsel %vm9060_vm14, %v3095_v42, 0.0  ;;  %vm9067_vm14 = vmmov %vm9054_vm3 }
 0x462   :  { %v3094_v49 = vmul.f32 %v8275_v4, %v8279_v23  ;;  %v3104_v53 = vsel %vm9058_vm11, %v3093_v20, 0.0  ;;  %vm9065_vm11 = vmmov %vm9054_vm3 }
 0x463   :  { %v3109_v26 = vsel %vm9061_vm15, %v3096_v34, 0.0  ;;  %vm9068_vm15 = vmmov %vm9054_vm3 }
 0x464   :  { %v3105_v37 = vsel %vm9059_vm8, %v3094_v49, 0.0  ;;  %v5902_v27 = vpop.f32.mrb[52].mxu1  ;;  %vm9066_vm8 = vmmov %vm9054_vm3  ;;  %v6015_v49 = vld [vmem:[%s8993_s3 + $0x118] sm:$0xff]  }
 0x465   :  { %v3106_v30 = vadd.f32 %v3105_v37, %v3104_v53  ;;  %v8297_v47 = vadd.f32 %v5902_v27, %v2979_v52  ;;  %v3050_v38 = vpop.f32.mrb[53].mxu1  ;;  %5914 = vmatprep.subr.bf16.mxu0 %v6015_v49 }
 0x466   :  { %v8305_v1 = vadd.f32 %v3050_v38, %v2971_v57  ;;  %v5903_v12 = vpop.f32.mrb[54].mxu1  ;;  %5915 = vmatpush3.bf16.msra.mxu0 %v6015_v49 }
 0x467   :  { %v3108_v46 = vadd.f32 %v3107_v13, %v3106_v30  ;;  %v3062_v36 = vadd.f32 %v5903_v12, %v2982_v31  ;;  %v3053_v51 = vpop.f32.mrb[55].mxu1  ;;  %v3099_v21 = vmul.f32 %v8310_v0, %v8297_v47 }
 0x468   :  { %v3097_v2 = vmul.f32 %v8302_v63, %v8305_v1  ;;  %v8321_v57 = vadd.f32 %v3053_v51, %v8242_v29 }
 0x469   :  { %v3110_v40 = vadd.f32 %v3109_v26, %v3108_v46  ;;  %v3100_v52 = vmul.f32 %v8326_v48, %v3062_v36  ;;  %v3115_v28 = vsel %vm9063_vm9, %v3099_v21, 0.0  ;;  %vm9070_vm9 = vmmov %vm9054_vm3 }
 0x46a   :  { %v3111_v14 = vsel %vm9054_vm3, %v3097_v2, 0.0  ;;  %v3098_v19 = vmul.f32 %v8315_v55, %v8321_v57 }
 0x46b   :  { %v3112_v60 = vadd.f32 %v3111_v14, %v3110_v40 }
 0x46c   :  { %v3113_v29 = vsel %vm9062_vm12, %v3098_v19, 0.0  ;;  %v5906_v31 = vpop.f32.mrb[56].mxu1  ;;  %v6029_v19 = vld [vmem:[%s8993_s3 + $0x40] sm:$0xff]   ;;  %vm9069_vm12 = vmmov %vm9054_vm3 }
 0x46d   :  { %v3114_v50 = vadd.f32 %v3113_v29, %v3112_v60  ;;  %v8335_v25 = vadd.f32 %v5906_v31, %v2995_v11  ;;  %v3066_v3 = vpop.f32.mrb[57].mxu1  ;;  %v3117_v11 = vsel %vm9064_vm13, %v3100_v52, 0.0  ;;  %v6030_v60 = vld [vmem:[%s8993_s3] sm:$0xff]   ;;  %5613 = vmatprep.subr.bf16.mxu1 %v6029_v19  ;;  %vm9071_vm13 = vmmov %vm9054_vm3 }
 0x46e   :  { %v3067_v33 = vadd.f32 %v3066_v3, %v8244_v10  ;;  %v5907_v7 = vpop.f32.mrb[58].mxu1  ;;  %5614 = vmatpush3.bf16.msra.mxu1 %v6030_v60 }
 0x46f   :  { %v3116_v44 = vadd.f32 %v3115_v28, %v3114_v50  ;;  %v3069_v18 = vpop.f32.mrb[59].mxu1  ;;  %v3103_v32 = vmul.f32 %v8347_v54, %v8335_v25  ;;  %v6032_v50 = vld [vmem:[%s8993_s3 + $0x8] sm:$0xff]  }
 0x470   :  { %v3101_v61 = vmul.f32 %v8340_v24, %v3067_v33  ;;  %v3070_v56 = vadd.f32 %v3069_v18, %v8246_v41 }
 0x471   :  { %v3118_v10 = vadd.f32 %v3117_v11, %v3116_v44  ;;  %v3123_v17 = vsel %vm9009_vm5, %v3103_v32, 0.0  ;;  %v6034_v11 = vld [vmem:[%s8993_s3 + $0x10] sm:$0xff]  }
 0x472   :  { %v3119_v16 = vsel %vm9065_vm11, %v3101_v61, 0.0  ;;  %v3102_v6 = vmul.f32 %v8352_v43, %v3070_v56  ;;  %vm9072_vm11 = vmmov %vm9054_vm3 }
 0x473   :  { %v3120_v45 = vadd.f32 %v3119_v16, %v3118_v10 }
 0x474   :  { %v3121_v62 = vsel %vm9066_vm8, %v3102_v6, 0.0  ;;  %vm9073_vm8 = vmmov %vm9054_vm3 }
 0x475   :  { %v3122_v20 = vadd.f32 %v3121_v62, %v3120_v45  ;;  %v6036_v62 = vld [vmem:[%s8993_s3 + $0x18] sm:$0xff]  }
 0x477   :  { %v3124_v42 = vadd.f32 %v3123_v17, %v3122_v20 }
 0x479   :  { %v3125_v41 = vrot.slane %v3124_v42, 4 }
 0x47b   :  { %v3126_v53 = vadd.f32 %v3125_v41, %v3124_v42 }
 0x47d   :  { %v3127_v34 = vrot.slane %v3126_v53, 2 }
 0x47f   :  { %v3128_v37 = vadd.f32 %v3127_v34, %v3126_v53  ;;  %v6038_v34 = vld [vmem:[%s8993_s3 + $0x20] sm:$0xff]  }
 0x481   :  { %v3129_v27 = vrot.slane %v3128_v37, 1 }
 0x483   :  { %v3130_v30 = vadd.f32 %v3129_v27, %v3128_v37 }
 0x485   :  { %v3131_v38 = vmul.f32 0.02, %v3130_v30 }
 0x487   :  { %v8367_v13 = vsub.f32 %v8263_v22, %v3131_v38  ;;  %v8370_v12 = vsub.f32 %v8279_v23, %v3131_v38  ;;  %v8373_v46 = vsub.f32 %v8254_v8, %v3131_v38  ;;  %v8376_v51 = vsub.f32 %v8270_v9, %v3131_v38 }
 0x488   :  { %v3136_v26 = vsub.f32 %v8305_v1, %v3131_v38  ;;  %v3137_v2 = vsub.f32 %v8321_v57, %v3131_v38  ;;  %v8381_v40 = vsub.f32 %v8297_v47, %v3131_v38  ;;  %v8383_v21 = vsub.f32 %v3062_v36, %v3131_v38 }
 0x489   :  { %v8385_v22 = vsub.f32 %v3067_v33, %v3131_v38  ;;  %v8387_v14 = vsub.f32 %v3070_v56, %v3131_v38  ;;  %v3142_v23 = vsub.f32 %v8335_v25, %v3131_v38  ;;  %v3143_v8 = vmul.f32 %v8367_v13, %v8259_v5  ;;  %v6031_v5 = vld [vmem:[%s8993_s3 + $0x48] sm:$0xff]  }
 0x48a   :  { %v3144_v9 = vmul.f32 %v8370_v12, %v8275_v4  ;;  %v3145_v1 = vmul.f32 %v8373_v46, %v8268_v59  ;;  %v3146_v47 = vmul.f32 %v8376_v51, %v8287_v35  ;;  %v3147_v4 = vmul.f32 %v3136_v26, %v8302_v63  ;;  %5615 = vmatprep.subr.bf16.mxu1 %v6031_v5  ;;  %v6033_v63 = vld [vmem:[%s8993_s3 + $0x50] sm:$0xff]  }
 0x48b   :  { %v3154_v36 = vmul.f32 %v3143_v8, %v3143_v8  ;;  %v3148_v35 = vmul.f32 %v3137_v2, %v8315_v55  ;;  %v3149_v3 = vmul.f32 %v8381_v40, %v8310_v0  ;;  %v3150_v7 = vmul.f32 %v8383_v21, %v8326_v48  ;;  %5616 = vmatpush3.bf16.msra.mxu1 %v6032_v50  ;;  %v6035_v0 = vld [vmem:[%s8993_s3 + $0x58] sm:$0xff]  }
 0x48c   :  { %v3155_v57 = vmul.f32 %v3144_v9, %v3144_v9  ;;  %v3156_v59 = vmul.f32 %v3145_v1, %v3145_v1  ;;  %v3157_v52 = vmul.f32 %v3146_v47, %v3146_v47  ;;  %v3158_v55 = vmul.f32 %v3147_v4, %v3147_v4  ;;  %5617 = vmatprep.subr.bf16.mxu1 %v6033_v63  ;;  %v5266_v4 = vld [vmem:[%s8995_s5 + $0x1] ss:$0 sm:$0xff] }
 0x48d   :  { %v3165_v29 = vsel %vm9067_vm14, %v3154_v36, 0.0  ;;  %v3159_v44 = vmul.f32 %v3148_v35, %v3148_v35  ;;  %v3151_v56 = vmul.f32 %v8385_v22, %v8340_v24  ;;  %v3160_v10 = vmul.f32 %v3149_v3, %v3149_v3  ;;  %v6037_v24 = vld [vmem:[%s8993_s3 + $0x60] sm:$0xff]   ;;  %vm9074_vm14 = vmmov %vm9054_vm3 }
 0x48e   :  { %v3166_v31 = vsel %vm9068_vm15, %v3155_v57, 0.0  ;;  %v3168_v28 = vsel %vm9054_vm3, %v3156_v59, 0.0  ;;  %v3170_v18 = vsel %vm9069_vm12, %v3157_v52, 0.0  ;;  %v3172_v48 = vsel %vm9070_vm9, %v3158_v55, 0.0  ;;  %vm9075_vm15 = vmmov %vm9054_vm3 }
 0x48f   :  { %v3167_v25 = vadd.f32 %v3166_v31, %v3165_v29  ;;  %v3152_v16 = vmul.f32 %v8387_v14, %v8352_v43  ;;  %v3161_v6 = vmul.f32 %v3150_v7, %v3150_v7  ;;  %v3174_v45 = vsel %vm9071_vm13, %v3159_v44, 0.0  ;;  %5618 = vmatpush3.bf16.msra.mxu1 %v6034_v11  ;;  %vm9076_vm12 = vmmov %vm9054_vm3 }
 0x490   :  { %5619 = vmatprep.subr.bf16.mxu1 %v6035_v0  ;;  %v3153_v17 = vmul.f32 %v3142_v23, %v8347_v54  ;;  %v3162_v42 = vmul.f32 %v3151_v56, %v3151_v56  ;;  %v3176_v49 = vsel %vm9072_vm11, %v3160_v10, 0.0  ;;  %vm9077_vm9 = vmmov %vm9054_vm3 }
 0x491   :  { %v3169_v33 = vadd.f32 %v3168_v28, %v3167_v25  ;;  %v3163_v41 = vmul.f32 %v3152_v16, %v3152_v16  ;;  %v3178_v53 = vsel %vm9073_vm8, %v3161_v6, 0.0  ;;  %v5267_v25 = vld [vmem:[%s8996_s6 + $0x1] ss:$0 sm:$0xff]  ;;  %vm9078_vm13 = vmmov %vm9054_vm3 }
 0x492   :  { %v3164_v27 = vmul.f32 %v3153_v17, %v3153_v17  ;;  %v3180_v30 = vsel %vm9074_vm14, %v3162_v42, 0.0  ;;  %vm9079_vm11 = vmmov %vm9054_vm3 }
 0x493   :  { %v3171_v61 = vadd.f32 %v3170_v18, %v3169_v33  ;;  %5620 = vmatpush3.bf16.msra.mxu1 %v6036_v62  ;;  %v3182_v54 = vsel %vm9075_vm15, %v3163_v41, 0.0  ;;  %vm9080_vm8 = vmmov %vm9054_vm3 }
 0x494   :  { %5621 = vmatprep.subr.bf16.mxu1 %v6037_v24  ;;  %v3184_v2 = vsel %vm9009_vm5, %v3164_v27, 0.0  ;;  %vm9081_vm14 = vmmov %vm9054_vm3  ;;  %vm3280_vm5 = vsmask.f32 3338 }
 0x495   :  { %v3173_v32 = vadd.f32 %v3172_v48, %v3171_v61  ;;  %vm9082_vm15 = vmmov %vm9054_vm3 }
 0x497   :  { %v3175_v20 = vadd.f32 %v3174_v45, %v3173_v32  ;;  %5622 = vmatpush3.bf16.msra.mxu1 %v6038_v34 }
 0x499   :  { %v3177_v43 = vadd.f32 %v3176_v49, %v3175_v20 }
 0x49b   :  { %v3179_v37 = vadd.f32 %v3178_v53, %v3177_v43 }
 0x49d   :  { %v3181_v38 = vadd.f32 %v3180_v30, %v3179_v37 }
 0x49f   :  { %v3183_v26 = vadd.f32 %v3182_v54, %v3181_v38 }
 0x4a1   :  { %v3185_v23 = vadd.f32 %v3184_v2, %v3183_v26 }
 0x4a3   :  { %v3186_v8 = vrot.slane %v3185_v23, 4 }
 0x4a5   :  { %v3187_v9 = vadd.f32 %v3186_v8, %v3185_v23 }
 0x4a7   :  { %v3188_v1 = vrot.slane %v3187_v9, 2 }
 0x4a9   :  { %v3189_v47 = vadd.f32 %v3188_v1, %v3187_v9 }
 0x4ab   :  { %v3190_v36 = vrot.slane %v3189_v47, 1 }
 0x4ad   :  { %v3191_v57 = vadd.f32 %v3190_v36, %v3189_v47 }
 0x4af   :  { %v3192_v19 = vmul.f32 0.02, %v3191_v57 }
 0x4b1   :  { %v3193_v60 = vadd.f32 1e-05, %v3192_v19 }
 0x4b3   :  { %6150 = vrsqrt.f32 %v3193_v60 }
 0x4bd   :  { %v6151_v5 = vpop.eup %6150 }
 0x4be   :  { %v3195_v59 = vmul.f32 %v6151_v5, %v8367_v13  ;;  %v3196_v35 = vmul.f32 %v6151_v5, %v8370_v12  ;;  %v3197_v52 = vmul.f32 %v6151_v5, %v8373_v46  ;;  %v3198_v29 = vmul.f32 %v6151_v5, %v8376_v51 }
 0x4bf   :  { %v3201_v31 = vmul.f32 %v6151_v5, %v8381_v40  ;;  %v3202_v50 = vmul.f32 %v6151_v5, %v8383_v21  ;;  %v3203_v63 = vmul.f32 %v6151_v5, %v8385_v22  ;;  %v3204_v3 = vmul.f32 %v6151_v5, %v8387_v14 }
 0x4c0   :  { %v3210_v55 = vmul.f32 %v5266_v4, %v3195_v59  ;;  %v3211_v13 = vmul.f32 %v5266_v4, %v3196_v35  ;;  %v3212_v28 = vmul.f32 %v5266_v4, %v3197_v52  ;;  %v3213_v12 = vmul.f32 %v5266_v4, %v3198_v29 }
 0x4c1   :  { %v3216_v33 = vmul.f32 %v5266_v4, %v3201_v31  ;;  %v3217_v46 = vmul.f32 %v5266_v4, %v3202_v50  ;;  %v3218_v7 = vmul.f32 %v5266_v4, %v3203_v63  ;;  %v3219_v51 = vmul.f32 %v5266_v4, %v3204_v3  ;;  %v3282_v3 = vld [vmem:[#allocation5] sm:$0xc]  ;;  %v6102_v63 = vld [vmem:[%s8994_s4 + $0xc8] sm:$0xff]  }
 0x4c2   :  { %v3225_v44 = vadd.f32 %v5267_v25, %v3210_v55  ;;  %v3226_v40 = vadd.f32 %v5267_v25, %v3211_v13  ;;  %v3227_v18 = vadd.f32 %v5267_v25, %v3212_v28  ;;  %v3228_v21 = vadd.f32 %v5267_v25, %v3213_v12 }
 0x4c3   :  { %v3231_v11 = vadd.f32 %v5267_v25, %v3216_v33  ;;  %v3232_v61 = vadd.f32 %v5267_v25, %v3217_v46  ;;  %v3233_v0 = vadd.f32 %v5267_v25, %v3218_v7  ;;  %v3234_v56 = vadd.f32 %v5267_v25, %v3219_v51  ;;  %v6104_v51 = vld [vmem:[%s8994_s4 + $0x88] sm:$0xff]  }
 0x4c4   :  { %v3236_v10 = vmax.f32 %v3225_v44, 0.0  ;;  %v3237_v22 = vmax.f32 %v3226_v40, 0.0  ;;  %v3238_v48 = vmax.f32 %v3227_v18, 0.0  ;;  %v3239_v14 = vmax.f32 %v3228_v21, 0.0  ;;  %v3357_v40 = vld [vmem:[#allocation5 + $0x8] sm:$0x30] }
 0x4c5   :  { %v3242_v32 = vmax.f32 %v3231_v11, 0.0  ;;  %v3243_v16 = vmax.f32 %v3232_v61, 0.0  ;;  %v3244_v6 = vmax.f32 %v3233_v0, 0.0  ;;  %v3245_v45 = vmax.f32 %v3234_v56, 0.0 }
 0x4c6   :  { %3247 = vst.msk [vmem:[#allocation4] sm:$0xff] %vm9054_vm3, %v3236_v10  ;;  %vm3306_vm3 = vcmask 521220   ;;  %v3309_v10 = vld [vmem:[#allocation5] sm:$0x30] }
 0x4c7   :  { %3248 = vst.msk [vmem:[#allocation4 + $0x8] sm:$0xff] %vm9076_vm12, %v3237_v22  ;;  %vm3307_vm12 = vsmask.f32 5394 }
 0x4c8   :  { %3249 = vst.msk [vmem:[#allocation4 + $0x10] sm:$0xff] %vm9077_vm9, %v3238_v48  ;;  %vm8474_vm9 = vmand %vm1215_vm4, %vm3280_vm5  ;;  %vm3464_vm5 = vcmask 1041408   ;;  %vm3465_vm4 = vcmask 1045508  }
 0x4c9   :  { %3250 = vst.msk [vmem:[#allocation4 + $0x18] sm:$0xff] %vm9078_vm13, %v3239_v14  ;;  %vm8480_vm13 = vmand %vm3306_vm3, %vm3307_vm12 }
 0x4ca   :  { %3253 = vst.msk [vmem:[#allocation4 + $0x30] sm:$0xff] %vm9079_vm11, %v3242_v32  ;;  %vm8532_vm11 = vmor %vm3464_vm5, %vm3465_vm4  ;;  %vm9092_vm5 = vcmask 523264  }
 0x4cb   :  { %3254 = vst.msk [vmem:[#allocation4 + $0x38] sm:$0xff] %vm9080_vm8, %v3243_v16  ;;  %v3333_v16 = vld [vmem:[#allocation5 + $0x8] sm:$0xc]  ;;  %vm9089_vm8 = vcmask 518144   ;;  %vm9093_vm4 = vmmov %vm9092_vm5 }
 0x4cc   :  { %3255 = vst.msk [vmem:[#allocation4 + $0x40] sm:$0xff] %vm9081_vm14, %v3244_v6  ;;  %vm9090_vm14 = vmmov %vm9089_vm8 }
 0x4cd   :  { %3256 = vst.msk [vmem:[#allocation4 + $0x48] sm:$0xff] %vm9082_vm15, %v3245_v45  ;;  %v3260_v62 = vld [vmem:[#allocation4] ss:$2 sm:$0x3]  ;;  %vm3501_vm15 = vsmask.f32 5392  ;;  %vm9091_vm12 = vmmov %vm9089_vm8 }
 0x4ce   :  { %v3262_v20 = vld [vmem:[#allocation4 + $0x1] ss:$2 sm:$0x3]  ;;  %v3264_v24 = vld [vmem:[#allocation4 + $0x7] ss:$2 sm:$0x3] }
 0x4cf   :  { %v3266_v17 = vld [vmem:[#allocation4 + $0x8] ss:$2 sm:$0x3]  ;;  %v3267_v42 = vmax.f32 %v3260_v62, %v3262_v20  ;;  %v3286_v38 = vld [vmem:[#allocation4 + $0xe] ss:$2 sm:$0x3] }
 0x4d0   :  { %v3268_v41 = vmax.f32 %v3264_v24, %v3266_v17  ;;  %v3288_v54 = vld [vmem:[#allocation4 + $0xf] ss:$2 sm:$0x3]  ;;  %v3290_v26 = vld [vmem:[#allocation4 + $0x15] ss:$2 sm:$0x3] }
 0x4d1   :  { %v3292_v2 = vld [vmem:[#allocation4 + $0x16] ss:$2 sm:$0x3]  ;;  %v3293_v23 = vmax.f32 %v3286_v38, %v3288_v54  ;;  %v3313_v47 = vld [vmem:[#allocation4 + $0x31] ss:$2 sm:$0x3] }
 0x4d2   :  { %v3269_v30 = vmax.f32 %v3267_v42, %v3268_v41  ;;  %v3294_v1 = vmax.f32 %v3290_v26, %v3292_v2  ;;  %v3315_v36 = vld [vmem:[#allocation4 + $0x32] ss:$2 sm:$0x3]  ;;  %v3317_v57 = vld [vmem:[#allocation4 + $0x38] ss:$2 sm:$0x3] }
 0x4d3   :  { %v3337_v49 = vld [vmem:[#allocation4 + $0x3f] ss:$2 sm:$0x3]  ;;  %v3339_v43 = vld [vmem:[#allocation4 + $0x40] ss:$2 sm:$0x3]  ;;  %v3320_v60 = vmax.f32 %v3313_v47, %v3315_v36 }
 0x4d4   :  { %v3341_v53 = vld [vmem:[#allocation4 + $0x46] ss:$2 sm:$0x3]  ;;  %v3343_v34 = vld [vmem:[#allocation4 + $0x47] ss:$2 sm:$0x3]  ;;  %v3344_v37 = vmax.f32 %v3337_v49, %v3339_v43  ;;  %v3270_v9 = vpack.c.bf16 %v3269_v30, %v3269_v30  ;;  %v3295_v35 = vmax.f32 %v3293_v23, %v3294_v1 }
 0x4d5   :  { %v3345_v27 = vmax.f32 %v3341_v53, %v3343_v34  ;;  %v3319_v19 = vld [vmem:[#allocation4 + $0x39] ss:$2 sm:$0x3]  ;;  %v6039_v20 = vld [vmem:[%s8993_s3 + $0x68] sm:$0xff]   ;;  %v6013_v53 = vld [vmem:[#allocation5 + $0x8] ss:$0 sps:$4 sm:$0xff]  }
 0x4d6   :  { %v3272_v4 = vshrl.u32 %v3270_v9, 16  ;;  %v3275_v59 = vshll.u32 %v3270_v9, 16  ;;  %v3321_v52 = vmax.f32 %v3317_v57, %v3319_v19  ;;  %v3296_v55 = vpack.c.bf16 %v3295_v35, %v3295_v35  ;;  %v6040_v24 = vld [vmem:[%s8993_s3 + $0x28] sm:$0xff]   ;;  %5623 = vmatprep.subr.bf16.mxu1 %v6039_v20  ;;  %v6043_v2 = vld [vmem:[%s8993_s3 + $0x70] sm:$0xff]  }
 0x4d7   :  { %v3346_v8 = vmax.f32 %v3344_v37, %v3345_v27  ;;  %5624 = vmatpush3.bf16.msra.mxu1 %v6040_v24  ;;  %v3406_v23 = vshll.u32 %v6013_v53, 16  ;;  %v6044_v36 = vld [vmem:[%s8993_s3 + $0x30] sm:$0xff]  }
 0x4d8   :  { %v3274_v50 = vrot.slane %v3272_v4, 5  ;;  %v3277_v25 = vrot.slane %v3275_v59, 6  ;;  %v3322_v13 = vmax.f32 %v3320_v60, %v3321_v52  ;;  %v3298_v46 = vshrl.u32 %v3296_v55, 16  ;;  %5625 = vmatprep.subr.bf16.mxu1 %v6043_v2 }
 0x4d9   :  { %v3347_v5 = vpack.c.bf16 %v3346_v8, %v3346_v8  ;;  %v3301_v7 = vshll.u32 %v3296_v55, 16  ;;  %v8514_v4 = vrot.slane %v3406_v23, 5 }
 0x4da   :  { %v3278_v33 = vor.u32 %v3277_v25, %v3274_v50  ;;  %v3323_v44 = vpack.c.bf16 %v3322_v13, %v3322_v13  ;;  %v3300_v11 = vrot.slane %v3298_v46, 3  ;;  %v6046_v13 = vld [vmem:[%s8993_s3 + $0x78] sm:$0xff]  }
 0x4db   :  { %v3349_v29 = vshrl.u32 %v3347_v5, 16  ;;  %v3352_v31 = vshll.u32 %v3347_v5, 16  ;;  %v3303_v61 = vrot.slane %v3301_v7, 4  ;;  %5626 = vmatpush3.bf16.msra.mxu1 %v6044_v36 }
 0x4dc   :  { %v3283_v18 = vsel %vm8474_vm9, %v3278_v33, %v3282_v3  ;;  %v3325_v0 = vshrl.u32 %v3323_v44, 16  ;;  %v3328_v56 = vshll.u32 %v3323_v44, 16  ;;  %5627 = vmatprep.subr.bf16.mxu1 %v6046_v13 }
 0x4dd   :  { %v3351_v28 = vrot.slane %v3349_v29, 3  ;;  %v3354_v12 = vrot.slane %v3352_v31, 4  ;;  %3284 = vst [vmem:[#allocation5] sm:$0xc] %v3283_v18  ;;  %v3304_v48 = vor.u32 %v3303_v61, %v3300_v11 }
 0x4de   :  { %v3327_v14 = vrot.slane %v3325_v0, 5  ;;  %v3330_v32 = vrot.slane %v3328_v56, 6  ;;  %v6045_v11 = vld [vmem:[#allocation5 + $0x8] ss:$0 sps:$4 sm:$0x77]  }
 0x4df   :  { %v3355_v21 = vor.u32 %v3354_v12, %v3351_v28  ;;  %v3310_v6 = vsel %vm8480_vm13, %v3304_v48, %v3309_v10  ;;  %v6047_v28 = vld [vmem:[%s8993_s3 + $0x38] sm:$0xff]   ;;  %3375 = vst.msk [vmem:[#allocation6 + $0x28] sm:$0x7] %vm9089_vm8, %v6045_v11  ;;  %vm8616_vm8 = vmor %vm1245_vm0, %vm3501_vm15  ;;  %vm3426_vm15 = vcmask 1042944  }
 0x4e0   :  { %v3331_v45 = vor.u32 %v3330_v32, %v3327_v14  ;;  %3311 = vst [vmem:[#allocation5] sm:$0x30] %v3310_v6  ;;  %5628 = vmatpush3.bf16.msra.mxu1 %v6047_v28  ;;  %v6052_v6 = vld [vmem:[%s8993_s3 + $0xc0] sm:$0xff]   ;;  %vm9097_vm0 = vmmov %vm9091_vm12 }
 0x4e1   :  { %v3358_v22 = vsel %vm8480_vm13, %v3355_v21, %v3357_v40  ;;  %v3410_v40 = vshrl.u32 %v6013_v53, 16  ;;  %v6042_v53 = vld [vmem:[#allocation5 + $0x8] ss:$0 sps:$4 sm:$0xff]   ;;  %5641 = vmatprep.subr.bf16.mxu1 %v6052_v6 }
 0x4e2   :  { %3359 = vst [vmem:[#allocation5 + $0x8] sm:$0x30] %v3358_v22  ;;  %v3334_v62 = vsel %vm8474_vm9, %v3331_v45, %v3333_v16 }
 0x4e3   :  { %3335 = vst [vmem:[#allocation5 + $0x8] sm:$0xc] %v3334_v62  ;;  %v3412_v32 = vrot.slane %v3410_v40, 4 }
 0x4e7   :  { %v3376_v17 = vld [vmem:[#allocation5] sm:$0xff] }
 0x4e8   :  { %v3452_v42 = vld [vmem:[#allocation5] sm:$0xfc]  ;;  %v5272_v49 = vcombine.high %v3376_v17, %v3376_v17  ;;  %v5271_v43 = vcombine.low %v3376_v17, %v3376_v17 }
 0x4e9   :  { %v5279_v41 = vcombine.high %v3452_v42, %v3452_v42  ;;  %v5278_v37 = vcombine.low %v3452_v42, %v3452_v42  ;;  %v6019_v27 = vld [vmem:[#allocation5 + $0x4] ss:$0 sps:$4 sm:$0xee]  }
 0x4ea   :  { %v8498_v34 = vld [vmem:[#allocation5 + $0x8] sm:$0x1f]  ;;  %v3396_v30 = vshll.u32 %v5272_v49, 16  ;;  %v3400_v38 = vshrl.u32 %v5272_v49, 16  ;;  %v3387_v54 = vshrl.u32 %v5271_v43, 16  ;;  %v3390_v26 = vshll.u32 %v5271_v43, 16 }
 0x4eb   :  { %3374 = vst.msk [vmem:[#allocation6 + $0x14] sm:$0xf] %vm1122_vm6, %v5272_v49  ;;  %3373 = vst.msk [vmem:[#allocation6] sm:$0xf] %vm1122_vm6, %v5271_v43  ;;  %v5280_v8 = vcombine.low %v8498_v34, %v8498_v34  ;;  %v8507_v9 = vrot.slane %v5279_v41, 6  ;;  %v3649_v1 = vld [vmem:[#allocation5 + $0x8] sm:$0xff]  ;;  %v5281_v14 = vcombine.high %v8498_v34, %v8498_v34  ;;  %v3413_v49 = vor.u32 %v3412_v32, %v8514_v4 }
 0x4ec   :  { %v8509_v47 = vld [vmem:[#allocation5] sm:$0xf8]  ;;  %v3398_v57 = vrot.slane %v3396_v30, 5  ;;  %v3402_v19 = vrot.slane %v3400_v38, 4  ;;  %v3389_v60 = vrot.slane %v3387_v54, 4  ;;  %v3392_v5 = vrot.slane %v3390_v26, 5 }
 0x4ed   :  { %v3471_v59 = vrot.slane %v8507_v9, 4  ;;  %v5282_v35 = vrot.slane %v5278_v37, 10  ;;  %v5299_v31 = vcombine.low %v3649_v1, %v3649_v1  ;;  %v8517_v50 = vcombine.high %v3649_v1, %v3649_v1  ;;  %v6027_v21 = vld [vmem:[#allocation5 + $0x4] ss:$0 sps:$4 sm:$0xff]   ;;  %v8545_v22 = vld [vmem:[#allocation5 + $0x8] sm:$0x3f] }
 0x4ee   :  { %v3403_v52 = vor.u32 %v3402_v19, %v3398_v57  ;;  %v3393_v29 = vor.u32 %v3392_v5, %v3389_v60  ;;  %v8519_v25 = vrot.slane %v5280_v8, 6  ;;  %v5301_v3 = vrot.slane %v6019_v27, 9  ;;  %v6054_v17 = vld [vmem:[#allocation5 + $0x4] ss:$0 sps:$4 sm:$0xff]  }
 0x4ef   :  { %v5288_v55 = vcombine.high %v8509_v47, %v8509_v47  ;;  %v3660_v46 = vrot.slane %v5299_v31, 5  ;;  %v3663_v7 = vrot.slane %v8517_v50, 5  ;;  %v5287_v18 = vcombine.low %v8509_v47, %v8509_v47  ;;  %v3428_v38 = vld [vmem:[#allocation5] sm:$0xfe]  ;;  %3594 = vst.msk [vmem:[#allocation6 + $0xc] sm:$0xf] %vm1122_vm6, %v6054_v17 }
 0x4f0   :  { %v3404_v12 = vrot.slane %v3403_v52, 4  ;;  %v3394_v33 = vrot.slane %v3393_v29, 4  ;;  %v3473_v45 = vsel %vm8532_vm11, %v3471_v59, %v8519_v25  ;;  %v3470_v62 = vsel %vm8532_vm11, %v5282_v35, %v8507_v9  ;;  %v3489_v5 = vld [vmem:[#allocation5] sm:$0xfc] }
 0x4f1   :  { %v3661_v56 = vsel %vm7987_vm2, %v5301_v3, %v3660_v46  ;;  %v3662_v10 = vrot.slane %v3660_v46, 4  ;;  %v3665_v48 = vrot.slane %v3663_v7, 4  ;;  %v8552_v16 = vrot.slane %v5288_v55, 7  ;;  %v3582_v55 = vld [vmem:[#allocation5 + $0x8] sm:$0x7f] }
 0x4f2   :  { %v3409_v61 = vsel %vm7544_vm10, %v3404_v12, %v8514_v4  ;;  %v3399_v0 = vsel %vm7544_vm10, %v3394_v33, %v3398_v57  ;;  %3669 = vst.msk [vmem:[#allocation6 + $0x10] sm:$0xf] %vm1122_vm6, %v3661_v56  ;;  %v3617_v24 = vshll.u32 %v5299_v31, 16  ;;  %v3474_v42 = vrot.slane %v8519_v25, 4  ;;  %v3490_v4 = vld [vmem:[#allocation5 + $0x8] sm:$0x3f] }
 0x4f3   :  { %3417 = vrot.lane.b32.xlu1 %v3409_v61, %s6184_s27  ;;  %3415 = vrot.lane.b32.xlu0 %v3399_v0, %s6184_s27  ;;  %v3664_v20 = vsel %vm7987_vm2, %v3662_v10, %v3663_v7  ;;  %3671 = vst.msk [vmem:[#allocation6 + $0x38] sm:$0x7] %vm9090_vm14, %v3665_v48  ;;  %v3621_v43 = vshrl.u32 %v5299_v31, 16  ;;  %v3608_v41 = vshrl.u32 %v6027_v21, 16  ;;  %v5289_v34 = vcombine.low %v8545_v22, %v8545_v22  ;;  %vm9096_vm14 = vmmov %vm9091_vm12 }
 0x4f4   :  { %3670 = vst.msk [vmem:[#allocation6 + $0x24] sm:$0xf] %vm1122_vm6, %v3664_v20  ;;  %v8572_v37 = vrot.slane %v3617_v24, 5  ;;  %v3627_v27 = vshll.u32 %v8517_v50, 16  ;;  %v3611_v30 = vshll.u32 %v6027_v21, 16  ;;  %v3475_v54 = vrot.slane %v5281_v14, 6 }
 0x4f5   :  { %v3563_v26 = vrot.slane %v8552_v16, 4  ;;  %v3623_v2 = vrot.slane %v3621_v43, 4  ;;  %v3610_v23 = vrot.slane %v3608_v41, 4  ;;  %v3414_v8 = vrot.slane %v3413_v49, 4 }
 0x4f6   :  { %v5291_v9 = vrot.slane %v5287_v18, 11  ;;  %v3613_v1 = vrot.slane %v3611_v30, 5  ;;  %v3631_v47 = vshrl.u32 %v8517_v50, 16  ;;  %v5275_v57 = vcombine.high %v3428_v38, %v3428_v38 }
 0x4f7   :  { %3479 = vrot.lane.b32.xlu1 %v3473_v45, %s6184_s27  ;;  %3477 = vrot.lane.b32.xlu0 %v3470_v62, %s6184_s27  ;;  %v3624_v36 = vor.u32 %v3623_v2, %v8572_v37  ;;  %v3443_v19 = vrot.slane %v6042_v53, 5  ;;  %v5274_v60 = vcombine.low %v3428_v38, %v3428_v38  ;;  %v3476_v59 = vsel %vm8532_vm11, %v3474_v42, %v3475_v54 }
 0x4f8   :  { %v8583_v35 = vrot.slane %v5289_v34, 7  ;;  %v3629_v52 = vrot.slane %v3627_v27, 5  ;;  %v3633_v29 = vrot.slane %v3631_v47, 4  ;;  %v3614_v31 = vor.u32 %v3613_v1, %v3610_v23 }
 0x4f9   :  { %v3440_v50 = vrot.slane %v5275_v57, 5  ;;  %v5277_v25 = vrot.slane %v5274_v60, 9  ;;  %v3445_v3 = vrot.slane %v3443_v19, 4  ;;  %v3562_v12 = vsel %vm8066_vm7, %v5291_v9, %v8552_v16 }
 0x4fa   :  { %v3565_v28 = vsel %vm8066_vm7, %v3563_v26, %v8583_v35  ;;  %v5284_v33 = vcombine.high %v3489_v5, %v3489_v5  ;;  %v5285_v46 = vcombine.low %v3490_v4, %v3490_v4  ;;  %v6023_v7 = vld [vmem:[#allocation6 + $0x38] ss:$0 sps:$4 sm:$0x77]   ;;  %v3625_v40 = vrot.slane %v3624_v36, 4 }
 0x4fb   :  { %3481 = vrot.lane.b32.xlu1 %v3476_v59, %s6184_s27  ;;  %3419 = vrot.lane.b32.xlu0 %v3414_v8, %s6184_s27  ;;  %v6022_v13 = vld [vmem:[#allocation6 + $0x10] ss:$20 sps:$4 sm:$0xff]   ;;  %v5290_v18 = vcombine.high %v8545_v22, %v8545_v22  ;;  %v3442_v21 = vrot.slane %v3440_v50, 4  ;;  %v3441_v11 = vsel %vm7987_vm2, %v5277_v25, %v3440_v50  ;;  %3451 = vst.msk [vmem:[#allocation6 + $0x2c] sm:$0x7] %vm9091_vm12, %v3445_v3  ;;  %v3615_v48 = vrot.slane %v3614_v31, 4  ;;  %vm9098_vm12 = vmmov %vm9093_vm4 }
 0x4fc   :  { %5916 = vmatprep.mubr.msk.bf16.mxu0 %vm9092_vm5, %v6022_v13  ;;  %v3634_v61 = vor.u32 %v3633_v29, %v3629_v52  ;;  %3449 = vst.msk [vmem:[#allocation6 + $0x4] sm:$0xf] %vm1122_vm6, %v3441_v11  ;;  %v3513_v0 = vshrl.u32 %v5284_v33, 16  ;;  %v3516_v56 = vshll.u32 %v5284_v33, 16  ;;  %v3523_v10 = vshrl.u32 %v5285_v46, 16  ;;  %v6055_v3 = vld [vmem:[%s8993_s3 + $0x80] sm:$0xff]   ;;  %vm9099_vm5 = vmmov %vm9093_vm4 }
 0x4fd   :  { %5917 = vmatmul.mubr.msk.bf16.vlgmr.msra.gmra.mrb[100].mxu0 %vm9093_vm4, %v6023_v7  ;;  %v3444_v22 = vsel %vm7987_vm2, %v3442_v21, %v3443_v19  ;;  %v3526_v14 = vshll.u32 %v5285_v46, 16  ;;  %v5283_v32 = vcombine.low %v3489_v5, %v3489_v5  ;;  %v5293_v62 = vcombine.low %v3582_v55, %v3582_v55  ;;  %v6057_v7 = vld [vmem:[%s8993_s3 + $0xc8] sm:$0xff]  }
 0x4fe   :  { %3450 = vst.msk [vmem:[#allocation6 + $0x18] sm:$0xf] %vm1122_vm6, %v3444_v22  ;;  %v3515_v16 = vrot.slane %v3513_v0, 6  ;;  %v3518_v6 = vrot.slane %v3516_v56, 7  ;;  %v3525_v45 = vrot.slane %v3523_v10, 6  ;;  %v5294_v42 = vcombine.high %v3582_v55, %v3582_v55  ;;  %v6058_v21 = vld [vmem:[%s8993_s3 + $0x88] sm:$0xff]  }
 0x4ff   :  { %3571 = vrot.lane.b32.xlu1 %v3565_v28, %s6184_s27  ;;  %3569 = vrot.lane.b32.xlu0 %v3562_v12, %s6184_s27  ;;  %v3528_v20 = vrot.slane %v3526_v14, 7  ;;  %v3504_v24 = vshrl.u32 %v5283_v32, 16  ;;  %v3507_v17 = vshll.u32 %v5283_v32, 16  ;;  %v3630_v49 = vsel %vm7544_vm10, %v3625_v40, %v3629_v52  ;;  %3595 = vst.msk [vmem:[#allocation6 + $0x20] sm:$0xf] %vm1122_vm6, %v5293_v62  ;;  %v6059_v0 = vld [vmem:[%s8993_s3 + $0xd0] sm:$0xff]  }
 0x500   :  { %v3566_v43 = vrot.slane %v8583_v35, 4  ;;  %v3519_v41 = vor.u32 %v3518_v6, %v3515_v16  ;;  %v5286_v53 = vcombine.high %v3490_v4, %v3490_v4  ;;  %v3620_v34 = vsel %vm7544_vm10, %v3615_v48, %v8572_v37  ;;  %3596 = vst.msk [vmem:[#allocation6 + $0x34] sm:$0x7] %vm9096_vm14, %v5294_v42  ;;  %v6060_v10 = vld [vmem:[%s8993_s3 + $0x90] sm:$0xff]   ;;  %v6061_v14 = vld [vmem:[%s8993_s3 + $0xd8] sm:$0xff]   ;;  %v6065_v6 = vld [vmem:[%s8993_s3 + $0xe0] sm:$0xff]  }
 0x501   :  { %v3529_v30 = vor.u32 %v3528_v20, %v3525_v45  ;;  %v3506_v38 = vrot.slane %v3504_v24, 6  ;;  %v3509_v54 = vrot.slane %v3507_v17, 7  ;;  %v3635_v8 = vrot.slane %v3634_v61, 4  ;;  %v6064_v32 = vld [vmem:[%s8993_s3 + $0x98] sm:$0xff]   ;;  %v6066_v45 = vld [vmem:[%s8993_s3 + $0xa0] sm:$0xff]   ;;  %v6067_v62 = vld [vmem:[%s8993_s3 + $0xe8] sm:$0xff]  }
 0x502   :  { %v3521_v26 = vrot.slane %v3519_v41, 4  ;;  %v3533_v2 = vshrl.u32 %v5286_v53, 16  ;;  %v3536_v23 = vshll.u32 %v5286_v53, 16  ;;  %v3567_v9 = vrot.slane %v5290_v18, 7  ;;  %v6068_v20 = vld [vmem:[%s8993_s3 + $0xa8] sm:$0xff]   ;;  %v6069_v24 = vld [vmem:[%s8993_s3 + $0xf0] sm:$0xff]   ;;  %vm9100_vm14 = vmmov %vm9099_vm5 }
 0x503   :  { %3638 = vrot.lane.b32.xlu1 %v3630_v49, %s6184_s27  ;;  %3636 = vrot.lane.b32.xlu0 %v3620_v34, %s6184_s27  ;;  %v3510_v1 = vor.u32 %v3509_v54, %v3506_v38  ;;  %v3531_v47 = vrot.slane %v3529_v30, 4  ;;  %v6070_v17 = vld [vmem:[%s8993_s3 + $0xb0] sm:$0xff]   ;;  %v6071_v42 = vld [vmem:[%s8993_s3 + $0xf8] sm:$0xff]   ;;  %vm4172_vm4 = vcmask 521216  }
 0x504   :  { %v3530_v37 = vsel %vm8616_vm8, %v3521_v26, %v3529_v30  ;;  %v3535_v36 = vrot.slane %v3533_v2, 6  ;;  %v3538_v57 = vrot.slane %v3536_v23, 7  ;;  %v3568_v19 = vsel %vm8066_vm7, %v3566_v43, %v3567_v9  ;;  %v6072_v49 = vld [vmem:[%s8993_s3 + $0xb8] sm:$0xff]  }
 0x505   :  { %3545 = vst.msk [vmem:[#allocation6 + $0x1c] sm:$0xf] %vm1122_vm6, %v3530_v37  ;;  %v3511_v60 = vrot.slane %v3510_v1, 4 }
 0x506   :  { %v3539_v5 = vor.u32 %v3538_v57, %v3535_v36 }
 0x507   :  { %3640 = vrot.lane.b32.xlu1 %v3635_v8, %s6184_s27  ;;  %3573 = vrot.lane.b32.xlu0 %v3568_v19, %s6184_s27  ;;  %v3520_v4 = vsel %vm8616_vm8, %v3511_v60, %v3519_v41 }
 0x508   :  { %3544 = vst.msk [vmem:[#allocation6 + $0x8] sm:$0xf] %vm1122_vm6, %v3520_v4  ;;  %v3540_v59 = vsel %vm8616_vm8, %v3531_v47, %v3539_v5  ;;  %v6090_v5 = vld [vmem:[%s8994_s4 + $0x40] sm:$0xff]  }
 0x509   :  { %3546 = vst.msk [vmem:[#allocation6 + $0x30] sm:$0x7] %vm9097_vm0, %v3540_v59  ;;  %v6091_v4 = vld [vmem:[%s8994_s4] sm:$0xff]   ;;  %v6092_v59 = vld [vmem:[%s8994_s4 + $0x48] sm:$0xff]   ;;  %vm9101_vm0 = vmmov %vm9099_vm5 }
 0x565   :  { %v3418_v35 = vpop.permute.xlu1 %3417  ;;  %v3416_v52 = vpop.permute.xlu0 %3415 }
 0x566   :  { %3425 = vst.msk [vmem:[#allocation6 + $0x14] sm:$0xf] %vm1668_vm1, %v3418_v35  ;;  %3424 = vst.msk [vmem:[#allocation6] sm:$0xf] %vm1668_vm1, %v3416_v52  ;;  %v6096_v35 = vld [vmem:[%s8994_s4 + $0xc0] sm:$0xff]  }
 0x567   :  { %v6097_v52 = vld [vmem:[%s8994_s4 + $0x80] sm:$0xff]   ;;  %5703 = vmatprep.subr.bf16.mxu0 %v6096_v35 }
 0x568   :  { %5704 = vmatpush3.bf16.msra.mxu0 %v6097_v52 }
 0x569   :  { %v3480_v29 = vpop.permute.xlu1 %3479  ;;  %v3478_v31 = vpop.permute.xlu0 %3477  ;;  %5705 = vmatprep.subr.bf16.mxu0 %v6102_v63 }
 0x56a   :  { %3487 = vst.msk [vmem:[#allocation6 + $0x18] sm:$0xf] %vm1668_vm1, %v3480_v29  ;;  %3486 = vst.msk [vmem:[#allocation6 + $0x4] sm:$0xf] %vm1668_vm1, %v3478_v31  ;;  %v6093_v31 = vld [vmem:[%s8994_s4 + $0x8] sm:$0xff]  }
 0x56c   :  { %5706 = vmatpush3.bf16.msra.mxu0 %v6104_v51 }
 0x56d   :  { %v3482_v50 = vpop.permute.xlu1 %3481  ;;  %v3420_v25 = vpop.permute.xlu0 %3419 }
 0x56e   :  { %3488 = vst.msk [vmem:[#allocation6 + $0x2c] sm:$0x7] %vm3426_vm15, %v3482_v50  ;;  %3427 = vst.msk [vmem:[#allocation6 + $0x28] sm:$0x7] %vm3426_vm15, %v3420_v25  ;;  %v6094_v25 = vld [vmem:[%s8994_s4 + $0x50] sm:$0xff]  }
 0x571   :  { %v3572_v55 = vpop.permute.xlu1 %3571  ;;  %v3672_v13 = vld [vmem:[#allocation6] sm:$0xff]  ;;  %v3675_v28 = vld [vmem:[#allocation6 + $0x14] sm:$0xff]  ;;  %v3570_v33 = vpop.permute.xlu0 %3569 }
 0x572   :  { %v6050_v12 = vld [vmem:[#allocation6 + $0x4] ss:$20 sps:$4 sm:$0xff]   ;;  %3579 = vst.msk [vmem:[#allocation6 + $0x1c] sm:$0xf] %vm1668_vm1, %v3572_v55  ;;  %v5302_v46 = vcombine.low %v3672_v13, %v3675_v28  ;;  %3578 = vst.msk [vmem:[#allocation6 + $0x8] sm:$0xf] %vm1668_vm1, %v3570_v33 }
 0x573   :  { %4049 = vmatprep.mubr.bf16.mxu1 %v6050_v12  ;;  %v6095_v33 = vld [vmem:[%s8994_s4 + $0x10] sm:$0xff]  }
 0x574   :  { %4050 = vmatmul.mubr.bf16.vlgmr.msra.gmra.mrb[60].mxu1 %v5302_v46  ;;  %v8719_v46 = vld [vmem:[%s8998_s8] sm:$0xff] }
 0x575   :  { %v3639_v40 = vpop.permute.xlu1 %3638  ;;  %5642 = vmatpush3.bf16.msra.mxu1 %v6055_v3  ;;  %v3678_v18 = vld [vmem:[#allocation6 + $0x28] sm:$0x77]  ;;  %v3637_v11 = vpop.permute.xlu0 %3636 }
 0x576   :  { %3646 = vst.msk [vmem:[#allocation6 + $0x20] sm:$0xf] %vm1668_vm1, %v3639_v40  ;;  %v5308_v61 = vcombine.high %v3678_v18, %v3678_v18  ;;  %5643 = vmatprep.subr.bf16.mxu1 %v6057_v7  ;;  %3645 = vst.msk [vmem:[#allocation6 + $0xc] sm:$0xf] %vm1668_vm1, %v3637_v11  ;;  %v5307_v22 = vcombine.low %v3678_v18, %v3678_v18  ;;  %v8724_v18 = vld [vmem:[%s8998_s8 + $0x8] sm:$0xff] }
 0x578   :  { %4057 = vmatprep.mubr.bf16.mxu1 %v5308_v61 }
 0x579   :  { %v3641_v56 = vpop.permute.xlu1 %3640  ;;  %5644 = vmatpush3.bf16.msra.mxu1 %v6058_v21  ;;  %v3574_v48 = vpop.permute.xlu0 %3573  ;;  %v6073_v41 = vld [vmem:[#allocation6 + $0x8] ss:$20 sps:$4 sm:$0xff]  }
 0x57a   :  { %3647 = vst.msk [vmem:[#allocation6 + $0x34] sm:$0x7] %vm3426_vm15, %v3641_v56  ;;  %5645 = vmatprep.subr.bf16.mxu1 %v6059_v0  ;;  %3580 = vst.msk [vmem:[#allocation6 + $0x30] sm:$0x7] %vm3426_vm15, %v3574_v48 }
 0x57c   :  { %4058 = vmatmul.mubr.bf16.gmra.mrb[64].mxu1 %v5307_v22 }
 0x57d   :  { %5646 = vmatpush3.bf16.msra.mxu1 %v6060_v10  ;;  %v6062_v16 = vld [vmem:[#allocation6 + $0xc] ss:$20 sps:$4 sm:$0xff]  }
 0x57e   :  { %5647 = vmatprep.subr.bf16.mxu1 %v6061_v14  ;;  %4097 = vmatprep.mubr.bf16.mxu1 %v6062_v16 }
 0x581   :  { %5648 = vmatpush3.bf16.msra.mxu1 %v6064_v32  ;;  %v3679_v43 = vld [vmem:[#allocation6 + $0x30] sm:$0x77] }
 0x582   :  { %5649 = vmatprep.subr.bf16.mxu1 %v6065_v6  ;;  %v5310_v53 = vcombine.high %v3679_v43, %v3679_v43  ;;  %v5309_v34 = vcombine.low %v3679_v43, %v3679_v43 }
 0x585   :  { %5650 = vmatpush3.bf16.msra.mxu1 %v6066_v45  ;;  %v4165_v45 = vld [vmem:[%s8998_s8 + $0x10] sm:$0x3f] }
 0x586   :  { %5651 = vmatprep.subr.bf16.mxu1 %v6067_v62 }
 0x589   :  { %5652 = vmatpush3.bf16.msra.mxu1 %v6068_v20 }
 0x58a   :  { %5653 = vmatprep.subr.bf16.mxu1 %v6069_v24 }
 0x58d   :  { %5654 = vmatpush3.bf16.msra.mxu1 %v6070_v17 }
 0x58e   :  { %5655 = vmatprep.subr.bf16.mxu1 %v6071_v42 }
 0x591   :  { %5656 = vmatpush3.bf16.msra.mxu1 %v6072_v49 }
 0x592   :  { %5675 = vmatprep.subr.bf16.mxu1 %v6090_v5 }
 0x594   :  { %4098 = vmatmul.mubr.bf16.vlgmr.msra.gmra.mrb[68].mxu1 %v6073_v41 }
 0x595   :  { %4105 = vmatprep.mubr.bf16.mxu1 %v5310_v53  ;;  %5676 = vmatpush3.bf16.msra.mxu1 %v6091_v4 }
 0x596   :  { %5677 = vmatprep.subr.bf16.mxu1 %v6092_v59 }
 0x599   :  { %5678 = vmatpush3.bf16.msra.mxu1 %v6093_v31 }
 0x59a   :  { %5679 = vmatprep.subr.bf16.mxu1 %v6094_v25 }
 0x59c   :  { %4106 = vmatmul.mubr.bf16.gmra.mrb[72].mxu1 %v5309_v34 }
 0x59d   :  { %5680 = vmatpush3.bf16.msra.mxu1 %v6095_v33 }
 0x5d0   :  { %v5918_v30 = vpop.f32.mrb[100].mxu0 }
 0x5d1   :  { %v4147_v38 = vpop.f32.mrb[101].mxu0 }
 0x5d2   :  { %v5919_v54 = vpop.f32.mrb[102].mxu0 }
 0x5d3   :  { %v4150_v26 = vpop.f32.mrb[103].mxu0 }
 0x647   :  { %v5629_v2 = vpop.f32.mrb[60].mxu1 }
 0x648   :  { %v5630_v23 = vpop.f32.mrb[61].mxu1 }
 0x649   :  { %v5631_v8 = vadd.f32 %v5630_v23, %v5629_v2  ;;  %v5632_v9 = vpop.f32.mrb[62].mxu1 }
 0x64a   :  { %v5633_v1 = vpop.f32.mrb[63].mxu1 }
 0x64b   :  { %v5634_v37 = vadd.f32 %v5633_v1, %v5632_v9 }
 0x64f   :  { %v5635_v47 = vpop.f32.mrb[64].mxu1 }
 0x650   :  { %v5636_v36 = vpop.f32.mrb[65].mxu1 }
 0x651   :  { %v5637_v57 = vadd.f32 %v5636_v36, %v5635_v47  ;;  %v5638_v19 = vpop.f32.mrb[66].mxu1 }
 0x652   :  { %v5639_v60 = vpop.f32.mrb[67].mxu1 }
 0x667   :  { %v5657_v29 = vpop.f32.mrb[68].mxu1 }
 0x668   :  { %v5658_v50 = vpop.f32.mrb[69].mxu1 }
 0x669   :  { %v5659_v3 = vadd.f32 %v5658_v50, %v5657_v29  ;;  %v5660_v55 = vpop.f32.mrb[70].mxu1 }
 0x66a   :  { %v5661_v13 = vpop.f32.mrb[71].mxu1 }
 0x66b   :  { %v4100_v28 = vadd.f32 %v5659_v3, %v5631_v8  ;;  %v5662_v12 = vadd.f32 %v5661_v13, %v5660_v55  ;;  %v5350_v3 = vld [vmem:[%s8995_s5 + $0x2] ss:$0 sm:$0xff] }
 0x66d   :  { %v4148_v7 = vadd.f32 %v4147_v38, %v4100_v28  ;;  %v4103_v40 = vadd.f32 %v5662_v12, %v5634_v37  ;;  %v5351_v28 = vld [vmem:[%s8996_s6 + $0x2] ss:$0 sm:$0xff] }
 0x66f   :  { %v4166_v21 = vmul.f32 %v8719_v46, %v4148_v7  ;;  %v4151_v11 = vadd.f32 %v4150_v26, %v4103_v40  ;;  %v5663_v61 = vpop.f32.mrb[72].mxu1 }
 0x670   :  { %v5664_v0 = vpop.f32.mrb[73].mxu1 }
 0x671   :  { %v4167_v56 = vmul.f32 %v8724_v18, %v4151_v11  ;;  %v5665_v10 = vadd.f32 %v5664_v0, %v5663_v61  ;;  %v5666_v48 = vpop.f32.mrb[74].mxu1  ;;  %v4169_v14 = vsel %vm9098_vm12, %v4166_v21, 0.0  ;;  %vm9112_vm12 = vmmov %vm9101_vm0 }
 0x672   :  { %v5667_v22 = vpop.f32.mrb[75].mxu1 }
 0x673   :  { %v4170_v32 = vsel %vm9099_vm5, %v4167_v56, 0.0  ;;  %v4108_v16 = vadd.f32 %v5665_v10, %v5637_v57  ;;  %vm9113_vm5 = vcmask 517120  }
 0x674   :  { %v4171_v6 = vadd.f32 %v4170_v32, %v4169_v14 }
 0x675   :  { %v4156_v62 = vadd.f32 %v5918_v30, %v4108_v16 }
 0x677   :  { %v4168_v20 = vmul.f32 %v4165_v45, %v4156_v62 }
 0x679   :  { %v4173_v24 = vsel %vm4172_vm4, %v4168_v20, 0.0 }
 0x67a   :  { %v4174_v17 = vadd.f32 %v4173_v24, %v4171_v6  ;;  %v4234_v24 = vld [vmem:[#allocation5] sm:$0x30] }
 0x67c   :  { %v4175_v42 = vrot.slane %v4174_v17, 4 }
 0x67e   :  { %v4176_v49 = vadd.f32 %v4175_v42, %v4174_v17  ;;  %v4247_v17 = vld [vmem:[#allocation5 + $0x8] sm:$0xc]  ;;  %v4250_v42 = vld [vmem:[#allocation5 + $0x8] sm:$0x30] }
 0x680   :  { %v4177_v43 = vrot.slane %v4176_v49, 2 }
 0x682   :  { %v4178_v41 = vadd.f32 %v4177_v43, %v4176_v49 }
 0x684   :  { %v4179_v53 = vrot.slane %v4178_v41, 1 }
 0x686   :  { %v4180_v34 = vadd.f32 %v4179_v53, %v4178_v41 }
 0x688   :  { %v4181_v38 = vmul.f32 0.125, %v4180_v34  ;;  %v6100_v34 = vld [vmem:[%s8994_s4 + $0x58] sm:$0xff]  }
 0x689   :  { %5681 = vmatprep.subr.bf16.mxu1 %v6100_v34  ;;  %v6117_v34 = vld [vmem:[%s8994_s4 + $0x30] sm:$0xff]  }
 0x68a   :  { %v4182_v54 = vsub.f32 %v4148_v7, %v4181_v38  ;;  %v4183_v26 = vsub.f32 %v4151_v11, %v4181_v38  ;;  %v4184_v2 = vsub.f32 %v4156_v62, %v4181_v38  ;;  %v4231_v62 = vld [vmem:[#allocation5] sm:$0xc]  ;;  %v6101_v38 = vld [vmem:[%s8994_s4 + $0x18] sm:$0xff]  }
 0x68b   :  { %5682 = vmatpush3.bf16.msra.mxu1 %v6101_v38 }
 0x68c   :  { %v4185_v23 = vmul.f32 %v4182_v54, %v8719_v46  ;;  %v4186_v8 = vmul.f32 %v4183_v26, %v8724_v18  ;;  %v4187_v30 = vmul.f32 %v4184_v2, %v4165_v45  ;;  %v6107_v26 = vld [vmem:[%s8994_s4 + $0x20] sm:$0xff]  }
 0x68e   :  { %v4188_v9 = vmul.f32 %v4185_v23, %v4185_v23  ;;  %v4189_v1 = vmul.f32 %v4186_v8, %v4186_v8  ;;  %v4190_v37 = vmul.f32 %v4187_v30, %v4187_v30  ;;  %v6109_v23 = vld [vmem:[%s8994_s4 + $0x90] sm:$0xff]  }
 0x690   :  { %v4191_v47 = vsel %vm9100_vm14, %v4188_v9, 0.0  ;;  %v4192_v36 = vsel %vm9101_vm0, %v4189_v1, 0.0  ;;  %v4194_v19 = vsel %vm4172_vm4, %v4190_v37, 0.0 }
 0x691   :  { %v4193_v57 = vadd.f32 %v4192_v36, %v4191_v47  ;;  %v6079_v47 = vld [vmem:[#allocation5 + $0x8] ss:$0 sps:$4 sm:$0xff]  }
 0x693   :  { %v4195_v60 = vadd.f32 %v4194_v19, %v4193_v57 }
 0x695   :  { %v4196_v5 = vrot.slane %v4195_v60, 4 }
 0x697   :  { %v4197_v4 = vadd.f32 %v4196_v5, %v4195_v60 }
 0x699   :  { %v4198_v59 = vrot.slane %v4197_v4, 2 }
 0x69b   :  { %v4199_v35 = vadd.f32 %v4198_v59, %v4197_v4 }
 0x69d   :  { %v4200_v52 = vrot.slane %v4199_v35, 1 }
 0x69f   :  { %v4201_v29 = vadd.f32 %v4200_v52, %v4199_v35 }
 0x6a1   :  { %v4202_v31 = vmul.f32 0.125, %v4201_v29 }
 0x6a3   :  { %v4203_v50 = vadd.f32 1e-05, %v4202_v31  ;;  %v4299_v31 = vshll.u32 %v6079_v47, 16 }
 0x6a5   :  { %6152 = vrsqrt.f32 %v4203_v50  ;;  %v4303_v50 = vshrl.u32 %v6079_v47, 16 }
 0x6af   :  { %v6153_v25 = vpop.eup %6152 }
 0x6b0   :  { %v4205_v55 = vmul.f32 %v6153_v25, %v4182_v54  ;;  %v4206_v13 = vmul.f32 %v6153_v25, %v4184_v2  ;;  %v6105_v54 = vld [vmem:[%s8994_s4 + $0x60] sm:$0xff]   ;;  %v6108_v2 = vld [vmem:[%s8994_s4 + $0xd0] sm:$0xff]  }
 0x6b1   :  { %5683 = vmatprep.subr.bf16.mxu1 %v6105_v54  ;;  %5707 = vmatprep.subr.bf16.mxu0 %v6108_v2 }
 0x6b2   :  { %v4211_v12 = vmul.f32 %v5350_v3, %v4205_v55  ;;  %v4212_v33 = vmul.f32 %v5350_v3, %v4206_v13  ;;  %5684 = vmatpush3.bf16.msra.mxu1 %v6107_v26  ;;  %5708 = vmatpush3.bf16.msra.mxu0 %v6109_v23  ;;  %v6118_v26 = vld [vmem:[%s8994_s4 + $0xe0] sm:$0xff]  }
 0x6b4   :  { %v4217_v7 = vadd.f32 %v5351_v28, %v4211_v12  ;;  %v4218_v40 = vadd.f32 %v5351_v28, %v4212_v33 }
 0x6b6   :  { %v4219_v21 = vmax.f32 %v4217_v7, 0.0  ;;  %v4220_v11 = vmax.f32 %v4218_v40, 0.0  ;;  %v8783_v7 = vrot.slane %v4299_v31, 5  ;;  %v6124_v31 = vld [vmem:[%s8994_s4 + $0xe8] sm:$0xff]  }
 0x6b8   :  { %v4221_v61 = vpack.c.bf16 %v4219_v21, %v4219_v21  ;;  %v4237_v0 = vpack.c.bf16 %v4220_v11, %v4220_v11  ;;  %v6110_v21 = vld [vmem:[%s8994_s4 + $0x68] sm:$0xff]   ;;  %v4305_v11 = vrot.slane %v4303_v50, 4 }
 0x6b9   :  { %5685 = vmatprep.subr.bf16.mxu1 %v6110_v21 }
 0x6ba   :  { %v4223_v56 = vshrl.u32 %v4221_v61, 16  ;;  %v4226_v10 = vshll.u32 %v4221_v61, 16  ;;  %v4239_v48 = vshrl.u32 %v4237_v0, 16  ;;  %v4242_v22 = vshll.u32 %v4237_v0, 16 }
 0x6bc   :  { %v4225_v14 = vrot.slane %v4223_v56, 5  ;;  %v4228_v32 = vrot.slane %v4226_v10, 6  ;;  %v4241_v16 = vrot.slane %v4239_v48, 5  ;;  %v4244_v6 = vrot.slane %v4242_v22, 6 }
 0x6be   :  { %v4229_v45 = vor.u32 %v4228_v32, %v4225_v14  ;;  %v4245_v20 = vor.u32 %v4244_v6, %v4241_v16  ;;  %v6111_v16 = vld [vmem:[%s8994_s4 + $0x28] sm:$0xff]   ;;  %v6112_v6 = vld [vmem:[%s8994_s4 + $0xd8] sm:$0xff]  }
 0x6bf   :  { %5686 = vmatpush3.bf16.msra.mxu1 %v6111_v16  ;;  %5709 = vmatprep.subr.bf16.mxu0 %v6112_v6 }
 0x6c0   :  { %v4232_v49 = vsel %vm8474_vm9, %v4229_v45, %v4231_v62  ;;  %v4235_v43 = vsel %vm8480_vm13, %v4229_v45, %v4234_v24  ;;  %v4248_v41 = vsel %vm8474_vm9, %v4245_v20, %v4247_v17  ;;  %v4251_v53 = vsel %vm8480_vm13, %v4245_v20, %v4250_v42  ;;  %v6106_v24 = vld [vmem:[#allocation5 + $0x8] ss:$0 sps:$4 sm:$0x77]  }
 0x6c1   :  { %4233 = vst [vmem:[#allocation5] sm:$0xc] %v4232_v49  ;;  %4236 = vst [vmem:[#allocation5] sm:$0x30] %v4235_v43  ;;  %v4306_v45 = vor.u32 %v4305_v11, %v8783_v7  ;;  %v6113_v17 = vld [vmem:[%s8994_s4 + $0x98] sm:$0xff]   ;;  %vm9102_vm9 = vcmask 518144  }
 0x6c2   :  { %4249 = vst [vmem:[#allocation5 + $0x8] sm:$0xc] %v4248_v41  ;;  %4252 = vst [vmem:[#allocation5 + $0x8] sm:$0x30] %v4251_v53  ;;  %v6114_v53 = vld [vmem:[%s8994_s4 + $0x70] sm:$0xff]   ;;  %5710 = vmatpush3.bf16.msra.mxu0 %v6113_v17 }
 0x6c3   :  { %v4307_v38 = vrot.slane %v4306_v45, 4  ;;  %4268 = vst.msk [vmem:[#allocation6 + $0x28] sm:$0x7] %vm9102_vm9, %v6106_v24  ;;  %5687 = vmatprep.subr.bf16.mxu1 %v6114_v53  ;;  %5711 = vmatprep.subr.bf16.mxu0 %v6118_v26  ;;  %v6133_v24 = vld [vmem:[%s8994_s4 + $0xb0] sm:$0xff]   ;;  %vm9103_vm13 = vmmov %vm9102_vm9 }
 0x6c4   :  { %5688 = vmatpush3.bf16.msra.mxu1 %v6117_v34 }
 0x6c8   :  { %v4344_v8 = vld [vmem:[#allocation5] sm:$0xfc] }
 0x6c9   :  { %v4345_v30 = vld [vmem:[#allocation5 + $0x8] sm:$0x1f]  ;;  %v5362_v9 = vcombine.low %v4344_v8, %v4344_v8  ;;  %v5363_v1 = vcombine.high %v4344_v8, %v4344_v8  ;;  %v4269_v57 = vld [vmem:[#allocation5] sm:$0xff] }
 0x6ca   :  { %v5364_v37 = vcombine.low %v4345_v30, %v4345_v30  ;;  %v5365_v36 = vcombine.high %v4345_v30, %v4345_v30  ;;  %v4434_v19 = vld [vmem:[#allocation5] sm:$0xf8]  ;;  %v5355_v60 = vcombine.low %v4269_v57, %v4269_v57  ;;  %v5356_v5 = vcombine.high %v4269_v57, %v4269_v57  ;;  %v8777_v13 = vld [vmem:[#allocation5 + $0x8] sm:$0x3f] }
 0x6cb   :  { %v5371_v4 = vcombine.low %v4434_v19, %v4434_v19  ;;  %v5372_v59 = vcombine.high %v4434_v19, %v4434_v19  ;;  %v5366_v35 = vrot.slane %v5362_v9, 10  ;;  %v4358_v52 = vrot.slane %v5363_v1, 6  ;;  %v6086_v28 = vld [vmem:[#allocation5 + $0x4] ss:$0 sps:$4 sm:$0xff]   ;;  %v4485_v10 = vld [vmem:[#allocation5 + $0x8] sm:$0xff] }
 0x6cc   :  { %v4361_v29 = vrot.slane %v5364_v37, 6  ;;  %v4364_v25 = vrot.slane %v5365_v36, 6  ;;  %v4280_v3 = vshrl.u32 %v5355_v60, 16  ;;  %v4283_v55 = vshll.u32 %v5355_v60, 16  ;;  %4266 = vst.msk [vmem:[#allocation6] sm:$0xf] %vm1122_vm6, %v5355_v60 }
 0x6cd   :  { %4267 = vst.msk [vmem:[#allocation6 + $0x14] sm:$0xf] %vm1122_vm6, %v5356_v5  ;;  %v4359_v12 = vsel %vm8532_vm11, %v5366_v35, %v4358_v52  ;;  %v4360_v33 = vrot.slane %v4358_v52, 4  ;;  %v4289_v56 = vshll.u32 %v5356_v5, 16  ;;  %v4293_v14 = vshrl.u32 %v5356_v5, 16  ;;  %v6120_v1 = vld [vmem:[%s8994_s4 + $0xa0] sm:$0xff]  }
 0x6ce   :  { %v4363_v40 = vrot.slane %v4361_v29, 4  ;;  %4366 = vrot.lane.b32.xlu0 %v4359_v12, %s6184_s27  ;;  %v4282_v61 = vrot.slane %v4280_v3, 4  ;;  %v4285_v0 = vrot.slane %v4283_v55, 5  ;;  %v8793_v32 = vrot.slane %v5371_v4, 11  ;;  %v4320_v9 = vld [vmem:[#allocation5] sm:$0xfe]  ;;  %5712 = vmatpush3.bf16.msra.mxu0 %v6120_v1 }
 0x6cf   :  { %v4362_v48 = vsel %vm8532_vm11, %v4360_v33, %v4361_v29  ;;  %v4291_v20 = vrot.slane %v4289_v56, 5  ;;  %v8803_v44 = vrot.slane %v5372_v59, 7  ;;  %v4295_v42 = vrot.slane %v4293_v14, 4  ;;  %v6121_v37 = vld [vmem:[%s8994_s4 + $0x78] sm:$0xff]   ;;  %5713 = vmatprep.subr.bf16.mxu0 %v6124_v31 }
 0x6d0   :  { %v4365_v22 = vsel %vm8532_vm11, %v4363_v40, %v4364_v25  ;;  %4368 = vrot.lane.b32.xlu1 %v4362_v48, %s6184_s27  ;;  %v4286_v62 = vor.u32 %v4285_v0, %v4282_v61  ;;  %v5373_v49 = vcombine.low %v8777_v13, %v8777_v13  ;;  %v8810_v43 = vcombine.low %v4485_v10, %v4485_v10  ;;  %v6122_v60 = vld [vmem:[#allocation5 + $0x4] ss:$0 sps:$4 sm:$0xff]   ;;  %v6103_v52 = vld [vmem:[#allocation5 + $0x8] ss:$0 sps:$4 sm:$0xff]   ;;  %v6131_v61 = vld [vmem:[%s8994_s4 + $0xf0] sm:$0xff]  }
 0x6d1   :  { %v4495_v41 = vshrl.u32 %v6086_v28, 16  ;;  %v4449_v51 = vsel %vm8066_vm7, %v8793_v32, %v8803_v44  ;;  %v4450_v54 = vrot.slane %v8803_v44, 4  ;;  %v4296_v2 = vor.u32 %v4295_v42, %v4291_v20  ;;  %v6123_v29 = vld [vmem:[%s8994_s4 + $0x38] sm:$0xff]   ;;  %5689 = vmatprep.subr.bf16.mxu1 %v6121_v37  ;;  %4481 = vst.msk [vmem:[#allocation6 + $0xc] sm:$0xf] %vm1122_vm6, %v6122_v60 }
 0x6d2   :  { %v4287_v63 = vrot.slane %v4286_v62, 4  ;;  %v4451_v23 = vrot.slane %v5373_v49, 7  ;;  %v4498_v30 = vshll.u32 %v6086_v28, 16  ;;  %4312 = vrot.lane.b32.xlu0 %v4307_v38, %s6184_s27  ;;  %v4504_v36 = vshll.u32 %v8810_v43, 16  ;;  %v8861_v28 = vld [vmem:[%s8994_s4 + $0x100] sm:$0xff]   ;;  %5690 = vmatpush3.bf16.msra.mxu1 %v6123_v29  ;;  %v6135_v38 = vld [vmem:[%s8994_s4 + $0xf8] sm:$0xff]  }
 0x6d3   :  { %v4497_v8 = vrot.slane %v4495_v41, 4  ;;  %v8838_v57 = vcombine.high %v4485_v10, %v4485_v10  ;;  %v4508_v19 = vshrl.u32 %v8810_v43, 16  ;;  %v4297_v5 = vrot.slane %v4296_v2, 4  ;;  %v4378_v11 = vld [vmem:[#allocation5] sm:$0xfc]  ;;  %5920 = vmatprep.subr.bf16.mxu1 %v8861_v28 }
 0x6d4   :  { %4370 = vrot.lane.b32.xlu1 %v4365_v22, %s6184_s27  ;;  %v4292_v47 = vsel %vm7544_vm10, %v4287_v63, %v4291_v20  ;;  %v4452_v4 = vsel %vm8066_vm7, %v4450_v54, %v4451_v23  ;;  %v4500_v59 = vrot.slane %v4498_v30, 5  ;;  %v5374_v35 = vcombine.high %v8777_v13, %v8777_v13  ;;  %v6126_v13 = vld [vmem:[%s8994_s4 + $0xa8] sm:$0xff]   ;;  %v4379_v53 = vld [vmem:[#allocation5 + $0x8] sm:$0x3f] }
 0x6d5   :  { %v8851_v50 = vrot.slane %v4504_v36, 5  ;;  %v4510_v25 = vrot.slane %v4508_v19, 4  ;;  %v4514_v3 = vshll.u32 %v8838_v57, 16  ;;  %v4453_v55 = vrot.slane %v4451_v23, 4  ;;  %5714 = vmatpush3.bf16.msra.mxu0 %v6126_v13  ;;  %v4469_v34 = vld [vmem:[#allocation5 + $0x8] sm:$0x7f] }
 0x6d6   :  { %v4302_v12 = vsel %vm7544_vm10, %v4297_v5, %v8783_v7  ;;  %v4501_v33 = vor.u32 %v4500_v59, %v4497_v8  ;;  %v4454_v40 = vrot.slane %v5374_v35, 7  ;;  %v4518_v21 = vshrl.u32 %v8838_v57, 16  ;;  %4308 = vrot.lane.b32.xlu0 %v4292_v47, %s6184_s27  ;;  %5715 = vmatprep.subr.bf16.mxu0 %v6131_v61  ;;  %v6142_v23 = vld [vmem:[#allocation5 + $0x4] ss:$0 sps:$4 sm:$0xee]  }
 0x6d7   :  { %v4511_v0 = vor.u32 %v4510_v25, %v8851_v50  ;;  %v4516_v56 = vrot.slane %v4514_v3, 5  ;;  %v5358_v10 = vcombine.low %v4320_v9, %v4320_v9  ;;  %v5359_v48 = vcombine.high %v4320_v9, %v4320_v9  ;;  %v6136_v1 = vld [vmem:[%s8994_s4 + $0xb8] sm:$0xff]  }
 0x6d8   :  { %4310 = vrot.lane.b32.xlu1 %v4302_v12, %s6184_s27  ;;  %v4502_v7 = vrot.slane %v4501_v33, 4  ;;  %v8875_v22 = vsel %vm8066_vm7, %v4453_v55, %v4454_v40  ;;  %v4520_v14 = vrot.slane %v4518_v21, 4  ;;  %v4335_v16 = vrot.slane %v6103_v52, 5  ;;  %vm9105_vm7 = vmmov %vm9102_vm9 }
 0x6d9   :  { %v4512_v6 = vrot.slane %v4511_v0, 4  ;;  %v5361_v45 = vrot.slane %v5358_v10, 9  ;;  %v4332_v62 = vrot.slane %v5359_v48, 5  ;;  %v5367_v20 = vcombine.low %v4378_v11, %v4378_v11  ;;  %5716 = vmatpush3.bf16.msra.mxu0 %v6133_v24  ;;  %vm9106_vm11 = vmmov %vm9105_vm7 }
 0x6da   :  { %v4507_v17 = vsel %vm7544_vm10, %v4502_v7, %v8851_v50  ;;  %v4521_v42 = vor.u32 %v4520_v14, %v4516_v56  ;;  %v4337_v49 = vrot.slane %v4335_v16, 4  ;;  %v5368_v41 = vcombine.high %v4378_v11, %v4378_v11  ;;  %4456 = vrot.lane.b32.xlu0 %v4449_v51, %s6184_s27  ;;  %5717 = vmatprep.subr.bf16.mxu0 %v6135_v38 }
 0x6db   :  { %v4517_v63 = vsel %vm7544_vm10, %v4512_v6, %v4516_v56  ;;  %v4333_v54 = vsel %vm7987_vm2, %v5361_v45, %v4332_v62  ;;  %v4334_v26 = vrot.slane %v4332_v62, 4  ;;  %v4391_v2 = vshrl.u32 %v5367_v20, 16  ;;  %vm9104_vm10 = vmmov %vm9102_vm9 }
 0x6dc   :  { %4458 = vrot.lane.b32.xlu1 %v4452_v4, %s6184_s27  ;;  %v4522_v8 = vrot.slane %v4521_v42, 4  ;;  %4341 = vst.msk [vmem:[#allocation6 + $0x4] sm:$0xf] %vm1122_vm6, %v4333_v54  ;;  %v4394_v39 = vshll.u32 %v5367_v20, 16  ;;  %v4400_v30 = vshrl.u32 %v5368_v41, 16  ;;  %v4403_v32 = vshll.u32 %v5368_v41, 16 }
 0x6dd   :  { %4343 = vst.msk [vmem:[#allocation6 + $0x2c] sm:$0x7] %vm9103_vm13, %v4337_v49  ;;  %v4336_v44 = vsel %vm7987_vm2, %v4334_v26, %v4335_v16  ;;  %v4393_v51 = vrot.slane %v4391_v2, 6  ;;  %v5369_v15 = vcombine.low %v4379_v53, %v4379_v53  ;;  %v5377_v9 = vcombine.low %v4469_v34, %v4469_v34  ;;  %5718 = vmatpush3.bf16.msra.mxu0 %v6136_v1  ;;  %v6134_v41 = vld [vmem:[%s8994_s4 + $0x108] sm:$0xff]  }
 0x6de   :  { %4342 = vst.msk [vmem:[#allocation6 + $0x18] sm:$0xf] %vm1122_vm6, %v4336_v44  ;;  %v4396_v37 = vrot.slane %v4394_v39, 7  ;;  %v4402_v47 = vrot.slane %v4400_v30, 6  ;;  %v4405_v36 = vrot.slane %v4403_v32, 7  ;;  %v5370_v19 = vcombine.high %v4379_v53, %v4379_v53  ;;  %4523 = vrot.lane.b32.xlu0 %v4507_v17, %s6184_s27 }
 0x6df   :  { %v4410_v60 = vshrl.u32 %v5369_v15, 16  ;;  %v4413_v5 = vshll.u32 %v5369_v15, 16  ;;  %4482 = vst.msk [vmem:[#allocation6 + $0x20] sm:$0xf] %vm1122_vm6, %v5377_v9  ;;  %v5378_v4 = vcombine.high %v4469_v34, %v4469_v34  ;;  %v5385_v59 = vrot.slane %v6142_v23, 9  ;;  %v6145_v23 = vld [vmem:[%s8994_s4 + $0x118] sm:$0xff]  }
 0x6e0   :  { %4525 = vrot.lane.b32.xlu1 %v4517_v63, %s6184_s27  ;;  %v4397_v35 = vor.u32 %v4396_v37, %v4393_v51  ;;  %v4406_v52 = vor.u32 %v4405_v36, %v4402_v47  ;;  %v4420_v29 = vshrl.u32 %v5370_v19, 16  ;;  %v4423_v31 = vshll.u32 %v5370_v19, 16  ;;  %v6140_v63 = vld [vmem:[%s8994_s4 + $0x110] sm:$0xff]  }
 0x6e1   :  { %v4412_v50 = vrot.slane %v4410_v60, 6  ;;  %v4415_v25 = vrot.slane %v4413_v5, 7  ;;  %4483 = vst.msk [vmem:[#allocation6 + $0x34] sm:$0x7] %vm9104_vm10, %v5378_v4  ;;  %v4547_v3 = vrot.slane %v8810_v43, 5  ;;  %v4550_v55 = vrot.slane %v8838_v57, 5 }
 0x6e2   :  { %v4398_v13 = vrot.slane %v4397_v35, 4  ;;  %v4408_v12 = vrot.slane %v4406_v52, 4  ;;  %v4422_v33 = vrot.slane %v4420_v29, 6  ;;  %v4425_v40 = vrot.slane %v4423_v31, 7  ;;  %4460 = vrot.lane.b32.xlu0 %v8875_v22, %s6184_s27 }
 0x6e3   :  { %v4416_v21 = vor.u32 %v4415_v25, %v4412_v50  ;;  %v4548_v11 = vsel %vm7987_vm2, %v5385_v59, %v4547_v3  ;;  %v4549_v61 = vrot.slane %v4547_v3, 4  ;;  %v4552_v0 = vrot.slane %v4550_v55, 4 }
 0x6e4   :  { %4527 = vrot.lane.b32.xlu1 %v4522_v8, %s6184_s27  ;;  %v4407_v43 = vsel %vm8616_vm8, %v4398_v13, %v4406_v52  ;;  %4556 = vst.msk [vmem:[#allocation6 + $0x10] sm:$0xf] %vm1122_vm6, %v4548_v11  ;;  %v4426_v10 = vor.u32 %v4425_v40, %v4422_v33 }
 0x6e5   :  { %4431 = vst.msk [vmem:[#allocation6 + $0x8] sm:$0xf] %vm1122_vm6, %v4407_v43  ;;  %v4417_v57 = vsel %vm8616_vm8, %v4408_v12, %v4416_v21  ;;  %v4418_v56 = vrot.slane %v4416_v21, 4  ;;  %v4551_v48 = vsel %vm7987_vm2, %v4549_v61, %v4550_v55  ;;  %vm9108_vm2 = vmmov %vm9101_vm0 }
 0x6e6   :  { %4558 = vst.msk [vmem:[#allocation6 + $0x38] sm:$0x7] %vm9105_vm7, %v4552_v0 }
 0x6e7   :  { %4432 = vst.msk [vmem:[#allocation6 + $0x1c] sm:$0xf] %vm1122_vm6, %v4417_v57  ;;  %4557 = vst.msk [vmem:[#allocation6 + $0x24] sm:$0xf] %vm1122_vm6, %v4551_v48  ;;  %v4427_v7 = vsel %vm8616_vm8, %v4418_v56, %v4426_v10  ;;  %v5052_v10 = vld [vmem:[%s8998_s8 + $0x10] sm:$0x3f] }
 0x6e8   :  { %4433 = vst.msk [vmem:[#allocation6 + $0x30] sm:$0x7] %vm9106_vm11, %v4427_v7  ;;  %vm9107_vm6 = vmmov %vm9101_vm0 }
 0x6e9   :  { %vm9110_vm8 = vmmov %vm9101_vm0 }
 0x6ed   :  { %v6147_v32 = vld [vmem:[#allocation6 + $0x38] ss:$0 sps:$4 sm:$0x77]  }
 0x6ee   :  { %v6143_v8 = vld [vmem:[#allocation6 + $0x10] ss:$20 sps:$4 sm:$0xff]  }
 0x740   :  { %v4367_v22 = vpop.permute.xlu0 %4366 }
 0x741   :  { %4375 = vst.msk [vmem:[#allocation6 + $0x4] sm:$0xf] %vm1668_vm1, %v4367_v22 }
 0x742   :  { %v4369_v14 = vpop.permute.xlu1 %4368 }
 0x743   :  { %4376 = vst.msk [vmem:[#allocation6 + $0x18] sm:$0xf] %vm1668_vm1, %v4369_v14 }
 0x744   :  { %v4313_v16 = vpop.permute.xlu0 %4312 }
 0x745   :  { %4319 = vst.msk [vmem:[#allocation6 + $0x28] sm:$0x7] %vm3426_vm15, %v4313_v16 }
 0x746   :  { %v4371_v58 = vpop.permute.xlu1 %4370 }
 0x747   :  { %4377 = vst.msk [vmem:[#allocation6 + $0x2c] sm:$0x7] %vm3426_vm15, %v4371_v58 }
 0x748   :  { %v4309_v6 = vpop.permute.xlu0 %4308 }
 0x749   :  { %4317 = vst.msk [vmem:[#allocation6] sm:$0xf] %vm1668_vm1, %v4309_v6 }
 0x74a   :  { %v4311_v45 = vpop.permute.xlu1 %4310  ;;  %v6130_v49 = vld [vmem:[#allocation6 + $0x4] ss:$20 sps:$4 sm:$0xff]  }
 0x74b   :  { %4318 = vst.msk [vmem:[#allocation6 + $0x14] sm:$0xf] %vm1668_vm1, %v4311_v45  ;;  %4936 = vmatprep.mubr.bf16.mxu1 %v6130_v49 }
 0x74c   :  { %v4457_v27 = vpop.permute.xlu0 %4456 }
 0x74d   :  { %4465 = vst.msk [vmem:[#allocation6 + $0x8] sm:$0xf] %vm1668_vm1, %v4457_v27 }
 0x74e   :  { %v4459_v62 = vpop.permute.xlu1 %4458  ;;  %v4565_v20 = vld [vmem:[#allocation6 + $0x28] sm:$0x77] }
 0x74f   :  { %4466 = vst.msk [vmem:[#allocation6 + $0x1c] sm:$0xf] %vm1668_vm1, %v4459_v62  ;;  %v5392_v53 = vcombine.high %v4565_v20, %v4565_v20  ;;  %v5391_v2 = vcombine.low %v4565_v20, %v4565_v20 }
 0x750   :  { %v4524_v24 = vpop.permute.xlu0 %4523 }
 0x751   :  { %4532 = vst.msk [vmem:[#allocation6 + $0xc] sm:$0xf] %vm1668_vm1, %v4524_v24 }
 0x752   :  { %v4526_v17 = vpop.permute.xlu1 %4525  ;;  %v6128_v42 = vld [vmem:[#allocation6] ss:$20 sps:$4 sm:$0xff]  }
 0x753   :  { %4533 = vst.msk [vmem:[#allocation6 + $0x20] sm:$0xf] %vm1668_vm1, %v4526_v17  ;;  %4937 = vmatmul.mubr.bf16.vlgmr.msra.gmra.mrb[76].mxu1 %v6128_v42  ;;  %vm9109_vm1 = vmmov %vm9101_vm0 }
 0x754   :  { %v4461_v34 = vpop.permute.xlu0 %4460  ;;  %5921 = vmatpush3.bf16.msra.mxu1 %v8861_v28  ;;  %4944 = vmatprep.mubr.bf16.mxu1 %v5392_v53 }
 0x755   :  { %4467 = vst.msk [vmem:[#allocation6 + $0x30] sm:$0x7] %vm3426_vm15, %v4461_v34  ;;  %5922 = vmatprep.subr.bf16.mxu1 %v6134_v41 }
 0x756   :  { %v4528_v38 = vpop.permute.xlu1 %4527  ;;  %v6137_v54 = vld [vmem:[#allocation6 + $0x8] ss:$20 sps:$4 sm:$0xff]  }
 0x757   :  { %4534 = vst.msk [vmem:[#allocation6 + $0x34] sm:$0x7] %vm3426_vm15, %v4528_v38  ;;  %vm9111_vm15 = vmmov %vm9101_vm0 }
 0x758   :  { %5923 = vmatpush3.bf16.msra.mxu1 %v6134_v41 }
 0x759   :  { %5924 = vmatprep.subr.bf16.mxu1 %v6140_v63 }
 0x75a   :  { %v6139_v26 = vld [vmem:[#allocation6 + $0xc] ss:$20 sps:$4 sm:$0xff]  }
 0x75b   :  { %4984 = vmatprep.mubr.bf16.mxu0 %v6139_v26  ;;  %4945 = vmatmul.mubr.bf16.gmra.mrb[80].mxu1 %v5391_v2 }
 0x75c   :  { %4985 = vmatmul.mubr.bf16.vlgmr.msra.gmra.mrb[104].mxu0 %v6137_v54  ;;  %5925 = vmatpush3.bf16.msra.mxu1 %v6140_v63 }
 0x75d   :  { %5928 = vmatprep.mubr.msk.bf16.mxu1 %vm9107_vm6, %v6143_v8  ;;  %5926 = vmatprep.subr.bf16.mxu1 %v6145_v23 }
 0x75e   :  { %v4566_v28 = vld [vmem:[#allocation6 + $0x30] sm:$0x77] }
 0x75f   :  { %v5394_v39 = vcombine.high %v4566_v28, %v4566_v28  ;;  %v5393_v30 = vcombine.low %v4566_v28, %v4566_v28 }
 0x760   :  { %5927 = vmatpush3.bf16.msra.mxu1 %v6145_v23 }
 0x761   :  { %4992 = vmatprep.mubr.bf16.mxu0 %v5394_v39 }
 0x763   :  { %5929 = vmatmul.mubr.msk.bf16.vlgmr.msra.gmra.mrb[84].mxu1 %vm9108_vm2, %v6147_v32 }
 0x764   :  { %4993 = vmatmul.mubr.bf16.gmra.mrb[108].mxu0 %v5393_v30 }
 0x826   :  { %v5691_v44 = vpop.f32.mrb[76].mxu1 }
 0x827   :  { %v5692_v51 = vpop.f32.mrb[77].mxu1 }
 0x828   :  { %v5693_v15 = vadd.f32 %v5692_v51, %v5691_v44  ;;  %v5694_v9 = vpop.f32.mrb[78].mxu1 }
 0x829   :  { %v5695_v1 = vpop.f32.mrb[79].mxu1 }
 0x82a   :  { %v5696_v37 = vadd.f32 %v5695_v1, %v5694_v9 }
 0x82e   :  { %v5697_v47 = vpop.f32.mrb[80].mxu1 }
 0x82f   :  { %v5719_v36 = vpop.f32.mrb[104].mxu0  ;;  %v5698_v19 = vpop.f32.mrb[81].mxu1 }
 0x830   :  { %v5720_v60 = vpop.f32.mrb[105].mxu0  ;;  %v5699_v5 = vadd.f32 %v5698_v19, %v5697_v47  ;;  %v5700_v59 = vpop.f32.mrb[82].mxu1 }
 0x831   :  { %v5721_v4 = vadd.f32 %v5720_v60, %v5719_v36  ;;  %v5722_v35 = vpop.f32.mrb[106].mxu0  ;;  %v5701_v52 = vpop.f32.mrb[83].mxu1  ;;  %v5434_v36 = vld [vmem:[%s8995_s5 + $0x3] ss:$0 sm:$0xff]  ;;  %s6156_s5 = scalar_lea.vmem %s5119_s21, 128 }
 0x832   :  { %v5723_v29 = vpop.f32.mrb[107].mxu0  ;;  %p6157_p0 = scmp.ne.s32.totalorder %s5119_s21, %s6156_s5  ;;  %p6162_p2 = scmp.lt.s32.totalorder %s6156_s5, %s6156_s5 }
 0x833   :  { %v5724_v31 = vadd.f32 %v5723_v29, %v5722_v35  ;;  %v4987_v50 = vadd.f32 %v5721_v4, %v5693_v15 }
 0x834   :  { %p6163_p3 = por %p6162_p2, %p6161_p1 }
 0x835   :  { %v4990_v25 = vadd.f32 %v5724_v31, %v5696_v37 }
 0x836   :  { %v5930_v55 = vpop.f32.mrb[84].mxu1  ;;  %p6164_p4 = pnand %p6163_p3, %p6157_p0 }
 0x837   :  { %v5725_v3 = vpop.f32.mrb[108].mxu0  ;;  %v5034_v12 = vpop.f32.mrb[85].mxu1 }
 0x838   :  { %v5726_v13 = vpop.f32.mrb[109].mxu0  ;;  %v5035_v40 = vadd.f32 %v5034_v12, %v4987_v50  ;;  %v5931_v11 = vpop.f32.mrb[86].mxu1 }
 0x839   :  { %v5727_v33 = vadd.f32 %v5726_v13, %v5725_v3  ;;  %v5728_v21 = vpop.f32.mrb[110].mxu0  ;;  %v5037_v0 = vpop.f32.mrb[87].mxu1 }
 0x83a   :  { %v5729_v61 = vpop.f32.mrb[111].mxu0  ;;  %v5053_v57 = vmul.f32 %v5035_v40, %v8719_v46  ;;  %v5038_v56 = vadd.f32 %v5037_v0, %v4990_v25 }
 0x83b   :  { %v4995_v43 = vadd.f32 %v5727_v33, %v5699_v5  ;;  %v5435_v5 = vld [vmem:[%s8996_s6 + $0x3] ss:$0 sm:$0xff] }
 0x83c   :  { %v5054_v7 = vmul.f32 %v5038_v56, %v8724_v18  ;;  %v5056_v14 = vsel %vm9109_vm1, %v5053_v57, 0.0 }
 0x83d   :  { %v5043_v48 = vadd.f32 %v5930_v55, %v4995_v43 }
 0x83e   :  { %v5057_v16 = vsel %vm9110_vm8, %v5054_v7, 0.0 }
 0x83f   :  { %v5055_v22 = vmul.f32 %v5052_v10, %v5043_v48  ;;  %v5058_v58 = vadd.f32 %v5057_v16, %v5056_v14 }
 0x841   :  { %v5059_v6 = vsel %vm4172_vm4, %v5055_v22, 0.0 }
 0x842   :  { %v5060_v45 = vadd.f32 %v5059_v6, %v5058_v58 }
 0x844   :  { %v5061_v27 = vrot.slane %v5060_v45, 4 }
 0x846   :  { %v5062_v62 = vadd.f32 %v5061_v27, %v5060_v45 }
 0x848   :  { %v5063_v20 = vrot.slane %v5062_v62, 2 }
 0x84a   :  { %v5064_v24 = vadd.f32 %v5063_v20, %v5062_v62 }
 0x84c   :  { %v5065_v17 = vrot.slane %v5064_v24, 1 }
 0x84e   :  { %v5066_v42 = vadd.f32 %v5065_v17, %v5064_v24 }
 0x850   :  { %v5067_v49 = vmul.f32 0.125, %v5066_v42 }
 0x852   :  { %v5068_v41 = vsub.f32 %v5035_v40, %v5067_v49  ;;  %v5069_v53 = vsub.f32 %v5038_v56, %v5067_v49  ;;  %v5070_v34 = vsub.f32 %v5043_v48, %v5067_v49 }
 0x854   :  { %v5071_v38 = vmul.f32 %v5068_v41, %v8719_v46  ;;  %v5072_v63 = vmul.f32 %v5069_v53, %v8724_v18  ;;  %v5073_v54 = vmul.f32 %v5070_v34, %v5052_v10 }
 0x856   :  { %v5074_v26 = vmul.f32 %v5071_v38, %v5071_v38  ;;  %v5075_v2 = vmul.f32 %v5072_v63, %v5072_v63  ;;  %v5076_v23 = vmul.f32 %v5073_v54, %v5073_v54 }
 0x858   :  { %v5077_v8 = vsel %vm9111_vm15, %v5074_v26, 0.0  ;;  %v5078_v28 = vsel %vm9112_vm12, %v5075_v2, 0.0  ;;  %v5080_v30 = vsel %vm4172_vm4, %v5076_v23, 0.0  ;;  %vm9114_vm4 = vmmov %vm9113_vm5 }
 0x859   :  { %v5079_v39 = vadd.f32 %v5078_v28, %v5077_v8 }
 0x85b   :  { %v5081_v32 = vadd.f32 %v5080_v30, %v5079_v39 }
 0x85d   :  { %v5082_v44 = vrot.slane %v5081_v32, 4 }
 0x85f   :  { %v5083_v51 = vadd.f32 %v5082_v44, %v5081_v32 }
 0x861   :  { %v5084_v15 = vrot.slane %v5083_v51, 2 }
 0x863   :  { %v5085_v9 = vadd.f32 %v5084_v15, %v5083_v51 }
 0x865   :  { %v5086_v1 = vrot.slane %v5085_v9, 1 }
 0x867   :  { %v5087_v46 = vadd.f32 %v5086_v1, %v5085_v9 }
 0x869   :  { %v5088_v37 = vmul.f32 0.125, %v5087_v46 }
 0x86b   :  { %v5089_v18 = vadd.f32 1e-05, %v5088_v37 }
 0x86d   :  { %6154 = vrsqrt.f32 %v5089_v18 }
 0x877   :  { %v6155_v47 = vpop.eup %6154 }
 0x878   :  { %v5091_v19 = vmul.f32 %v6155_v47, %v5068_v41  ;;  %v5092_v60 = vmul.f32 %v6155_v47, %v5070_v34 }
 0x87a   :  { %v5097_v4 = vmul.f32 %v5434_v36, %v5091_v19  ;;  %v5098_v59 = vmul.f32 %v5434_v36, %v5092_v60 }
 0x87c   :  { %v5103_v35 = vadd.f32 %v5435_v5, %v5097_v4  ;;  %v5104_v52 = vadd.f32 %v5435_v5, %v5098_v59 }
 0x87e   :  { %v5105_v29 = vmax.f32 %v5103_v35, 0.0  ;;  %v5106_v31 = vmax.f32 %v5104_v52, 0.0 }
 0x880   :  { %5107 = vst.msk [vmem:[#allocation7] sm:$0x3] %vm9113_vm5, %v5105_v29 }
 0x881   :  { %5109 = vst.msk [vmem:[#allocation7 - $0x2] sm:$0x30] %vm3306_vm3, %v5105_v29  ;;  %5111 = vst.msk [vmem:[#allocation7 + $0x2] sm:$0x30] %vm3306_vm3, %v5106_v31 }
 0x882   :  { %5110 = vst.msk [vmem:[#allocation7 + $0x4] sm:$0x3] %vm9114_vm4, %v5106_v31 }
 0x883   :  { %6167 = shalt.err (!%p6164_p4)
}
 0x884   :  { %s6168_s22 = scalar_lea.hbm %s8999_s9, 128 }
 0x885   :  { %p6169_p5 = scmp.ne.s32.totalorder %s8999_s9, %s6168_s22  ;;  %p6172_p6 = scmp.lt.u32.totalorder %s6168_s22, %s8999_s9 }
 0x887   :  { %p6174_p7 = pnand %p6172_p6, %p6169_p5 }
 0x889   :  { %6177 = shalt.err (!%p6174_p7)
}
 0x88a   :  { %5121 = dma.vmem_to_hbm [thread:$0]  %s5119_s21, 128, %s8999_s9, [#allocation8]  }
 0x88b   :  { %6178 = dma.done.wait [#allocation8], 128  }
 0x88c   :  { %6179 = vsyncadd [#allocation8], 4294967168 }
 0x88d   :  { %5125 = vsyncpa [#allocation8], 1 }

</bundles_post_ra>
